<compile_context>
chip_gen: v7x
topology: tpu7x:2x2x1
jax: 0.10.0
libtpu: 0.0.40
codegen_flags: <defaults>
</compile_context>

<pallas_src>
import jax
import jax.numpy as jnp
from jax.experimental import pallas as pl
from jax.experimental.pallas import tpu as pltpu


# ----------------------------------------------------------------------------
# Pallas kernels
# ----------------------------------------------------------------------------
def conv_pool_kernel(p_ref, w_ref, b_ref, o_ref):
    """Fused conv3x3(stride 2) + bias + ReLU + maxpool2x2, channel-major.

    p_ref: (25*Cin, TM) bf16   one column per pooled output position; each
                               column holds the 5x5xCin input window feeding
                               that position's 2x2 pool window.
    w_ref: (4*Cout, 25*Cin) bf16  3x3 kernel embedded at the 4 pool-window
                               offsets inside the 5x5 window (zeros elsewhere).
    b_ref: (Cout, 1) f32
    o_ref: (Cout, TM) bf16     lane-dense pooled output.
    """
    c = o_ref.shape[0]
    acc = jnp.dot(w_ref[...], p_ref[...], preferred_element_type=jnp.float32)
    m = jnp.maximum(jnp.maximum(acc[0:c], acc[c:2 * c]),
                    jnp.maximum(acc[2 * c:3 * c], acc[3 * c:4 * c]))
    # max(a_i) + b == max(a_i + b) and ReLU is monotone, so this equals
    # maxpool(relu(conv + b)) exactly.
    o_ref[...] = jnp.maximum(m + b_ref[...], 0.0).astype(o_ref.dtype)


def tail_kernel(p_ref, w3_ref, b3_ref, w1_ref, b1_ref, w2_ref, b2_ref, o_ref):
    """conv3 + ReLU + pool3 + flatten + fc_1 + ReLU + fc_2 + Sigmoid.

    p_ref:  (9*NP, 800) bf16  rows ordered (spatial s = h*3+w, image n),
                              images zero-padded to NP = 8 per spatial slot.
    w3_ref: (4, 800, 64) bf16 ; b3_ref: (1, 64) f32
    w1_ref: (9, 64, 10) f32 (NCHW-flatten permutation folded in)
    b1_ref: (1, 10) f32 ; w2_ref: (10, 1) f32 ; b2_ref: (1, 1) f32
    o_ref:  (NP, 1) f32
    """
    p = p_ref[...]

    def mm(i):
        return jnp.dot(p, w3_ref[i], preferred_element_type=jnp.float32)

    t = jnp.maximum(jnp.maximum(mm(0), mm(1)), jnp.maximum(mm(2), mm(3)))
    t = jnp.maximum(t + b3_ref[...], 0.0)                      # (9*NP, 64)

    npad = o_ref.shape[0]
    acc = jnp.zeros((npad, 10), jnp.float32)
    for s in range(9):                                         # static, unrolled
        acc = acc + jnp.dot(t[s * npad:(s + 1) * npad, :], w1_ref[s],
                            preferred_element_type=jnp.float32)
    h = jnp.maximum(acc + b1_ref[...], 0.0)                    # fc_1 + ReLU
    z = jnp.dot(h, w2_ref[...], preferred_element_type=jnp.float32) + b2_ref[...]
    o_ref[...] = 1.0 / (1.0 + jnp.exp(-z))                     # Sigmoid


# ----------------------------------------------------------------------------
# Wrappers
# ----------------------------------------------------------------------------
def _round_up(x, m):
    return ((x + m - 1) // m) * m


def conv_pool(patches, w4, b, *, blocks=1):
    """patches: (25*Cin, M) bf16, w4: (4*Cout, 25*Cin) bf16, b: (Cout, 1) f32.
    Returns the pooled activation, channel-major (Cout, M) bf16."""
    K, M = patches.shape
    cout = w4.shape[0] // 4
    tm = _round_up(pl.cdiv(M, blocks), 128) if blocks > 1 else M
    grid = (pl.cdiv(M, tm),)
    return pl.pallas_call(
        conv_pool_kernel,
        out_shape=jax.ShapeDtypeStruct((cout, M), jnp.bfloat16),
        grid=grid,
        in_specs=[
            pl.BlockSpec((K, tm), lambda i: (0, i)),
            pl.BlockSpec((4 * cout, K), lambda i: (0, 0)),
            pl.BlockSpec((cout, 1), lambda i: (0, 0)),
        ],
        out_specs=pl.BlockSpec((cout, tm), lambda i: (0, i)),
        compiler_params=pltpu.CompilerParams(dimension_semantics=("parallel",)),
    )(patches, w4, b)


def tail(patches, w3, b3, w1, b1, w2, b2, *, n):
    """Fused conv3/pool3/flatten/fc_1/fc_2/sigmoid over the whole batch."""
    npad = patches.shape[0] // 9
    out = pl.pallas_call(
        tail_kernel,
        out_shape=jax.ShapeDtypeStruct((npad, 1), jnp.float32),
    )(patches, w3, b3, w1, b1, w2, b2)
    return out[:n]


# ----------------------------------------------------------------------------
# Patch extraction (XLA strided-slice glue; compute stays in Pallas)
# ----------------------------------------------------------------------------
def _pool_conv_patches(x_cm):
    """x_cm: (Cin, N, H, W) bf16 -> (25*Cin, N*Hp*Wp) patch matrix, where
    (Hp, Wp) is the size AFTER conv(k3, s2) + maxpool(2).  Column (n, i, j)
    holds the 5x5xCin stride-4 window at (4i, 4j)."""
    cin, n, h, w = x_cm.shape
    hp = ((h - 3) // 2 + 1) // 2
    wp = ((w - 3) // 2 + 1) // 2
    cols = [x_cm[:, :, r:r + 4 * (hp - 1) + 1:4, c:c + 4 * (wp - 1) + 1:4]
            for r in range(5) for c in range(5)]
    p = jnp.concatenate(cols, axis=0)               # (25*Cin, N, Hp, Wp)
    return p.reshape(25 * cin, n * hp * wp)


def _tail_patches(x_cm, npad=8):
    """x_cm: (32, N, 13, 13) -> (9*npad, 800) row-major patches for the fused
    conv3/pool3/MLP kernel; rows ordered (spatial, image), images zero-padded
    to npad so per-spatial slices inside the kernel stay 8-sublane aligned."""
    cin, n, h, w = x_cm.shape
    hp = ((h - 3) // 2 + 1) // 2                    # 3
    cols = [x_cm[:, :, r:r + 4 * (hp - 1) + 1:4, c:c + 4 * (hp - 1) + 1:4]
            for r in range(5) for c in range(5)]
    p = jnp.concatenate(cols, axis=0)               # (25*Cin, N, 3, 3)
    p = jnp.transpose(p, (2, 3, 1, 0))              # (3, 3, N, 25*Cin)
    p = p.reshape(hp * hp, n, 25 * cin)
    p = jnp.pad(p, ((0, 0), (0, npad - n), (0, 0)))
    return p.reshape(hp * hp * npad, 25 * cin)


# ----------------------------------------------------------------------------
# Full forward pass (matches CNN.forward semantics)
# ----------------------------------------------------------------------------
@jax.jit
def cnn_forward(x_nchw, kp):
    n = x_nchw.shape[0]
    # NCHW f32 -> channel-major (C, N, H, W) bf16 for the kernels
    x = jnp.transpose(x_nchw, (1, 0, 2, 3)).astype(jnp.bfloat16)

    a1 = conv_pool(_pool_conv_patches(x), kp["w1"], kp["b1"], blocks=2)
    a1 = a1.reshape(16, n, 55, 55)                  # pool(relu(conv1))

    a2 = conv_pool(_pool_conv_patches(a1), kp["w2"], kp["b2"], blocks=1)
    a2 = a2.reshape(32, n, 13, 13)                  # pool(relu(conv2))

    # conv3 + relu + pool3 + flatten + fc_1 + relu + fc_2 + sigmoid
    return tail(_tail_patches(a2), kp["w3"], kp["b3"],
                kp["fw1"], kp["fb1"], kp["fw2"], kp["fb2"], n=n)


# ----------------------------------------------------------------------------
# Params: torch-layout init + one-time conversion to kernel layout
# ----------------------------------------------------------------------------
def init_params(key):
    ks = jax.random.split(key, 10)

    def uniform(k, shape, fan_in):
        bound = 1.0 / jnp.sqrt(fan_in)
        return jax.random.uniform(k, shape, jnp.float32, -bound, bound)

    return {
        # conv weights in torch layout (Cout, Cin, kh, kw)
        "w1": uniform(ks[0], (16, 3, 3, 3), 3 * 9),
        "c1b": uniform(ks[1], (16,), 3 * 9),
        "w2": uniform(ks[2], (32, 16, 3, 3), 16 * 9),
        "c2b": uniform(ks[3], (32,), 16 * 9),
        "w3": uniform(ks[4], (64, 32, 3, 3), 32 * 9),
        "c3b": uniform(ks[5], (64,), 32 * 9),
        # fc weights in torch layout (out_features, in_features)
        "fw1": uniform(ks[6], (10, 576), 576),
        "fb1": uniform(ks[7], (10,), 576),
        "fw2": uniform(ks[8], (1, 10), 10),
        "fb2": uniform(ks[9], (1,), 10),
    }


def prepare_params(p):
    """One-time conversion from torch layout to kernel layout (outside jit)."""

    def embed(w):
        # (Cout, Cin, 3, 3) -> four (Cout, 5, 5, Cin) arrays with the 3x3
        # kernel placed at each 2x2 pool-window offset of the 5x5 window.
        wk = jnp.transpose(w, (0, 2, 3, 1))          # (Cout, kh, kw, Cin)
        outs = []
        for dh in (0, 1):
            for dw in (0, 1):
                z = jnp.zeros((w.shape[0], 5, 5, w.shape[1]), w.dtype)
                outs.append(z.at[:, 2 * dh:2 * dh + 3, 2 * dw:2 * dw + 3, :].set(wk))
        return outs

    def pool_conv_w_cm(w):       # channel-major weight: (4*Cout, 25*Cin) bf16
        cout, cin = w.shape[0], w.shape[1]
        blocks = [z.reshape(cout, 25 * cin) for z in embed(w)]
        return jnp.concatenate(blocks, axis=0).astype(jnp.bfloat16)

    def pool_conv_w_rm(w):       # row-major weight: (4, 25*Cin, Cout) bf16
        cout, cin = w.shape[0], w.shape[1]
        blocks = [jnp.transpose(z, (1, 2, 3, 0)).reshape(25 * cin, cout)
                  for z in embed(w)]
        return jnp.stack(blocks, axis=0).astype(jnp.bfloat16)

    # fc_1 weight: torch (10, 576) over flattened NCHW features c*9 + (h*3+w)
    # -> (9, 64, 10) indexed [spatial, channel, out]; this folds the flatten
    # permutation into the weight, removing the runtime transpose.
    fw1 = jnp.transpose(p["fw1"].reshape(10, 64, 9), (2, 1, 0))

    return {
        "w1": pool_conv_w_cm(p["w1"]), "b1": p["c1b"].reshape(-1, 1),
        "w2": pool_conv_w_cm(p["w2"]), "b2": p["c2b"].reshape(-1, 1),
        "w3": pool_conv_w_rm(p["w3"]), "b3": p["c3b"].reshape(1, -1),
        "fw1": fw1, "fb1": p["fb1"].reshape(1, -1),
        "fw2": p["fw2"].T, "fb2": p["fb2"].reshape(1, -1),
    }


if __name__ == "__main__":
    key = jax.random.PRNGKey(0)
    k_x, k_p = jax.random.split(key)

    # fc_1 expects 576 = 64*3*3 features, which pins the input to 224x224
    # (the canonical size for this module); batch kept small.
    x = jax.random.normal(k_x, (2, 3, 224, 224), dtype=jnp.float32)
    params = prepare_params(init_params(k_p))

    out = cnn_forward(x, params)
    out = jax.block_until_ready(out)

    assert out.shape == (2, 1), out.shape
    assert bool(jnp.all(jnp.isfinite(out)))
    assert bool(jnp.all((out >= 0.0) & (out <= 1.0)))
    print("KERNEL_OK")
</pallas_src>

<mosaic_0001>
module attributes {stable_mosaic.version = 11 : i64} {
  func.func @conv_pool_kernel(%arg0: i32, %arg1: memref<75x3072xbf16, #tpu.memory_space<vmem>>, %arg2: memref<64x75xbf16, #tpu.memory_space<vmem>>, %arg3: memref<16x1xf32, #tpu.memory_space<vmem>>, %arg4: memref<16x3072xbf16, #tpu.memory_space<vmem>>) attributes {dimension_semantics = [#tpu.dimension_semantics<parallel>], iteration_bounds = array<i64: 2>, scalar_prefetch = 0 : i64, scratch_operands = 0 : i64, tpu.core_type = #tpu.core_type<tc>, window_params = [{transform_indices = @transform_0, window_bounds = array<i64: 75, 3072>}, {pipeline_mode = #tpu.pipeline_mode<synchronous>, transform_indices = @transform_1, window_bounds = array<i64: 64, 75>}, {pipeline_mode = #tpu.pipeline_mode<synchronous>, transform_indices = @transform_2, window_bounds = array<i64: 16, 1>}, {transform_indices = @transform_3, window_bounds = array<i64: 16, 3072>}]} {
    %c0 = arith.constant 0 : index
    %c0_0 = arith.constant 0 : index
    %0 = vector.load %arg2[%c0, %c0_0] : memref<64x75xbf16, #tpu.memory_space<vmem>>, vector<64x75xbf16>
    %c0_1 = arith.constant 0 : index
    %c0_2 = arith.constant 0 : index
    %1 = vector.load %arg1[%c0_1, %c0_2] : memref<75x3072xbf16, #tpu.memory_space<vmem>>, vector<75x3072xbf16>
    %cst = arith.constant dense<0.000000e+00> : vector<64x3072xf32>
    %2 = tpu.matmul %0, %1, %cst {dimension_numbers = #tpu.dot_dimension_numbers<[1], [0], [0], [1], [0, 0, 1, 1], [], []>} : vector<64x75xbf16>, vector<75x3072xbf16>, vector<64x3072xf32> -> vector<64x3072xf32>
    %3 = vector.extract_strided_slice %2 {offsets = [0, 0], sizes = [16, 3072], strides = [1, 1]} : vector<64x3072xf32> to vector<16x3072xf32>
    %4 = vector.extract_strided_slice %2 {offsets = [16, 0], sizes = [16, 3072], strides = [1, 1]} : vector<64x3072xf32> to vector<16x3072xf32>
    %5 = arith.maximumf %3, %4 : vector<16x3072xf32>
    %6 = vector.extract_strided_slice %2 {offsets = [32, 0], sizes = [16, 3072], strides = [1, 1]} : vector<64x3072xf32> to vector<16x3072xf32>
    %7 = vector.extract_strided_slice %2 {offsets = [48, 0], sizes = [16, 3072], strides = [1, 1]} : vector<64x3072xf32> to vector<16x3072xf32>
    %8 = arith.maximumf %6, %7 : vector<16x3072xf32>
    %9 = arith.maximumf %5, %8 : vector<16x3072xf32>
    %c0_3 = arith.constant 0 : index
    %c0_4 = arith.constant 0 : index
    %10 = vector.load %arg3[%c0_3, %c0_4] : memref<16x1xf32, #tpu.memory_space<vmem>>, vector<16x1xf32>
    %11 = vector.broadcast %10 : vector<16x1xf32> to vector<16x3072xf32>
    %12 = arith.addf %9, %11 : vector<16x3072xf32>
    %cst_5 = arith.constant 0.000000e+00 : f32
    %13 = vector.broadcast %cst_5 : f32 to vector<16x3072xf32>
    %14 = arith.maximumf %12, %13 : vector<16x3072xf32>
    %15 = arith.truncf %14 : vector<16x3072xf32> to vector<16x3072xbf16>
    %c0_6 = arith.constant 0 : index
    %c0_7 = arith.constant 0 : index
    %16 = vector.load %arg4[%c0_6, %c0_7] : memref<16x3072xbf16, #tpu.memory_space<vmem>>, vector<16x3072xbf16>
    tpu.vector_store %arg4[%c0_6, %c0_7], %15 {strides = array<i32>} : memref<16x3072xbf16, #tpu.memory_space<vmem>>, vector<16x3072xbf16>,
    return
  }
  func.func @transform_0(%arg0: i32) -> (i32, i32) {
    %c0_i32 = arith.constant 0 : i32
    %c0_i32_0 = arith.constant 0 : i32
    return %c0_i32, %arg0 : i32, i32
  }
  func.func @transform_1(%arg0: i32) -> (i32, i32) {
    %c0_i32 = arith.constant 0 : i32
    %c0_i32_0 = arith.constant 0 : i32
    %c0_i32_1 = arith.constant 0 : i32
    return %c0_i32, %c0_i32_0 : i32, i32
  }
  func.func @transform_2(%arg0: i32) -> (i32, i32) {
    %c0_i32 = arith.constant 0 : i32
    %c0_i32_0 = arith.constant 0 : i32
    %c0_i32_1 = arith.constant 0 : i32
    return %c0_i32, %c0_i32_0 : i32, i32
  }
  func.func @transform_3(%arg0: i32) -> (i32, i32) {
    %c0_i32 = arith.constant 0 : i32
    %c0_i32_0 = arith.constant 0 : i32
    return %c0_i32, %arg0 : i32, i32
  }
}

module attributes {stable_mosaic.version = 11 : i64} {
  func.func @conv_pool_kernel(%arg0: i32, %arg1: memref<400x338xbf16, #tpu.memory_space<vmem>>, %arg2: memref<128x400xbf16, #tpu.memory_space<vmem>>, %arg3: memref<32x1xf32, #tpu.memory_space<vmem>>, %arg4: memref<32x338xbf16, #tpu.memory_space<vmem>>) attributes {dimension_semantics = [#tpu.dimension_semantics<parallel>], iteration_bounds = array<i64: 1>, scalar_prefetch = 0 : i64, scratch_operands = 0 : i64, tpu.core_type = #tpu.core_type<tc>, window_params = [{transform_indices = @transform_0, window_bounds = array<i64: 400, 338>}, {pipeline_mode = #tpu.pipeline_mode<synchronous>, transform_indices = @transform_1, window_bounds = array<i64: 128, 400>}, {pipeline_mode = #tpu.pipeline_mode<synchronous>, transform_indices = @transform_2, window_bounds = array<i64: 32, 1>}, {transform_indices = @transform_3, window_bounds = array<i64: 32, 338>}]} {
    %c0 = arith.constant 0 : index
    %c0_0 = arith.constant 0 : index
    %0 = vector.load %arg2[%c0, %c0_0] : memref<128x400xbf16, #tpu.memory_space<vmem>>, vector<128x400xbf16>
    %c0_1 = arith.constant 0 : index
    %c0_2 = arith.constant 0 : index
    %1 = vector.load %arg1[%c0_1, %c0_2] : memref<400x338xbf16, #tpu.memory_space<vmem>>, vector<400x338xbf16>
    %cst = arith.constant dense<0.000000e+00> : vector<128x338xf32>
    %2 = tpu.matmul %0, %1, %cst {dimension_numbers = #tpu.dot_dimension_numbers<[1], [0], [0], [1], [0, 0, 1, 1], [], []>} : vector<128x400xbf16>, vector<400x338xbf16>, vector<128x338xf32> -> vector<128x338xf32>
    %3 = vector.extract_strided_slice %2 {offsets = [0, 0], sizes = [32, 338], strides = [1, 1]} : vector<128x338xf32> to vector<32x338xf32>
    %4 = vector.extract_strided_slice %2 {offsets = [32, 0], sizes = [32, 338], strides = [1, 1]} : vector<128x338xf32> to vector<32x338xf32>
    %5 = arith.maximumf %3, %4 : vector<32x338xf32>
    %6 = vector.extract_strided_slice %2 {offsets = [64, 0], sizes = [32, 338], strides = [1, 1]} : vector<128x338xf32> to vector<32x338xf32>
    %7 = vector.extract_strided_slice %2 {offsets = [96, 0], sizes = [32, 338], strides = [1, 1]} : vector<128x338xf32> to vector<32x338xf32>
    %8 = arith.maximumf %6, %7 : vector<32x338xf32>
    %9 = arith.maximumf %5, %8 : vector<32x338xf32>
    %c0_3 = arith.constant 0 : index
    %c0_4 = arith.constant 0 : index
    %10 = vector.load %arg3[%c0_3, %c0_4] : memref<32x1xf32, #tpu.memory_space<vmem>>, vector<32x1xf32>
    %11 = vector.broadcast %10 : vector<32x1xf32> to vector<32x338xf32>
    %12 = arith.addf %9, %11 : vector<32x338xf32>
    %cst_5 = arith.constant 0.000000e+00 : f32
    %13 = vector.broadcast %cst_5 : f32 to vector<32x338xf32>
    %14 = arith.maximumf %12, %13 : vector<32x338xf32>
    %15 = arith.truncf %14 : vector<32x338xf32> to vector<32x338xbf16>
    %c0_6 = arith.constant 0 : index
    %c0_7 = arith.constant 0 : index
    %16 = vector.load %arg4[%c0_6, %c0_7] : memref<32x338xbf16, #tpu.memory_space<vmem>>, vector<32x338xbf16>
    tpu.vector_store %arg4[%c0_6, %c0_7], %15 {strides = array<i32>} : memref<32x338xbf16, #tpu.memory_space<vmem>>, vector<32x338xbf16>,
    return
  }
  func.func @transform_0(%arg0: i32) -> (i32, i32) {
    %c0_i32 = arith.constant 0 : i32
    %c0_i32_0 = arith.constant 0 : i32
    return %c0_i32, %arg0 : i32, i32
  }
  func.func @transform_1(%arg0: i32) -> (i32, i32) {
    %c0_i32 = arith.constant 0 : i32
    %c0_i32_0 = arith.constant 0 : i32
    %c0_i32_1 = arith.constant 0 : i32
    return %c0_i32, %c0_i32_0 : i32, i32
  }
  func.func @transform_2(%arg0: i32) -> (i32, i32) {
    %c0_i32 = arith.constant 0 : i32
    %c0_i32_0 = arith.constant 0 : i32
    %c0_i32_1 = arith.constant 0 : i32
    return %c0_i32, %c0_i32_0 : i32, i32
  }
  func.func @transform_3(%arg0: i32) -> (i32, i32) {
    %c0_i32 = arith.constant 0 : i32
    %c0_i32_0 = arith.constant 0 : i32
    return %c0_i32, %arg0 : i32, i32
  }
}

module attributes {stable_mosaic.version = 11 : i64} {
  func.func @tail_kernel(%arg0: memref<72x800xbf16, #tpu.memory_space<vmem>>, %arg1: memref<4x800x64xbf16, #tpu.memory_space<vmem>>, %arg2: memref<1x64xf32, #tpu.memory_space<vmem>>, %arg3: memref<9x64x10xf32, #tpu.memory_space<vmem>>, %arg4: memref<1x10xf32, #tpu.memory_space<vmem>>, %arg5: memref<10x1xf32, #tpu.memory_space<vmem>>, %arg6: memref<1x1xf32, #tpu.memory_space<vmem>>, %arg7: memref<8x1xf32, #tpu.memory_space<vmem>>) attributes {dimension_semantics = [], scalar_prefetch = 0 : i64, scratch_operands = 0 : i64, tpu.core_type = #tpu.core_type<tc>} {
    %c0 = arith.constant 0 : index
    %c0_0 = arith.constant 0 : index
    %0 = vector.load %arg0[%c0, %c0_0] : memref<72x800xbf16, #tpu.memory_space<vmem>>, vector<72x800xbf16>
    %c0_1 = arith.constant 0 : index
    %c0_2 = arith.constant 0 : index
    %c0_3 = arith.constant 0 : index
    %1 = vector.load %arg1[%c0_1, %c0_2, %c0_3] : memref<4x800x64xbf16, #tpu.memory_space<vmem>>, vector<1x800x64xbf16>
    %2 = vector.shape_cast %1 : vector<1x800x64xbf16> to vector<800x64xbf16>
    %cst = arith.constant dense<0.000000e+00> : vector<72x64xf32>
    %3 = tpu.matmul %0, %2, %cst {dimension_numbers = #tpu.dot_dimension_numbers<[1], [0], [0], [1], [0, 0, 1, 1], [], []>} : vector<72x800xbf16>, vector<800x64xbf16>, vector<72x64xf32> -> vector<72x64xf32>
    %c1 = arith.constant 1 : index
    %c0_4 = arith.constant 0 : index
    %c0_5 = arith.constant 0 : index
    %4 = vector.load %arg1[%c1, %c0_4, %c0_5] : memref<4x800x64xbf16, #tpu.memory_space<vmem>>, vector<1x800x64xbf16>
    %5 = vector.shape_cast %4 : vector<1x800x64xbf16> to vector<800x64xbf16>
    %cst_6 = arith.constant dense<0.000000e+00> : vector<72x64xf32>
    %6 = tpu.matmul %0, %5, %cst_6 {dimension_numbers = #tpu.dot_dimension_numbers<[1], [0], [0], [1], [0, 0, 1, 1], [], []>} : vector<72x800xbf16>, vector<800x64xbf16>, vector<72x64xf32> -> vector<72x64xf32>
    %7 = arith.maximumf %3, %6 : vector<72x64xf32>
    %c2 = arith.constant 2 : index
    %c0_7 = arith.constant 0 : index
    %c0_8 = arith.constant 0 : index
    %8 = vector.load %arg1[%c2, %c0_7, %c0_8] : memref<4x800x64xbf16, #tpu.memory_space<vmem>>, vector<1x800x64xbf16>
    %9 = vector.shape_cast %8 : vector<1x800x64xbf16> to vector<800x64xbf16>
    %cst_9 = arith.constant dense<0.000000e+00> : vector<72x64xf32>
    %10 = tpu.matmul %0, %9, %cst_9 {dimension_numbers = #tpu.dot_dimension_numbers<[1], [0], [0], [1], [0, 0, 1, 1], [], []>} : vector<72x800xbf16>, vector<800x64xbf16>, vector<72x64xf32> -> vector<72x64xf32>
    %c3 = arith.constant 3 : index
    %c0_10 = arith.constant 0 : index
    %c0_11 = arith.constant 0 : index
    %11 = vector.load %arg1[%c3, %c0_10, %c0_11] : memref<4x800x64xbf16, #tpu.memory_space<vmem>>, vector<1x800x64xbf16>
    %12 = vector.shape_cast %11 : vector<1x800x64xbf16> to vector<800x64xbf16>
    %cst_12 = arith.constant dense<0.000000e+00> : vector<72x64xf32>
    %13 = tpu.matmul %0, %12, %cst_12 {dimension_numbers = #tpu.dot_dimension_numbers<[1], [0], [0], [1], [0, 0, 1, 1], [], []>} : vector<72x800xbf16>, vector<800x64xbf16>, vector<72x64xf32> -> vector<72x64xf32>
    %14 = arith.maximumf %10, %13 : vector<72x64xf32>
    %15 = arith.maximumf %7, %14 : vector<72x64xf32>
    %c0_13 = arith.constant 0 : index
    %c0_14 = arith.constant 0 : index
    %16 = vector.load %arg2[%c0_13, %c0_14] : memref<1x64xf32, #tpu.memory_space<vmem>>, vector<1x64xf32>
    %17 = vector.broadcast %16 : vector<1x64xf32> to vector<72x64xf32>
    %18 = arith.addf %15, %17 : vector<72x64xf32>
    %cst_15 = arith.constant 0.000000e+00 : f32
    %19 = vector.broadcast %cst_15 : f32 to vector<72x64xf32>
    %20 = arith.maximumf %18, %19 : vector<72x64xf32>
    %cst_16 = arith.constant 0.000000e+00 : f32
    %21 = vector.broadcast %cst_16 : f32 to vector<8x10xf32>
    %22 = vector.extract_strided_slice %20 {offsets = [0, 0], sizes = [8, 64], strides = [1, 1]} : vector<72x64xf32> to vector<8x64xf32>
    %c0_17 = arith.constant 0 : index
    %c0_18 = arith.constant 0 : index
    %c0_19 = arith.constant 0 : index
    %23 = vector.load %arg3[%c0_17, %c0_18, %c0_19] : memref<9x64x10xf32, #tpu.memory_space<vmem>>, vector<1x64x10xf32>
    %24 = vector.shape_cast %23 : vector<1x64x10xf32> to vector<64x10xf32>
    %cst_20 = arith.constant dense<0.000000e+00> : vector<8x10xf32>
    %25 = tpu.matmul %22, %24, %cst_20 {dimension_numbers = #tpu.dot_dimension_numbers<[1], [0], [0], [1], [0, 0, 1, 1], [], []>} : vector<8x64xf32>, vector<64x10xf32>, vector<8x10xf32> -> vector<8x10xf32>
    %26 = arith.addf %21, %25 : vector<8x10xf32>
    %27 = vector.extract_strided_slice %20 {offsets = [8, 0], sizes = [8, 64], strides = [1, 1]} : vector<72x64xf32> to vector<8x64xf32>
    %c1_21 = arith.constant 1 : index
    %c0_22 = arith.constant 0 : index
    %c0_23 = arith.constant 0 : index
    %28 = vector.load %arg3[%c1_21, %c0_22, %c0_23] : memref<9x64x10xf32, #tpu.memory_space<vmem>>, vector<1x64x10xf32>
    %29 = vector.shape_cast %28 : vector<1x64x10xf32> to vector<64x10xf32>
    %cst_24 = arith.constant dense<0.000000e+00> : vector<8x10xf32>
    %30 = tpu.matmul %27, %29, %cst_24 {dimension_numbers = #tpu.dot_dimension_numbers<[1], [0], [0], [1], [0, 0, 1, 1], [], []>} : vector<8x64xf32>, vector<64x10xf32>, vector<8x10xf32> -> vector<8x10xf32>
    %31 = arith.addf %26, %30 : vector<8x10xf32>
    %32 = vector.extract_strided_slice %20 {offsets = [16, 0], sizes = [8, 64], strides = [1, 1]} : vector<72x64xf32> to vector<8x64xf32>
    %c2_25 = arith.constant 2 : index
    %c0_26 = arith.constant 0 : index
    %c0_27 = arith.constant 0 : index
    %33 = vector.load %arg3[%c2_25, %c0_26, %c0_27] : memref<9x64x10xf32, #tpu.memory_space<vmem>>, vector<1x64x10xf32>
    %34 = vector.shape_cast %33 : vector<1x64x10xf32> to vector<64x10xf32>
    %cst_28 = arith.constant dense<0.000000e+00> : vector<8x10xf32>
    %35 = tpu.matmul %32, %34, %cst_28 {dimension_numbers = #tpu.dot_dimension_numbers<[1], [0], [0], [1], [0, 0, 1, 1], [], []>} : vector<8x64xf32>, vector<64x10xf32>, vector<8x10xf32> -> vector<8x10xf32>
    %36 = arith.addf %31, %35 : vector<8x10xf32>
    %37 = vector.extract_strided_slice %20 {offsets = [24, 0], sizes = [8, 64], strides = [1, 1]} : vector<72x64xf32> to vector<8x64xf32>
    %c3_29 = arith.constant 3 : index
    %c0_30 = arith.constant 0 : index
    %c0_31 = arith.constant 0 : index
    %38 = vector.load %arg3[%c3_29, %c0_30, %c0_31] : memref<9x64x10xf32, #tpu.memory_space<vmem>>, vector<1x64x10xf32>
    %39 = vector.shape_cast %38 : vector<1x64x10xf32> to vector<64x10xf32>
    %cst_32 = arith.constant dense<0.000000e+00> : vector<8x10xf32>
    %40 = tpu.matmul %37, %39, %cst_32 {dimension_numbers = #tpu.dot_dimension_numbers<[1], [0], [0], [1], [0, 0, 1, 1], [], []>} : vector<8x64xf32>, vector<64x10xf32>, vector<8x10xf32> -> vector<8x10xf32>
    %41 = arith.addf %36, %40 : vector<8x10xf32>
    %42 = vector.extract_strided_slice %20 {offsets = [32, 0], sizes = [8, 64], strides = [1, 1]} : vector<72x64xf32> to vector<8x64xf32>
    %c4 = arith.constant 4 : index
    %c0_33 = arith.constant 0 : index
    %c0_34 = arith.constant 0 : index
    %43 = vector.load %arg3[%c4, %c0_33, %c0_34] : memref<9x64x10xf32, #tpu.memory_space<vmem>>, vector<1x64x10xf32>
    %44 = vector.shape_cast %43 : vector<1x64x10xf32> to vector<64x10xf32>
    %cst_35 = arith.constant dense<0.000000e+00> : vector<8x10xf32>
    %45 = tpu.matmul %42, %44, %cst_35 {dimension_numbers = #tpu.dot_dimension_numbers<[1], [0], [0], [1], [0, 0, 1, 1], [], []>} : vector<8x64xf32>, vector<64x10xf32>, vector<8x10xf32> -> vector<8x10xf32>
    %46 = arith.addf %41, %45 : vector<8x10xf32>
    %47 = vector.extract_strided_slice %20 {offsets = [40, 0], sizes = [8, 64], strides = [1, 1]} : vector<72x64xf32> to vector<8x64xf32>
    %c5 = arith.constant 5 : index
    %c0_36 = arith.constant 0 : index
    %c0_37 = arith.constant 0 : index
    %48 = vector.load %arg3[%c5, %c0_36, %c0_37] : memref<9x64x10xf32, #tpu.memory_space<vmem>>, vector<1x64x10xf32>
    %49 = vector.shape_cast %48 : vector<1x64x10xf32> to vector<64x10xf32>
    %cst_38 = arith.constant dense<0.000000e+00> : vector<8x10xf32>
    %50 = tpu.matmul %47, %49, %cst_38 {dimension_numbers = #tpu.dot_dimension_numbers<[1], [0], [0], [1], [0, 0, 1, 1], [], []>} : vector<8x64xf32>, vector<64x10xf32>, vector<8x10xf32> -> vector<8x10xf32>
    %51 = arith.addf %46, %50 : vector<8x10xf32>
    %52 = vector.extract_strided_slice %20 {offsets = [48, 0], sizes = [8, 64], strides = [1, 1]} : vector<72x64xf32> to vector<8x64xf32>
    %c6 = arith.constant 6 : index
    %c0_39 = arith.constant 0 : index
    %c0_40 = arith.constant 0 : index
    %53 = vector.load %arg3[%c6, %c0_39, %c0_40] : memref<9x64x10xf32, #tpu.memory_space<vmem>>, vector<1x64x10xf32>
    %54 = vector.shape_cast %53 : vector<1x64x10xf32> to vector<64x10xf32>
    %cst_41 = arith.constant dense<0.000000e+00> : vector<8x10xf32>
    %55 = tpu.matmul %52, %54, %cst_41 {dimension_numbers = #tpu.dot_dimension_numbers<[1], [0], [0], [1], [0, 0, 1, 1], [], []>} : vector<8x64xf32>, vector<64x10xf32>, vector<8x10xf32> -> vector<8x10xf32>
    %56 = arith.addf %51, %55 : vector<8x10xf32>
    %57 = vector.extract_strided_slice %20 {offsets = [56, 0], sizes = [8, 64], strides = [1, 1]} : vector<72x64xf32> to vector<8x64xf32>
    %c7 = arith.constant 7 : index
    %c0_42 = arith.constant 0 : index
    %c0_43 = arith.constant 0 : index
    %58 = vector.load %arg3[%c7, %c0_42, %c0_43] : memref<9x64x10xf32, #tpu.memory_space<vmem>>, vector<1x64x10xf32>
    %59 = vector.shape_cast %58 : vector<1x64x10xf32> to vector<64x10xf32>
    %cst_44 = arith.constant dense<0.000000e+00> : vector<8x10xf32>
    %60 = tpu.matmul %57, %59, %cst_44 {dimension_numbers = #tpu.dot_dimension_numbers<[1], [0], [0], [1], [0, 0, 1, 1], [], []>} : vector<8x64xf32>, vector<64x10xf32>, vector<8x10xf32> -> vector<8x10xf32>
    %61 = arith.addf %56, %60 : vector<8x10xf32>
    %62 = vector.extract_strided_slice %20 {offsets = [64, 0], sizes = [8, 64], strides = [1, 1]} : vector<72x64xf32> to vector<8x64xf32>
    %c8 = arith.constant 8 : index
    %c0_45 = arith.constant 0 : index
    %c0_46 = arith.constant 0 : index
    %63 = vector.load %arg3[%c8, %c0_45, %c0_46] : memref<9x64x10xf32, #tpu.memory_space<vmem>>, vector<1x64x10xf32>
    %64 = vector.shape_cast %63 : vector<1x64x10xf32> to vector<64x10xf32>
    %cst_47 = arith.constant dense<0.000000e+00> : vector<8x10xf32>
    %65 = tpu.matmul %62, %64, %cst_47 {dimension_numbers = #tpu.dot_dimension_numbers<[1], [0], [0], [1], [0, 0, 1, 1], [], []>} : vector<8x64xf32>, vector<64x10xf32>, vector<8x10xf32> -> vector<8x10xf32>
    %66 = arith.addf %61, %65 : vector<8x10xf32>
    %c0_48 = arith.constant 0 : index
    %c0_49 = arith.constant 0 : index
    %67 = vector.load %arg4[%c0_48, %c0_49] : memref<1x10xf32, #tpu.memory_space<vmem>>, vector<1x10xf32>
    %68 = vector.broadcast %67 : vector<1x10xf32> to vector<8x10xf32>
    %69 = arith.addf %66, %68 : vector<8x10xf32>
    %cst_50 = arith.constant 0.000000e+00 : f32
    %70 = vector.broadcast %cst_50 : f32 to vector<8x10xf32>
    %71 = arith.maximumf %69, %70 : vector<8x10xf32>
    %c0_51 = arith.constant 0 : index
    %c0_52 = arith.constant 0 : index
    %72 = vector.load %arg5[%c0_51, %c0_52] : memref<10x1xf32, #tpu.memory_space<vmem>>, vector<10x1xf32>
    %cst_53 = arith.constant dense<0.000000e+00> : vector<8x1xf32>
    %73 = tpu.matmul %71, %72, %cst_53 {dimension_numbers = #tpu.dot_dimension_numbers<[1], [0], [0], [1], [0, 0, 1, 1], [], []>} : vector<8x10xf32>, vector<10x1xf32>, vector<8x1xf32> -> vector<8x1xf32>
    %c0_54 = arith.constant 0 : index
    %c0_55 = arith.constant 0 : index
    %74 = vector.load %arg6[%c0_54, %c0_55] : memref<1x1xf32, #tpu.memory_space<vmem>>, vector<1x1xf32>
    %75 = vector.broadcast %74 : vector<1x1xf32> to vector<8x1xf32>
    %76 = arith.addf %73, %75 : vector<8x1xf32>
    %cst_56 = arith.constant 0.000000e+00 : f32
    %77 = vector.broadcast %cst_56 : f32 to vector<8x1xf32>
    %78 = arith.subf %77, %76 : vector<8x1xf32>
    %79 = math.exp %78 : vector<8x1xf32>
    %cst_57 = arith.constant 1.000000e+00 : f32
    %80 = vector.broadcast %cst_57 : f32 to vector<8x1xf32>
    %81 = arith.addf %80, %79 : vector<8x1xf32>
    %cst_58 = arith.constant 1.000000e+00 : f32
    %82 = vector.broadcast %cst_58 : f32 to vector<8x1xf32>
    %83 = arith.divf %82, %81 : vector<8x1xf32>
    %c0_59 = arith.constant 0 : index
    %c0_60 = arith.constant 0 : index
    %84 = vector.load %arg7[%c0_59, %c0_60] : memref<8x1xf32, #tpu.memory_space<vmem>>, vector<8x1xf32>
    tpu.vector_store %arg7[%c0_59, %c0_60], %83 {strides = array<i32>} : memref<8x1xf32, #tpu.memory_space<vmem>>, vector<8x1xf32>,
    return
  }
}

</mosaic_0001>

<bundles_post_ra>
// kernel: cnn_forward.3
= control target key start
LH: loop header
LB: loop body
LE: loop exit
PB: predicated region body
PF: predicated region fallthrough
CT: control target
= control target key end

     0   :  { %s2975_s12 = smov 0   ;;  %s2977_s13 = smov 0   ;;  %s3790_s0 = inlined_call_operand.vmem [shape: bf16[75,6050], index: 0, kind: input, shape index: {}]   ;;  %s3791_s1 = inlined_call_operand.vmem [shape: bf16[64,75], index: 1, kind: input, shape index: {}]   ;;  %s3792_s2 = inlined_call_operand.vmem [shape: f32[16,1], index: 2, kind: input, shape index: {}]   ;;  %s3793_s3 = inlined_call_operand.vmem [shape: bf16[16,6050], index: 3, kind: output, shape index: {}]  }
   0x1   :  { %s2979_s14 = smov 0  }
   0x2 LB: > { %s2664_s15 = sadd.s32 4294967295, %s2951_s14   ;;  %s2992_s16 = sadd.s32 1, %s2951_s14   ;;  %s2951_s14 = sphi %s2979_s14, %s3797_s14   ;;  %s2947_s13 = sphi %s2977_s13, %s3796_s13   ;;  %s2943_s12 = sphi %s2975_s12, %s3795_s12  }
   0x3   : > { %s17_s17 = ssub.s32 %s2951_s14, %s2992_s16  ;;  %s20_s18 = sadd.s32 1, %s2947_s13 }
   0x4   : > { %p18_p0 = scmp.eq.s32.totalorder %s17_s17, 0  ;;  %p27_p1 = scmp.ne.s32.totalorder %s2947_s13, %s2943_s12 }
   0x5   : > { %p28_p2 = scmp.eq.s32.totalorder %s2951_s14, 0  ;;  %p99_p3 = scmp.eq.s32.totalorder %s2664_s15, 1 }
   0x6   : > { %s3003_s19 = scalar_select %p18_p0, %s2947_s13, %s20_s18  }
   0x7   : > { %p29_p4 = por %p28_p2, %p27_p1  ;;  %p3005_p5 = por %p99_p3, %p27_p1 }
   0x8   : > { %p2667_p6 = scmp.ge.s32.totalorder %s2951_s14, 2 }
   0xa   : > { %127 = sbr.rel (%p2667_p6) target bundleno = 82 (0x52), region = 24 }
  0x11   : > { %130 = sbr.rel (!%p29_p4) target bundleno = 82 (0x52), region = 28  ;;  %s132_s21 = sand.u32 (%p29_p4), 1, %s2947_s13  }
  0x12   : > { %s2869_s22 = smul.u32 (%p29_p4), 96, %s2951_s14 }
  0x13   : > { %s2895_s23 = smul.u32 (%p29_p4), 960, %s132_s21 }
  0x14   : > { %s3015_s26 = scalar_lea.vmem (%p29_p4), %s3790_s0, %s2869_s22 }
  0x15   : > { %v150_v0 = vld [vmem:[%s3015_s26] sm:$0xff] (%p29_p4)  ;;  %v152_v1 = vld [vmem:[%s3015_s26 + $0x8] sm:$0xff] (%p29_p4)  ;;  %v154_v2 = vld [vmem:[%s3015_s26 + $0x10] sm:$0xff] (%p29_p4)  ;;  %s3020_s27 = scalar_lea.vmem (%p29_p4), [#allocation2], %s2895_s23 }
  0x16   : > { %151 = vst [vmem:[%s3020_s27] sm:$0xff] (%p29_p4), %v150_v0  ;;  %153 = vst [vmem:[%s3020_s27 + $0x8] sm:$0xff] (%p29_p4), %v152_v1  ;;  %v156_v3 = vld [vmem:[%s3015_s26 + $0x18] sm:$0xff] (%p29_p4)  ;;  %v158_v4 = vld [vmem:[%s3015_s26 + $0x20] sm:$0xff] (%p29_p4) }
  0x17   : > { %155 = vst [vmem:[%s3020_s27 + $0x10] sm:$0xff] (%p29_p4), %v154_v2  ;;  %v160_v5 = vld [vmem:[%s3015_s26 + $0x28] sm:$0xff] (%p29_p4)  ;;  %157 = vst [vmem:[%s3020_s27 + $0x18] sm:$0xff] (%p29_p4), %v156_v3  ;;  %v162_v6 = vld [vmem:[%s3015_s26 + $0x30] sm:$0xff] (%p29_p4) }
  0x18   : > { %159 = vst [vmem:[%s3020_s27 + $0x20] sm:$0xff] %v158_v4  ;;  %161 = vst [vmem:[%s3020_s27 + $0x28] sm:$0xff] %v160_v5  ;;  %v164_v7 = vld [vmem:[%s3015_s26 + $0x38] sm:$0xff]  ;;  %v166_v8 = vld [vmem:[%s3015_s26 + $0x40] sm:$0xff] }
  0x19   : > { %163 = vst [vmem:[%s3020_s27 + $0x30] sm:$0xff] %v162_v6  ;;  %165 = vst [vmem:[%s3020_s27 + $0x38] sm:$0xff] %v164_v7  ;;  %v168_v9 = vld [vmem:[%s3015_s26 + $0x48] sm:$0xff]  ;;  %v170_v10 = vld [vmem:[%s3015_s26 + $0x50] sm:$0xff] }
  0x1a   : > { %167 = vst [vmem:[%s3020_s27 + $0x40] sm:$0xff] %v166_v8  ;;  %v172_v11 = vld [vmem:[%s3015_s26 + $0x58] sm:$0xff]  ;;  %169 = vst [vmem:[%s3020_s27 + $0x48] sm:$0xff] %v168_v9  ;;  %v174_v12 = vld [vmem:[%s3015_s26 + $0xc0] sm:$0xff] }
  0x1b   : > { %171 = vst [vmem:[%s3020_s27 + $0x50] sm:$0xff] %v170_v10  ;;  %173 = vst [vmem:[%s3020_s27 + $0x58] sm:$0xff] %v172_v11  ;;  %v176_v13 = vld [vmem:[%s3015_s26 + $0xc8] sm:$0xff]  ;;  %v178_v14 = vld [vmem:[%s3015_s26 + $0xd0] sm:$0xff] }
  0x1c   : > { %175 = vst [vmem:[%s3020_s27 + $0x60] sm:$0xff] %v174_v12  ;;  %177 = vst [vmem:[%s3020_s27 + $0x68] sm:$0xff] %v176_v13  ;;  %v180_v15 = vld [vmem:[%s3015_s26 + $0xd8] sm:$0xff]  ;;  %v182_v16 = vld [vmem:[%s3015_s26 + $0xe0] sm:$0xff] }
  0x1d   : > { %179 = vst [vmem:[%s3020_s27 + $0x70] sm:$0xff] %v178_v14  ;;  %v184_v17 = vld [vmem:[%s3015_s26 + $0xe8] sm:$0xff]  ;;  %181 = vst [vmem:[%s3020_s27 + $0x78] sm:$0xff] %v180_v15  ;;  %v186_v18 = vld [vmem:[%s3015_s26 + $0xf0] sm:$0xff] }
  0x1e   : > { %183 = vst [vmem:[%s3020_s27 + $0x80] sm:$0xff] %v182_v16  ;;  %185 = vst [vmem:[%s3020_s27 + $0x88] sm:$0xff] %v184_v17  ;;  %v188_v19 = vld [vmem:[%s3015_s26 + $0xf8] sm:$0xff]  ;;  %v190_v20 = vld [vmem:[%s3015_s26 + $0x100] sm:$0xff] }
  0x1f   : > { %187 = vst [vmem:[%s3020_s27 + $0x90] sm:$0xff] %v186_v18  ;;  %189 = vst [vmem:[%s3020_s27 + $0x98] sm:$0xff] %v188_v19  ;;  %v192_v21 = vld [vmem:[%s3015_s26 + $0x108] sm:$0xff]  ;;  %v194_v22 = vld [vmem:[%s3015_s26 + $0x110] sm:$0xff] }
  0x20   : > { %191 = vst [vmem:[%s3020_s27 + $0xa0] sm:$0xff] %v190_v20  ;;  %v196_v23 = vld [vmem:[%s3015_s26 + $0x118] sm:$0xff]  ;;  %193 = vst [vmem:[%s3020_s27 + $0xa8] sm:$0xff] %v192_v21  ;;  %v198_v24 = vld [vmem:[%s3015_s26 + $0x180] sm:$0xff] }
  0x21   : > { %195 = vst [vmem:[%s3020_s27 + $0xb0] sm:$0xff] %v194_v22  ;;  %197 = vst [vmem:[%s3020_s27 + $0xb8] sm:$0xff] %v196_v23  ;;  %v200_v25 = vld [vmem:[%s3015_s26 + $0x188] sm:$0xff]  ;;  %v202_v26 = vld [vmem:[%s3015_s26 + $0x190] sm:$0xff] }
  0x22   : > { %199 = vst [vmem:[%s3020_s27 + $0xc0] sm:$0xff] %v198_v24  ;;  %201 = vst [vmem:[%s3020_s27 + $0xc8] sm:$0xff] %v200_v25  ;;  %v204_v27 = vld [vmem:[%s3015_s26 + $0x198] sm:$0xff]  ;;  %v206_v28 = vld [vmem:[%s3015_s26 + $0x1a0] sm:$0xff] }
  0x23   : > { %203 = vst [vmem:[%s3020_s27 + $0xd0] sm:$0xff] %v202_v26  ;;  %v208_v29 = vld [vmem:[%s3015_s26 + $0x1a8] sm:$0xff]  ;;  %205 = vst [vmem:[%s3020_s27 + $0xd8] sm:$0xff] %v204_v27  ;;  %v210_v30 = vld [vmem:[%s3015_s26 + $0x1b0] sm:$0xff] }
  0x24   : > { %207 = vst [vmem:[%s3020_s27 + $0xe0] sm:$0xff] %v206_v28  ;;  %209 = vst [vmem:[%s3020_s27 + $0xe8] sm:$0xff] %v208_v29  ;;  %v212_v31 = vld [vmem:[%s3015_s26 + $0x1b8] sm:$0xff]  ;;  %v214_v32 = vld [vmem:[%s3015_s26 + $0x1c0] sm:$0xff] }
  0x25   : > { %211 = vst [vmem:[%s3020_s27 + $0xf0] sm:$0xff] %v210_v30  ;;  %213 = vst [vmem:[%s3020_s27 + $0xf8] sm:$0xff] %v212_v31  ;;  %v216_v33 = vld [vmem:[%s3015_s26 + $0x1c8] sm:$0xff]  ;;  %v218_v34 = vld [vmem:[%s3015_s26 + $0x1d0] sm:$0xff] }
  0x26   : > { %215 = vst [vmem:[%s3020_s27 + $0x100] sm:$0xff] %v214_v32  ;;  %v220_v35 = vld [vmem:[%s3015_s26 + $0x1d8] sm:$0xff]  ;;  %217 = vst [vmem:[%s3020_s27 + $0x108] sm:$0xff] %v216_v33  ;;  %v222_v36 = vld [vmem:[%s3015_s26 + $0x240] sm:$0xff] }
  0x27   : > { %219 = vst [vmem:[%s3020_s27 + $0x110] sm:$0xff] %v218_v34  ;;  %221 = vst [vmem:[%s3020_s27 + $0x118] sm:$0xff] %v220_v35  ;;  %v224_v37 = vld [vmem:[%s3015_s26 + $0x248] sm:$0xff]  ;;  %v226_v38 = vld [vmem:[%s3015_s26 + $0x250] sm:$0xff] }
  0x28   : > { %223 = vst [vmem:[%s3020_s27 + $0x120] sm:$0xff] %v222_v36  ;;  %225 = vst [vmem:[%s3020_s27 + $0x128] sm:$0xff] %v224_v37  ;;  %v228_v39 = vld [vmem:[%s3015_s26 + $0x258] sm:$0xff]  ;;  %v230_v40 = vld [vmem:[%s3015_s26 + $0x260] sm:$0xff] }
  0x29   : > { %227 = vst [vmem:[%s3020_s27 + $0x130] sm:$0xff] %v226_v38  ;;  %v232_v41 = vld [vmem:[%s3015_s26 + $0x268] sm:$0xff]  ;;  %229 = vst [vmem:[%s3020_s27 + $0x138] sm:$0xff] %v228_v39  ;;  %v234_v42 = vld [vmem:[%s3015_s26 + $0x270] sm:$0xff] }
  0x2a   : > { %231 = vst [vmem:[%s3020_s27 + $0x140] sm:$0xff] %v230_v40  ;;  %233 = vst [vmem:[%s3020_s27 + $0x148] sm:$0xff] %v232_v41  ;;  %v236_v43 = vld [vmem:[%s3015_s26 + $0x278] sm:$0xff]  ;;  %v238_v44 = vld [vmem:[%s3015_s26 + $0x280] sm:$0xff] }
  0x2b   : > { %235 = vst [vmem:[%s3020_s27 + $0x150] sm:$0xff] %v234_v42  ;;  %237 = vst [vmem:[%s3020_s27 + $0x158] sm:$0xff] %v236_v43  ;;  %v240_v45 = vld [vmem:[%s3015_s26 + $0x288] sm:$0xff]  ;;  %v242_v46 = vld [vmem:[%s3015_s26 + $0x290] sm:$0xff] }
  0x2c   : > { %239 = vst [vmem:[%s3020_s27 + $0x160] sm:$0xff] %v238_v44  ;;  %v244_v47 = vld [vmem:[%s3015_s26 + $0x298] sm:$0xff]  ;;  %241 = vst [vmem:[%s3020_s27 + $0x168] sm:$0xff] %v240_v45  ;;  %v246_v48 = vld [vmem:[%s3015_s26 + $0x300] sm:$0xff] }
  0x2d   : > { %243 = vst [vmem:[%s3020_s27 + $0x170] sm:$0xff] %v242_v46  ;;  %245 = vst [vmem:[%s3020_s27 + $0x178] sm:$0xff] %v244_v47  ;;  %v248_v49 = vld [vmem:[%s3015_s26 + $0x308] sm:$0xff]  ;;  %v250_v50 = vld [vmem:[%s3015_s26 + $0x310] sm:$0xff] }
  0x2e   : > { %247 = vst [vmem:[%s3020_s27 + $0x180] sm:$0xff] %v246_v48  ;;  %249 = vst [vmem:[%s3020_s27 + $0x188] sm:$0xff] %v248_v49  ;;  %v252_v51 = vld [vmem:[%s3015_s26 + $0x318] sm:$0xff]  ;;  %v254_v52 = vld [vmem:[%s3015_s26 + $0x320] sm:$0xff] }
  0x2f   : > { %251 = vst [vmem:[%s3020_s27 + $0x190] sm:$0xff] %v250_v50  ;;  %v256_v53 = vld [vmem:[%s3015_s26 + $0x328] sm:$0xff]  ;;  %253 = vst [vmem:[%s3020_s27 + $0x198] sm:$0xff] %v252_v51  ;;  %v258_v54 = vld [vmem:[%s3015_s26 + $0x330] sm:$0xff] }
  0x30   : > { %255 = vst [vmem:[%s3020_s27 + $0x1a0] sm:$0xff] %v254_v52  ;;  %257 = vst [vmem:[%s3020_s27 + $0x1a8] sm:$0xff] %v256_v53  ;;  %v260_v55 = vld [vmem:[%s3015_s26 + $0x338] sm:$0xff]  ;;  %v262_v56 = vld [vmem:[%s3015_s26 + $0x340] sm:$0xff] }
  0x31   : > { %259 = vst [vmem:[%s3020_s27 + $0x1b0] sm:$0xff] %v258_v54  ;;  %261 = vst [vmem:[%s3020_s27 + $0x1b8] sm:$0xff] %v260_v55  ;;  %v264_v57 = vld [vmem:[%s3015_s26 + $0x348] sm:$0xff]  ;;  %v266_v58 = vld [vmem:[%s3015_s26 + $0x350] sm:$0xff] }
  0x32   : > { %263 = vst [vmem:[%s3020_s27 + $0x1c0] sm:$0xff] %v262_v56  ;;  %v268_v59 = vld [vmem:[%s3015_s26 + $0x358] sm:$0xff]  ;;  %265 = vst [vmem:[%s3020_s27 + $0x1c8] sm:$0xff] %v264_v57  ;;  %v270_v60 = vld [vmem:[%s3015_s26 + $0x3c0] sm:$0xff] }
  0x33   : > { %267 = vst [vmem:[%s3020_s27 + $0x1d0] sm:$0xff] %v266_v58  ;;  %269 = vst [vmem:[%s3020_s27 + $0x1d8] sm:$0xff] %v268_v59  ;;  %v272_v61 = vld [vmem:[%s3015_s26 + $0x3c8] sm:$0xff]  ;;  %v274_v62 = vld [vmem:[%s3015_s26 + $0x3d0] sm:$0xff] }
  0x34   : > { %271 = vst [vmem:[%s3020_s27 + $0x1e0] sm:$0xff] %v270_v60  ;;  %273 = vst [vmem:[%s3020_s27 + $0x1e8] sm:$0xff] %v272_v61  ;;  %v276_v63 = vld [vmem:[%s3015_s26 + $0x3d8] sm:$0xff]  ;;  %v278_v0 = vld [vmem:[%s3015_s26 + $0x3e0] sm:$0xff] }
  0x35   : > { %275 = vst [vmem:[%s3020_s27 + $0x1f0] sm:$0xff] %v274_v62  ;;  %v280_v1 = vld [vmem:[%s3015_s26 + $0x3e8] sm:$0xff]  ;;  %277 = vst [vmem:[%s3020_s27 + $0x1f8] sm:$0xff] %v276_v63  ;;  %v282_v2 = vld [vmem:[%s3015_s26 + $0x3f0] sm:$0xff] }
  0x36   : > { %279 = vst [vmem:[%s3020_s27 + $0x200] sm:$0xff] %v278_v0  ;;  %281 = vst [vmem:[%s3020_s27 + $0x208] sm:$0xff] %v280_v1  ;;  %v284_v3 = vld [vmem:[%s3015_s26 + $0x3f8] sm:$0xff]  ;;  %v286_v4 = vld [vmem:[%s3015_s26 + $0x400] sm:$0xff] }
  0x37   : > { %283 = vst [vmem:[%s3020_s27 + $0x210] sm:$0xff] %v282_v2  ;;  %285 = vst [vmem:[%s3020_s27 + $0x218] sm:$0xff] %v284_v3  ;;  %v288_v5 = vld [vmem:[%s3015_s26 + $0x408] sm:$0xff]  ;;  %v290_v6 = vld [vmem:[%s3015_s26 + $0x410] sm:$0xff] }
  0x38   : > { %287 = vst [vmem:[%s3020_s27 + $0x220] sm:$0xff] %v286_v4  ;;  %v292_v7 = vld [vmem:[%s3015_s26 + $0x418] sm:$0xff]  ;;  %289 = vst [vmem:[%s3020_s27 + $0x228] sm:$0xff] %v288_v5  ;;  %v294_v8 = vld [vmem:[%s3015_s26 + $0x480] sm:$0xff] }
  0x39   : > { %291 = vst [vmem:[%s3020_s27 + $0x230] sm:$0xff] %v290_v6  ;;  %293 = vst [vmem:[%s3020_s27 + $0x238] sm:$0xff] %v292_v7  ;;  %v296_v9 = vld [vmem:[%s3015_s26 + $0x488] sm:$0xff]  ;;  %v298_v10 = vld [vmem:[%s3015_s26 + $0x490] sm:$0xff] }
  0x3a   : > { %295 = vst [vmem:[%s3020_s27 + $0x240] sm:$0xff] %v294_v8  ;;  %297 = vst [vmem:[%s3020_s27 + $0x248] sm:$0xff] %v296_v9  ;;  %v300_v11 = vld [vmem:[%s3015_s26 + $0x498] sm:$0xff]  ;;  %v302_v12 = vld [vmem:[%s3015_s26 + $0x4a0] sm:$0xff] }
  0x3b   : > { %299 = vst [vmem:[%s3020_s27 + $0x250] sm:$0xff] %v298_v10  ;;  %v304_v13 = vld [vmem:[%s3015_s26 + $0x4a8] sm:$0xff]  ;;  %301 = vst [vmem:[%s3020_s27 + $0x258] sm:$0xff] %v300_v11  ;;  %v306_v14 = vld [vmem:[%s3015_s26 + $0x4b0] sm:$0xff] }
  0x3c   : > { %303 = vst [vmem:[%s3020_s27 + $0x260] sm:$0xff] %v302_v12  ;;  %305 = vst [vmem:[%s3020_s27 + $0x268] sm:$0xff] %v304_v13  ;;  %v308_v15 = vld [vmem:[%s3015_s26 + $0x4b8] sm:$0xff]  ;;  %v310_v16 = vld [vmem:[%s3015_s26 + $0x4c0] sm:$0xff] }
  0x3d   : > { %307 = vst [vmem:[%s3020_s27 + $0x270] sm:$0xff] %v306_v14  ;;  %309 = vst [vmem:[%s3020_s27 + $0x278] sm:$0xff] %v308_v15  ;;  %v312_v17 = vld [vmem:[%s3015_s26 + $0x4c8] sm:$0xff]  ;;  %v314_v18 = vld [vmem:[%s3015_s26 + $0x4d0] sm:$0xff] }
  0x3e   : > { %311 = vst [vmem:[%s3020_s27 + $0x280] sm:$0xff] %v310_v16  ;;  %v316_v19 = vld [vmem:[%s3015_s26 + $0x4d8] sm:$0xff]  ;;  %313 = vst [vmem:[%s3020_s27 + $0x288] sm:$0xff] %v312_v17  ;;  %v318_v20 = vld [vmem:[%s3015_s26 + $0x540] sm:$0xff] }
  0x3f   : > { %315 = vst [vmem:[%s3020_s27 + $0x290] sm:$0xff] %v314_v18  ;;  %317 = vst [vmem:[%s3020_s27 + $0x298] sm:$0xff] %v316_v19  ;;  %v320_v21 = vld [vmem:[%s3015_s26 + $0x548] sm:$0xff]  ;;  %v322_v22 = vld [vmem:[%s3015_s26 + $0x550] sm:$0xff] }
  0x40   : > { %319 = vst [vmem:[%s3020_s27 + $0x2a0] sm:$0xff] %v318_v20  ;;  %321 = vst [vmem:[%s3020_s27 + $0x2a8] sm:$0xff] %v320_v21  ;;  %v324_v23 = vld [vmem:[%s3015_s26 + $0x558] sm:$0xff]  ;;  %v326_v24 = vld [vmem:[%s3015_s26 + $0x560] sm:$0xff] }
  0x41   : > { %323 = vst [vmem:[%s3020_s27 + $0x2b0] sm:$0xff] %v322_v22  ;;  %v328_v25 = vld [vmem:[%s3015_s26 + $0x568] sm:$0xff]  ;;  %325 = vst [vmem:[%s3020_s27 + $0x2b8] sm:$0xff] %v324_v23  ;;  %v330_v26 = vld [vmem:[%s3015_s26 + $0x570] sm:$0xff] }
  0x42   : > { %327 = vst [vmem:[%s3020_s27 + $0x2c0] sm:$0xff] %v326_v24  ;;  %329 = vst [vmem:[%s3020_s27 + $0x2c8] sm:$0xff] %v328_v25  ;;  %v332_v27 = vld [vmem:[%s3015_s26 + $0x578] sm:$0xff]  ;;  %v334_v28 = vld [vmem:[%s3015_s26 + $0x580] sm:$0xff] }
  0x43   : > { %331 = vst [vmem:[%s3020_s27 + $0x2d0] sm:$0xff] %v330_v26  ;;  %333 = vst [vmem:[%s3020_s27 + $0x2d8] sm:$0xff] %v332_v27  ;;  %v336_v29 = vld [vmem:[%s3015_s26 + $0x588] sm:$0xff]  ;;  %v338_v30 = vld [vmem:[%s3015_s26 + $0x590] sm:$0xff] }
  0x44   : > { %335 = vst [vmem:[%s3020_s27 + $0x2e0] sm:$0xff] %v334_v28  ;;  %v340_v31 = vld [vmem:[%s3015_s26 + $0x598] sm:$0xff]  ;;  %337 = vst [vmem:[%s3020_s27 + $0x2e8] sm:$0xff] %v336_v29  ;;  %v342_v32 = vld [vmem:[%s3015_s26 + $0x600] sm:$0xff] }
  0x45   : > { %339 = vst [vmem:[%s3020_s27 + $0x2f0] sm:$0xff] %v338_v30  ;;  %341 = vst [vmem:[%s3020_s27 + $0x2f8] sm:$0xff] %v340_v31  ;;  %v344_v33 = vld [vmem:[%s3015_s26 + $0x608] sm:$0xff]  ;;  %v346_v34 = vld [vmem:[%s3015_s26 + $0x610] sm:$0xff] }
  0x46   : > { %343 = vst [vmem:[%s3020_s27 + $0x300] sm:$0xff] %v342_v32  ;;  %345 = vst [vmem:[%s3020_s27 + $0x308] sm:$0xff] %v344_v33  ;;  %v348_v35 = vld [vmem:[%s3015_s26 + $0x618] sm:$0xff]  ;;  %v350_v36 = vld [vmem:[%s3015_s26 + $0x620] sm:$0xff] }
  0x47   : > { %347 = vst [vmem:[%s3020_s27 + $0x310] sm:$0xff] %v346_v34  ;;  %v352_v37 = vld [vmem:[%s3015_s26 + $0x628] sm:$0xff]  ;;  %349 = vst [vmem:[%s3020_s27 + $0x318] sm:$0xff] %v348_v35  ;;  %v354_v38 = vld [vmem:[%s3015_s26 + $0x630] sm:$0xff] }
  0x48   : > { %351 = vst [vmem:[%s3020_s27 + $0x320] sm:$0xff] %v350_v36  ;;  %353 = vst [vmem:[%s3020_s27 + $0x328] sm:$0xff] %v352_v37  ;;  %v356_v39 = vld [vmem:[%s3015_s26 + $0x638] sm:$0xff]  ;;  %v358_v40 = vld [vmem:[%s3015_s26 + $0x640] sm:$0xff] }
  0x49   : > { %355 = vst [vmem:[%s3020_s27 + $0x330] sm:$0xff] %v354_v38  ;;  %357 = vst [vmem:[%s3020_s27 + $0x338] sm:$0xff] %v356_v39  ;;  %v360_v41 = vld [vmem:[%s3015_s26 + $0x648] sm:$0xff]  ;;  %v362_v42 = vld [vmem:[%s3015_s26 + $0x650] sm:$0xff] }
  0x4a   : > { %359 = vst [vmem:[%s3020_s27 + $0x340] sm:$0xff] %v358_v40  ;;  %v364_v43 = vld [vmem:[%s3015_s26 + $0x658] sm:$0xff]  ;;  %361 = vst [vmem:[%s3020_s27 + $0x348] sm:$0xff] %v360_v41  ;;  %v366_v44 = vld [vmem:[%s3015_s26 + $0x6c0] sm:$0xff] }
  0x4b   : > { %363 = vst [vmem:[%s3020_s27 + $0x350] sm:$0xff] %v362_v42  ;;  %365 = vst [vmem:[%s3020_s27 + $0x358] sm:$0xff] %v364_v43  ;;  %v368_v45 = vld [vmem:[%s3015_s26 + $0x6c8] sm:$0xff]  ;;  %v370_v46 = vld [vmem:[%s3015_s26 + $0x6d0] sm:$0xff] }
  0x4c   : > { %367 = vst [vmem:[%s3020_s27 + $0x360] sm:$0xff] %v366_v44  ;;  %369 = vst [vmem:[%s3020_s27 + $0x368] sm:$0xff] %v368_v45  ;;  %v372_v47 = vld [vmem:[%s3015_s26 + $0x6d8] sm:$0xff]  ;;  %v374_v48 = vld [vmem:[%s3015_s26 + $0x6e0] sm:$0xff] }
  0x4d   : > { %371 = vst [vmem:[%s3020_s27 + $0x370] sm:$0xff] %v370_v46  ;;  %v376_v49 = vld [vmem:[%s3015_s26 + $0x6e8] sm:$0xff]  ;;  %373 = vst [vmem:[%s3020_s27 + $0x378] sm:$0xff] %v372_v47  ;;  %v378_v50 = vld [vmem:[%s3015_s26 + $0x6f0] sm:$0xff] }
  0x4e   : > { %375 = vst [vmem:[%s3020_s27 + $0x380] sm:$0xff] %v374_v48  ;;  %377 = vst [vmem:[%s3020_s27 + $0x388] sm:$0xff] %v376_v49  ;;  %v380_v51 = vld [vmem:[%s3015_s26 + $0x6f8] sm:$0xff]  ;;  %v382_v52 = vld [vmem:[%s3015_s26 + $0x700] sm:$0xff] }
  0x4f   : > { %379 = vst [vmem:[%s3020_s27 + $0x390] sm:$0xff] %v378_v50  ;;  %381 = vst [vmem:[%s3020_s27 + $0x398] sm:$0xff] %v380_v51  ;;  %v384_v53 = vld [vmem:[%s3015_s26 + $0x708] sm:$0xff]  ;;  %v386_v54 = vld [vmem:[%s3015_s26 + $0x710] sm:$0xff] }
  0x50   : > { %383 = vst [vmem:[%s3020_s27 + $0x3a0] sm:$0xff] %v382_v52  ;;  %v388_v55 = vld [vmem:[%s3015_s26 + $0x718] sm:$0xff]  ;;  %385 = vst [vmem:[%s3020_s27 + $0x3a8] sm:$0xff] %v384_v53 }
  0x51   : > { %387 = vst [vmem:[%s3020_s27 + $0x3b0] sm:$0xff] %v386_v54  ;;  %389 = vst [vmem:[%s3020_s27 + $0x3b8] sm:$0xff] %v388_v55 }
  0x52 PF: > { %p2669_p7 = scmp.ge.s32.totalorder %s2951_s14, 1  ;;  %p394_p8 = scmp.lt.s32.totalorder %s2951_s14, 3 }
  0x54   : > { %p395_p9 = pnand %p2669_p7, %p394_p8 }
  0x55   : > { %s401_s28 = sand.u32 (!%p395_p9), 1, %s2943_s12   ;;  %v2953_v56 = vmov (!%p395_p9), 0   ;;  %vm1163_vm0 = vcmask (!%p395_p9), 1044480   ;;  %vm1164_vm1 = vcmask (!%p395_p9), 1045504   ;;  %v2954_v21 = vmov (!%p395_p9), 65535   ;;  %v3302_v46 = vld [vmem:[%s3791_s1] sm:$0xff] (!%p395_p9)  }
  0x56   : > { %398 = sbr.rel (%p395_p9) target bundleno = 532 (0x214), region = 51  ;;  %1271 = vmatprep.mubr.bf16.mxu0 (!%p395_p9), %v2953_v56  ;;  %1344 = vmatprep.mubr.bf16.mxu1 (!%p395_p9), %v2953_v56  ;;  %v1165_v22 = vsel (!%p395_p9), %vm1163_vm0, 4294967295, %v2954_v21  ;;  %vm1150_vm2 = vcmask (!%p395_p9), 613376  }
  0x57   : > { %s2896_s29 = smul.u32 (!%p395_p9), 960, %s401_s28  ;;  %2924 = vset.pattern.permute.xlu0 (!%p395_p9), %v2953_v56  ;;  %v3289_v30 = vsel (!%p395_p9), %vm1164_vm1, %v1165_v22, 0 }
  0x58   : > { %s2897_s23 = smul.u32 (!%p395_p9), 192, %s401_s28 }
  0x59   : > { %s3267_s30 = scalar_lea.vmem (!%p395_p9), [#allocation2], %s2896_s29 }
  0x5a   : > { %v434_v57 = vld [vmem:[%s3267_s30] sm:$0xff] (!%p395_p9)  ;;  %v435_v59 = vld [vmem:[%s3267_s30 + $0x8] sm:$0xff] (!%p395_p9)  ;;  %v436_v38 = vld [vmem:[%s3267_s30 + $0x10] sm:$0xff] (!%p395_p9)  ;;  %s3657_s12 = scalar_lea.vmem (!%p395_p9), [#allocation3], %s2897_s23 }
  0x5b   : > { %v446_v58 = vld [vmem:[%s3267_s30 + $0x60] sm:$0xff] (!%p395_p9)  ;;  %v447_v61 = vld [vmem:[%s3267_s30 + $0x68] sm:$0xff] (!%p395_p9)  ;;  %v448_v39 = vld [vmem:[%s3267_s30 + $0x70] sm:$0xff] (!%p395_p9) }
  0x5c   : > { %v2675_v60 = vcombine.high (!%p395_p9), %v434_v57, %v446_v58  ;;  %v2674_v62 = vcombine.low (!%p395_p9), %v434_v57, %v446_v58  ;;  %v458_v63 = vld [vmem:[%s3267_s30 + $0xc0] sm:$0xff] (!%p395_p9)  ;;  %v2677_v1 = vcombine.high (!%p395_p9), %v435_v59, %v447_v61  ;;  %v2676_v2 = vcombine.low (!%p395_p9), %v435_v59, %v447_v61  ;;  %v459_v4 = vld [vmem:[%s3267_s30 + $0xc8] sm:$0xff] (!%p395_p9)  ;;  %v437_v40 = vld [vmem:[%s3267_s30 + $0x18] sm:$0xff] (!%p395_p9) }
  0x5d   : > { %v470_v0 = vld [vmem:[%s3267_s30 + $0x120] sm:$0xff]  ;;  %v471_v5 = vld [vmem:[%s3267_s30 + $0x128] sm:$0xff]  ;;  %v449_v41 = vld [vmem:[%s3267_s30 + $0x78] sm:$0xff]  ;;  %v2679_v44 = vcombine.high %v436_v38, %v448_v39  ;;  %v2678_v49 = vcombine.low %v436_v38, %v448_v39  ;;  %s2894_s24 = smul.u32 (%p3005_p5), 96, %s2664_s15 }
  0x5e   : > { %v2699_v3 = vcombine.high %v458_v63, %v470_v0  ;;  %v482_v6 = vld [vmem:[%s3267_s30 + $0x180] sm:$0xff]  ;;  %1239 = vmatprep.subr.bf16.mxu0 %v2675_v60  ;;  %v2701_v7 = vcombine.high %v459_v4, %v471_v5  ;;  %v483_v9 = vld [vmem:[%s3267_s30 + $0x188] sm:$0xff]  ;;  %1312 = vmatprep.subr.bf16.mxu1 %v2677_v1  ;;  %v2698_v11 = vcombine.low %v458_v63, %v470_v0  ;;  %v460_v47 = vld [vmem:[%s3267_s30 + $0xd0] sm:$0xff] }
  0x5f   : > { %v494_v8 = vld [vmem:[%s3267_s30 + $0x1e0] sm:$0xff]  ;;  %v495_v10 = vld [vmem:[%s3267_s30 + $0x1e8] sm:$0xff]  ;;  %1240 = vmatpush1.bf16.msra.mxu0 %v2674_v62  ;;  %1313 = vmatpush1.bf16.msra.mxu1 %v2676_v2  ;;  %v2700_v12 = vcombine.low %v459_v4, %v471_v5  ;;  %v2681_v45 = vcombine.high %v437_v40, %v449_v41  ;;  %v472_v48 = vld [vmem:[%s3267_s30 + $0x130] sm:$0xff]  ;;  %v2680_v52 = vcombine.low %v437_v40, %v449_v41  ;;  %s3736_s25 = scalar_lea.vmem (%p3005_p5), %s3793_s3, %s2894_s24 }
  0x60   : > { %1241 = vmatprep.subr.bf16.mxu0 %v2699_v3  ;;  %v2723_v13 = vcombine.high %v482_v6, %v494_v8  ;;  %v506_v14 = vld [vmem:[%s3267_s30 + $0x240] sm:$0xff]  ;;  %1314 = vmatprep.subr.bf16.mxu1 %v2701_v7  ;;  %v2725_v16 = vcombine.high %v483_v9, %v495_v10  ;;  %v507_v17 = vld [vmem:[%s3267_s30 + $0x248] sm:$0xff]  ;;  %v2722_v25 = vcombine.low %v482_v6, %v494_v8  ;;  %v461_v50 = vld [vmem:[%s3267_s30 + $0xd8] sm:$0xff] }
  0x61   : > { %v518_v15 = vld [vmem:[%s3267_s30 + $0x2a0] sm:$0xff]  ;;  %v519_v20 = vld [vmem:[%s3267_s30 + $0x2a8] sm:$0xff]  ;;  %v2724_v26 = vcombine.low %v483_v9, %v495_v10  ;;  %v473_v51 = vld [vmem:[%s3267_s30 + $0x138] sm:$0xff]  ;;  %v2703_v53 = vcombine.high %v460_v47, %v472_v48  ;;  %v2702_v60 = vcombine.low %v460_v47, %v472_v48 }
  0x62   : > { %v530_v18 = vld [vmem:[%s3267_s30 + $0x300] sm:$0xff]  ;;  %v531_v23 = vld [vmem:[%s3267_s30 + $0x308] sm:$0xff]  ;;  %v2747_v27 = vcombine.high %v506_v14, %v518_v15  ;;  %v2749_v29 = vcombine.high %v507_v17, %v519_v20  ;;  %v2746_v32 = vcombine.low %v506_v14, %v518_v15  ;;  %v2748_v34 = vcombine.low %v507_v17, %v519_v20  ;;  %v484_v54 = vld [vmem:[%s3267_s30 + $0x190] sm:$0xff] }
  0x63   : > { %v542_v19 = vld [vmem:[%s3267_s30 + $0x360] sm:$0x33]  ;;  %v543_v24 = vld [vmem:[%s3267_s30 + $0x368] sm:$0x33]  ;;  %1242 = vmatpush1.bf16.msra.mxu0 %v2698_v11  ;;  %1315 = vmatpush1.bf16.msra.mxu1 %v2700_v12  ;;  %v496_v55 = vld [vmem:[%s3267_s30 + $0x1f0] sm:$0xff]  ;;  %v2705_v57 = vcombine.high %v461_v50, %v473_v51  ;;  %v2704_v62 = vcombine.low %v461_v50, %v473_v51 }
  0x64   : > { %1243 = vmatprep.subr.bf16.mxu0 %v2723_v13  ;;  %v2771_v28 = vcombine.high %v530_v18, %v542_v19  ;;  %1316 = vmatprep.subr.bf16.mxu1 %v2725_v16  ;;  %v2773_v31 = vcombine.high %v531_v23, %v543_v24  ;;  %v2770_v33 = vcombine.low %v530_v18, %v542_v19  ;;  %v485_v58 = vld [vmem:[%s3267_s30 + $0x198] sm:$0xff]  ;;  %v3317_v61 = vld [vmem:[%s3267_s30 + $0x250] sm:$0xff]  ;;  %v3323_v63 = vld [vmem:[%s3791_s1 + $0x8] sm:$0xff]  }
  0x65   : > { %v2772_v36 = vcombine.low %v531_v23, %v543_v24  ;;  %v497_v59 = vld [vmem:[%s3267_s30 + $0x1f8] sm:$0xff]  ;;  %v2727_v0 = vcombine.high %v484_v54, %v496_v55  ;;  %v520_v1 = vld [vmem:[%s3267_s30 + $0x2b0] sm:$0xff]  ;;  %v2726_v8 = vcombine.low %v484_v54, %v496_v55  ;;  %v539_v38 = vld [vmem:[%s3267_s30 + $0x348] sm:$0xff] }
  0x66   : > { %v1171_v35 = vand.u32 %v2771_v28, %v3289_v30  ;;  %v1177_v37 = vand.u32 %v2773_v31, %v3289_v30  ;;  %v1168_v42 = vand.u32 %v2770_v33, %v3289_v30  ;;  %v3327_v2 = vld [vmem:[%s3267_s30 + $0x310] sm:$0xff]  ;;  %v2729_v4 = vcombine.high %v485_v58, %v497_v59  ;;  %v3334_v5 = vld [vmem:[%s3267_s30 + $0x318] sm:$0xff]  ;;  %v2259_v28 = vld [vmem:[%s3792_s2] sm:$0xff] }
  0x67   : > { %1244 = vmatpush1.bf16.msra.mxu0 %v2722_v25  ;;  %1317 = vmatpush1.bf16.msra.mxu1 %v2724_v26  ;;  %v1174_v43 = vand.u32 %v2772_v36, %v3289_v30  ;;  %v3330_v3 = vld [vmem:[%s3267_s30 + $0x370] sm:$0x33]  ;;  %v3337_v6 = vld [vmem:[%s3267_s30 + $0x378] sm:$0x33]  ;;  %v2728_v12 = vcombine.low %v485_v58, %v497_v59  ;;  %v2751_v18 = vcombine.high %v3317_v61, %v520_v1  ;;  %v538_v36 = vld [vmem:[%s3267_s30 + $0x340] sm:$0xff] }
  0x68   : > { %1245 = vmatprep.subr.bf16.mxu0 %v2747_v27  ;;  %1318 = vmatprep.subr.bf16.mxu1 %v2749_v29  ;;  %v536_v7 = vld [vmem:[%s3267_s30 + $0x330] sm:$0xff]  ;;  %v537_v10 = vld [vmem:[%s3267_s30 + $0x338] sm:$0xff]  ;;  %v2775_v19 = vcombine.high %v3327_v2, %v3330_v3  ;;  %v2777_v21 = vcombine.high %v3334_v5, %v3337_v6  ;;  %v2750_v27 = vcombine.low %v3317_v61, %v520_v1  ;;  %v3387_v39 = vld [vmem:[%s3267_s30 + $0x20] sm:$0xff] }
  0x69   : > { %v548_v9 = vld [vmem:[%s3267_s30 + $0x390] sm:$0x33]  ;;  %v549_v11 = vld [vmem:[%s3267_s30 + $0x398] sm:$0x33]  ;;  %v450_v40 = vld [vmem:[%s3267_s30 + $0x80] sm:$0xff]  ;;  %2263 = vperm.xlu0 %2924, %v2259_v28  }
  0x6a   : > { %v509_v13 = vld [vmem:[%s3267_s30 + $0x258] sm:$0xff]  ;;  %v2782_v15 = vcombine.low %v536_v7, %v548_v9  ;;  %v2783_v16 = vcombine.high %v536_v7, %v548_v9  ;;  %v2784_v17 = vcombine.low %v537_v10, %v549_v11  ;;  %v2785_v20 = vcombine.high %v537_v10, %v549_v11  ;;  %v3374_v29 = vld [vmem:[%s3791_s1 + $0x10] sm:$0xff]   ;;  %v2260_v47 = vld [vmem:[%s3792_s2 + $0x8] sm:$0xff] }
  0x6b   : > { %1246 = vmatpush1.bf16.msra.mxu0 %v2746_v32  ;;  %1319 = vmatpush1.bf16.msra.mxu1 %v2748_v34  ;;  %v521_v14 = vld [vmem:[%s3267_s30 + $0x2b8] sm:$0xff]  ;;  %v2774_v32 = vcombine.low %v3327_v2, %v3330_v3  ;;  %v1183_v33 = vand.u32 %v2775_v19, %v3289_v30  ;;  %v2776_v34 = vcombine.low %v3334_v5, %v3337_v6  ;;  %v552_v61 = vld [vmem:[%s3267_s30 + $0x3b0] sm:$0x33]  ;;  %v462_v7 = vld [vmem:[%s3267_s30 + $0xe0] sm:$0xff] }
  0x6c   : > { %1247 = vmatprep.subr.bf16.mxu0 %v1171_v35  ;;  %1320 = vmatprep.subr.bf16.mxu1 %v1177_v37  ;;  %v3351_v22 = vand.u32 %v2783_v16, %v3289_v30  ;;  %v3354_v23 = vand.u32 %v2782_v15, %v3289_v30  ;;  %v3357_v24 = vand.u32 %v2784_v17, %v3289_v30  ;;  %v550_v37 = vld [vmem:[%s3267_s30 + $0x3a0] sm:$0x33]  ;;  %v3420_v59 = vld [vmem:[%s3791_s1 + $0x18] sm:$0xff]   ;;  %v487_v19 = vld [vmem:[%s3267_s30 + $0x1a8] sm:$0xff] }
  0x6d   : > { %v2753_v25 = vcombine.high %v509_v13, %v521_v14  ;;  %v3362_v26 = vand.u32 %v2785_v20, %v3289_v30  ;;  %v2752_v31 = vcombine.low %v509_v13, %v521_v14  ;;  %v1189_v35 = vand.u32 %v2777_v21, %v3289_v30  ;;  %2268 = vperm.xlu0 %2924, %v2260_v47   ;;  %v553_v2 = vld [vmem:[%s3267_s30 + $0x3b8] sm:$0x33]  ;;  %v475_v13 = vld [vmem:[%s3267_s30 + $0x148] sm:$0xff]  ;;  %v486_v16 = vld [vmem:[%s3267_s30 + $0x1a0] sm:$0xff] }
  0x6e   : > { %v2786_v41 = vcombine.low %v538_v36, %v550_v37  ;;  %v1180_v50 = vand.u32 %v2774_v32, %v3289_v30  ;;  %v2683_v54 = vcombine.high %v3387_v39, %v450_v40  ;;  %v2682_v11 = vcombine.low %v3387_v39, %v450_v40  ;;  %v498_v17 = vld [vmem:[%s3267_s30 + $0x200] sm:$0xff]  ;;  %v499_v20 = vld [vmem:[%s3267_s30 + $0x208] sm:$0xff] }
  0x6f   : > { %1248 = vmatpush1.bf16.msra.mxu0 %v1168_v42  ;;  %1321 = vmatpush1.bf16.msra.mxu1 %v1174_v43  ;;  %v2787_v42 = vcombine.high %v538_v36, %v550_v37  ;;  %v551_v43 = vld [vmem:[%s3267_s30 + $0x3a8] sm:$0x33]  ;;  %v2733_v28 = vcombine.high %v487_v19, %v499_v20  ;;  %v534_v32 = vld [vmem:[%s3267_s30 + $0x320] sm:$0xff]  ;;  %v2730_v37 = vcombine.low %v486_v16, %v498_v17 }
  0x70   : > { %1385 = vmatprep.subr.bf16.mxu0 %v2679_v44  ;;  %1458 = vmatprep.subr.bf16.mxu1 %v2681_v45  ;;  %v439_v44 = vld [vmem:[%s3267_s30 + $0x28] sm:$0xff]  ;;  %v2788_v48 = vcombine.low %v539_v38, %v551_v43  ;;  %v2732_v40 = vcombine.low %v487_v19, %v499_v20 }
  0x71   : > { %v451_v45 = vld [vmem:[%s3267_s30 + $0x88] sm:$0xff]  ;;  %v3398_v51 = vand.u32 %v2787_v42, %v3289_v30 }
  0x72   : > { %2794 = vmatmul.mubr.msk.bf16.vlgmr.msra.gmra.mrb[0].mxu0 %vm1150_vm2, %v3302_v46  ;;  %2798 = vmatmul.mubr.msk.bf16.vlgmr.msra.gmra.mrb[0].mxu1 %vm1150_vm2, %v3302_v46  ;;  %v2685_v58 = vcombine.high %v439_v44, %v451_v45  ;;  %v2684_v14 = vcombine.low %v439_v44, %v451_v45  ;;  %v547_v36 = vld [vmem:[%s3267_s30 + $0x388] sm:$0x33] }
  0x73   : > { %1386 = vmatpush1.bf16.msra.mxu0 %v2678_v49  ;;  %1459 = vmatpush1.bf16.msra.mxu1 %v2680_v52  ;;  %v2789_v49 = vcombine.high %v539_v38, %v551_v43  ;;  %v3401_v52 = vand.u32 %v2786_v41, %v3289_v30  ;;  %v511_v38 = vld [vmem:[%s3267_s30 + $0x268] sm:$0xff] }
  0x74   : > { %1281 = vmatprep.mubr.bf16.mxu0 %v2953_v56  ;;  %1354 = vmatprep.mubr.bf16.mxu1 %v2953_v56  ;;  %v523_v39 = vld [vmem:[%s3267_s30 + $0x2c8] sm:$0xff] }
  0x75   : > { %1387 = vmatprep.subr.bf16.mxu0 %v2703_v53  ;;  %1460 = vmatprep.subr.bf16.mxu1 %v2705_v57  ;;  %v1186_v53 = vand.u32 %v2776_v34, %v3289_v30  ;;  %v3406_v55 = vand.u32 %v2789_v49, %v3289_v30  ;;  %v3409_v57 = vand.u32 %v2788_v48, %v3289_v30  ;;  %v522_v34 = vld [vmem:[%s3267_s30 + $0x2c0] sm:$0xff] }
  0x76   : > { %v2757_v44 = vcombine.high %v511_v38, %v523_v39  ;;  %v2756_v47 = vcombine.low %v511_v38, %v523_v39  ;;  %v442_v38 = vld [vmem:[%s3267_s30 + $0x40] sm:$0xff] }
  0x77   : > { %1388 = vmatpush1.bf16.msra.mxu0 %v2702_v60  ;;  %1461 = vmatpush1.bf16.msra.mxu1 %v2704_v62  ;;  %v540_v60 = vld [vmem:[%s3267_s30 + $0x350] sm:$0xff]  ;;  %v541_v62 = vld [vmem:[%s3267_s30 + $0x358] sm:$0xff]  ;;  %v454_v39 = vld [vmem:[%s3267_s30 + $0xa0] sm:$0xff] }
  0x78   : > { %1389 = vmatprep.subr.bf16.mxu0 %v2727_v0  ;;  %1462 = vmatprep.subr.bf16.mxu1 %v2729_v4  ;;  %v2790_v0 = vcombine.low %v540_v60, %v552_v61  ;;  %v2791_v1 = vcombine.high %v540_v60, %v552_v61  ;;  %v2792_v3 = vcombine.low %v541_v62, %v553_v2  ;;  %v441_v60 = vld [vmem:[%s3267_s30 + $0x38] sm:$0xff] }
  0x79   : > { %v2793_v4 = vcombine.high %v541_v62, %v553_v2  ;;  %v453_v61 = vld [vmem:[%s3267_s30 + $0x98] sm:$0xff] }
  0x7a   : > { %2795 = vmatmul.mubr.msk.bf16.gmra.mrb[4].mxu0 %vm1150_vm2, %v3323_v63  ;;  %2799 = vmatmul.mubr.msk.bf16.gmra.mrb[4].mxu1 %vm1150_vm2, %v3323_v63  ;;  %v3433_v5 = vand.u32 %v2791_v1, %v3289_v30  ;;  %v3436_v6 = vand.u32 %v2790_v0, %v3289_v30  ;;  %v3444_v10 = vand.u32 %v2792_v3, %v3289_v30  ;;  %v476_v3 = vld [vmem:[%s3267_s30 + $0x150] sm:$0xff] }
  0x7b   : > { %1390 = vmatpush1.bf16.msra.mxu0 %v2726_v8  ;;  %1463 = vmatpush1.bf16.msra.mxu1 %v2728_v12  ;;  %v474_v8 = vld [vmem:[%s3267_s30 + $0x140] sm:$0xff]  ;;  %v3441_v9 = vand.u32 %v2793_v4, %v3289_v30  ;;  %v463_v12 = vld [vmem:[%s3267_s30 + $0xe8] sm:$0xff]  ;;  %v2689_v2 = vcombine.high %v441_v60, %v453_v61 }
  0x7c   : > { %1291 = vmatprep.mubr.bf16.mxu0 %v2953_v56  ;;  %1364 = vmatprep.mubr.bf16.mxu1 %v2953_v56  ;;  %v2707_v15 = vcombine.high %v462_v7, %v474_v8  ;;  %v2706_v21 = vcombine.low %v462_v7, %v474_v8  ;;  %v465_v7 = vld [vmem:[%s3267_s30 + $0xf8] sm:$0xff] }
  0x7d   : > { %1391 = vmatprep.subr.bf16.mxu0 %v2751_v18  ;;  %1464 = vmatprep.subr.bf16.mxu1 %v2753_v25  ;;  %v2709_v18 = vcombine.high %v463_v12, %v475_v13  ;;  %v2708_v25 = vcombine.low %v463_v12, %v475_v13  ;;  %v477_v8 = vld [vmem:[%s3267_s30 + $0x158] sm:$0xff]  ;;  %v488_v13 = vld [vmem:[%s3267_s30 + $0x1b0] sm:$0xff] }
  0x7e   : > { %v2712_v19 = vcombine.low %v465_v7, %v477_v8 }
  0x7f   : > { %1392 = vmatpush1.bf16.msra.mxu0 %v2750_v27  ;;  %1465 = vmatpush1.bf16.msra.mxu1 %v2752_v31  ;;  %v2731_v27 = vcombine.high %v486_v16, %v498_v17  ;;  %v510_v31 = vld [vmem:[%s3267_s30 + $0x260] sm:$0xff]  ;;  %v489_v16 = vld [vmem:[%s3267_s30 + $0x1b8] sm:$0xff] }
  0x80   : > { %1393 = vmatprep.subr.bf16.mxu0 %v1183_v33  ;;  %1466 = vmatprep.subr.bf16.mxu1 %v1189_v35  ;;  %v546_v33 = vld [vmem:[%s3267_s30 + $0x380] sm:$0x33]  ;;  %v535_v35 = vld [vmem:[%s3267_s30 + $0x328] sm:$0xff]  ;;  %v2755_v42 = vcombine.high %v510_v31, %v522_v34  ;;  %v2754_v45 = vcombine.low %v510_v31, %v522_v34  ;;  %v501_v17 = vld [vmem:[%s3267_s30 + $0x218] sm:$0xff] }
  0x81   : > { %v2779_v41 = vcombine.high %v534_v32, %v546_v33  ;;  %v2781_v43 = vcombine.high %v535_v35, %v547_v36  ;;  %v2778_v48 = vcombine.low %v534_v32, %v546_v33  ;;  %v513_v31 = vld [vmem:[%s3267_s30 + $0x278] sm:$0xff]  ;;  %v2736_v33 = vcombine.low %v489_v16, %v501_v17 }
  0x82   : > { %2796 = vmatmul.mubr.msk.bf16.gmra.mrb[8].mxu0 %vm1150_vm2, %v3374_v29  ;;  %2800 = vmatmul.mubr.msk.bf16.gmra.mrb[8].mxu1 %vm1150_vm2, %v3374_v29  ;;  %v525_v32 = vld [vmem:[%s3267_s30 + $0x2d8] sm:$0xff] }
  0x83   : > { %1301 = vmatprep.mubr.bf16.mxu0 %v2953_v56  ;;  %1374 = vmatprep.mubr.bf16.mxu1 %v2953_v56  ;;  %v1195_v49 = vand.u32 %v2779_v41, %v3289_v30  ;;  %v1192_v62 = vand.u32 %v2778_v48, %v3289_v30  ;;  %v455_v41 = vld [vmem:[%s3267_s30 + $0xa8] sm:$0xff]  ;;  %v490_v48 = vld [vmem:[%s3267_s30 + $0x1c0] sm:$0xff] }
  0x84   : > { %1394 = vmatpush1.bf16.msra.mxu0 %v1180_v50  ;;  %1467 = vmatpush1.bf16.msra.mxu1 %v1186_v53  ;;  %v2780_v50 = vcombine.low %v535_v35, %v547_v36  ;;  %v1201_v53 = vand.u32 %v2781_v43, %v3289_v30  ;;  %v2761_v35 = vcombine.high %v513_v31, %v525_v32 }
  0x85   : > { %1531 = vmatprep.subr.bf16.mxu0 %v2683_v54  ;;  %1604 = vmatprep.subr.bf16.mxu1 %v2685_v58  ;;  %v440_v54 = vld [vmem:[%s3267_s30 + $0x30] sm:$0xff] }
  0x86   : > { %v452_v58 = vld [vmem:[%s3267_s30 + $0x90] sm:$0xff]  ;;  %v1198_v0 = vand.u32 %v2780_v50, %v3289_v30 }
  0x87   : > { %v2687_v1 = vcombine.high %v440_v54, %v452_v58  ;;  %v464_v30 = vld [vmem:[%s3267_s30 + $0xf0] sm:$0xff]  ;;  %v2686_v4 = vcombine.low %v440_v54, %v452_v58  ;;  %v503_v54 = vld [vmem:[%s3267_s30 + $0x228] sm:$0xff] }
  0x88   : > { %v2711_v12 = vcombine.high %v464_v30, %v476_v3 }
  0x8a   : > { %2797 = vmatmul.mubr.msk.bf16.gmra.mrb[12].mxu0 %vm1150_vm2, %v3420_v59  ;;  %2801 = vmatmul.mubr.msk.bf16.gmra.mrb[12].mxu1 %vm1150_vm2, %v3420_v59 }
  0x8b   : > { %1417 = vmatprep.mubr.bf16.mxu0 %v2953_v56  ;;  %1490 = vmatprep.mubr.bf16.mxu1 %v2953_v56 }
  0x92   : > { %2802 = vmatmul.mubr.msk.bf16.vlgmr.msra.gmra.mrb[16].mxu0 %vm1150_vm2, %v3302_v46  ;;  %2806 = vmatmul.mubr.msk.bf16.vlgmr.msra.gmra.mrb[16].mxu1 %vm1150_vm2, %v3302_v46 }
  0x93   : > { %1532 = vmatpush1.bf16.msra.mxu0 %v2682_v11  ;;  %1605 = vmatpush1.bf16.msra.mxu1 %v2684_v14  ;;  %v2688_v11 = vcombine.low %v441_v60, %v453_v61  ;;  %v500_v14 = vld [vmem:[%s3267_s30 + $0x210] sm:$0xff] }
  0x94   : > { %1427 = vmatprep.mubr.bf16.mxu0 %v2953_v56  ;;  %1500 = vmatprep.mubr.bf16.mxu1 %v2953_v56  ;;  %v2735_v20 = vcombine.high %v488_v13, %v500_v14 }
  0x95   : > { %1533 = vmatprep.subr.bf16.mxu0 %v2707_v15  ;;  %1606 = vmatprep.subr.bf16.mxu1 %v2709_v18  ;;  %v2713_v15 = vcombine.high %v465_v7, %v477_v8  ;;  %v2710_v18 = vcombine.low %v464_v30, %v476_v3  ;;  %v515_v30 = vld [vmem:[%s3267_s30 + $0x288] sm:$0xff] }
  0x96   : > { %v527_v3 = vld [vmem:[%s3267_s30 + $0x2e8] sm:$0xff] }
  0x97   : > { %1534 = vmatpush1.bf16.msra.mxu0 %v2706_v21  ;;  %1607 = vmatpush1.bf16.msra.mxu1 %v2708_v25  ;;  %v2737_v21 = vcombine.high %v489_v16, %v501_v17  ;;  %v512_v25 = vld [vmem:[%s3267_s30 + $0x270] sm:$0xff]  ;;  %v2765_v8 = vcombine.high %v515_v30, %v527_v3  ;;  %v457_v16 = vld [vmem:[%s3267_s30 + $0xb8] sm:$0xff] }
  0x98   : > { %1535 = vmatprep.subr.bf16.mxu0 %v2731_v27  ;;  %1608 = vmatprep.subr.bf16.mxu1 %v2733_v28  ;;  %v524_v27 = vld [vmem:[%s3267_s30 + $0x2d0] sm:$0xff]  ;;  %v2734_v28 = vcombine.low %v488_v13, %v500_v14 }
  0x99   : > { %v2759_v34 = vcombine.high %v512_v25, %v524_v27  ;;  %v2758_v36 = vcombine.low %v512_v25, %v524_v27  ;;  %v444_v13 = vld [vmem:[%s3267_s30 + $0x50] sm:$0xff] }
  0x9a   : > { %2803 = vmatmul.mubr.msk.bf16.gmra.mrb[20].mxu0 %vm1150_vm2, %v3323_v63  ;;  %2807 = vmatmul.mubr.msk.bf16.gmra.mrb[20].mxu1 %vm1150_vm2, %v3323_v63  ;;  %v456_v14 = vld [vmem:[%s3267_s30 + $0xb0] sm:$0xff] }
  0x9b   : > { %1536 = vmatpush1.bf16.msra.mxu0 %v2730_v37  ;;  %1609 = vmatpush1.bf16.msra.mxu1 %v2732_v40  ;;  %v2760_v37 = vcombine.low %v513_v31, %v525_v32  ;;  %v443_v40 = vld [vmem:[%s3267_s30 + $0x48] sm:$0xff]  ;;  %v2695_v17 = vcombine.high %v444_v13, %v456_v14  ;;  %v492_v25 = vld [vmem:[%s3267_s30 + $0x1d0] sm:$0xff]  ;;  %v493_v31 = vld [vmem:[%s3267_s30 + $0x1d8] sm:$0xff] }
  0x9c   : > { %1437 = vmatprep.mubr.bf16.mxu0 %v2953_v56  ;;  %1510 = vmatprep.mubr.bf16.mxu1 %v2953_v56  ;;  %v2693_v43 = vcombine.high %v443_v40, %v455_v41  ;;  %v504_v27 = vld [vmem:[%s3267_s30 + $0x230] sm:$0xff]  ;;  %v505_v32 = vld [vmem:[%s3267_s30 + $0x238] sm:$0xff] }
  0x9d   : > { %1537 = vmatprep.subr.bf16.mxu0 %v2755_v42  ;;  %1610 = vmatprep.subr.bf16.mxu1 %v2757_v44  ;;  %v2691_v42 = vcombine.high %v442_v38, %v454_v39  ;;  %v467_v44 = vld [vmem:[%s3267_s30 + $0x108] sm:$0xff] }
  0x9f   : > { %1538 = vmatpush1.bf16.msra.mxu0 %v2754_v45  ;;  %1611 = vmatpush1.bf16.msra.mxu1 %v2756_v47  ;;  %v479_v45 = vld [vmem:[%s3267_s30 + $0x168] sm:$0xff] }
  0xa0   : > { %1539 = vmatprep.subr.bf16.mxu0 %v1195_v49  ;;  %1612 = vmatprep.subr.bf16.mxu1 %v1201_v53  ;;  %v502_v49 = vld [vmem:[%s3267_s30 + $0x220] sm:$0xff]  ;;  %v2717_v50 = vcombine.high %v467_v44, %v479_v45  ;;  %v491_v53 = vld [vmem:[%s3267_s30 + $0x1c8] sm:$0xff]  ;;  %v2716_v60 = vcombine.low %v467_v44, %v479_v45 }
  0xa1   : > { %v2739_v61 = vcombine.high %v490_v48, %v502_v49 }
  0xa2   : > { %2804 = vmatmul.mubr.msk.bf16.gmra.mrb[24].mxu0 %vm1150_vm2, %v3374_v29  ;;  %2808 = vmatmul.mubr.msk.bf16.gmra.mrb[24].mxu1 %vm1150_vm2, %v3374_v29 }
  0xa3   : > { %1447 = vmatprep.mubr.bf16.mxu0 %v2953_v56  ;;  %1520 = vmatprep.mubr.bf16.mxu1 %v2953_v56 }
  0xa4   : > { %1540 = vmatpush1.bf16.msra.mxu0 %v1192_v62  ;;  %1613 = vmatpush1.bf16.msra.mxu1 %v1198_v0  ;;  %v2741_v62 = vcombine.high %v491_v53, %v503_v54  ;;  %v514_v0 = vld [vmem:[%s3267_s30 + $0x280] sm:$0xff] }
  0xa5   : > { %1677 = vmatprep.subr.bf16.mxu0 %v2687_v1  ;;  %1750 = vmatprep.subr.bf16.mxu1 %v2689_v2  ;;  %v526_v1 = vld [vmem:[%s3267_s30 + $0x2e0] sm:$0xff]  ;;  %v2738_v2 = vcombine.low %v490_v48, %v502_v49 }
  0xa6   : > { %v2763_v7 = vcombine.high %v514_v0, %v526_v1 }
  0xaa   : > { %2805 = vmatmul.mubr.msk.bf16.gmra.mrb[28].mxu0 %vm1150_vm2, %v3420_v59  ;;  %2809 = vmatmul.mubr.msk.bf16.gmra.mrb[28].mxu1 %vm1150_vm2, %v3420_v59 }
  0xab   : > { %1563 = vmatprep.mubr.bf16.mxu0 %v2953_v56  ;;  %1636 = vmatprep.mubr.bf16.mxu1 %v2953_v56 }
  0xb2   : > { %2810 = vmatmul.mubr.msk.bf16.vlgmr.msra.gmra.mrb[32].mxu0 %vm1150_vm2, %v3302_v46  ;;  %2814 = vmatmul.mubr.msk.bf16.vlgmr.msra.gmra.mrb[32].mxu1 %vm1150_vm2, %v3302_v46 }
  0xb3   : > { %1678 = vmatpush1.bf16.msra.mxu0 %v2686_v4  ;;  %1751 = vmatpush1.bf16.msra.mxu1 %v2688_v11  ;;  %v2740_v4 = vcombine.low %v491_v53, %v503_v54  ;;  %v2762_v11 = vcombine.low %v514_v0, %v526_v1 }
  0xb4   : > { %1573 = vmatprep.mubr.bf16.mxu0 %v2953_v56  ;;  %1646 = vmatprep.mubr.bf16.mxu1 %v2953_v56 }
  0xb5   : > { %1679 = vmatprep.subr.bf16.mxu0 %v2711_v12  ;;  %1752 = vmatprep.subr.bf16.mxu1 %v2713_v15  ;;  %v2764_v12 = vcombine.low %v515_v30, %v527_v3  ;;  %v445_v15 = vld [vmem:[%s3267_s30 + $0x58] sm:$0xff] }
  0xb7   : > { %1680 = vmatpush1.bf16.msra.mxu0 %v2710_v18  ;;  %1753 = vmatpush1.bf16.msra.mxu1 %v2712_v19  ;;  %v2697_v18 = vcombine.high %v445_v15, %v457_v16  ;;  %v469_v19 = vld [vmem:[%s3267_s30 + $0x118] sm:$0xff] }
  0xb8   : > { %1681 = vmatprep.subr.bf16.mxu0 %v2735_v20  ;;  %1754 = vmatprep.subr.bf16.mxu1 %v2737_v21  ;;  %v481_v20 = vld [vmem:[%s3267_s30 + $0x178] sm:$0xff] }
  0xba   : > { %2811 = vmatmul.mubr.msk.bf16.gmra.mrb[36].mxu0 %vm1150_vm2, %v3323_v63  ;;  %2815 = vmatmul.mubr.msk.bf16.gmra.mrb[36].mxu1 %vm1150_vm2, %v3323_v63 }
  0xbb   : > { %1682 = vmatpush1.bf16.msra.mxu0 %v2734_v28  ;;  %1755 = vmatpush1.bf16.msra.mxu1 %v2736_v33  ;;  %v2721_v28 = vcombine.high %v469_v19, %v481_v20 }
  0xbc   : > { %1583 = vmatprep.mubr.bf16.mxu0 %v2953_v56  ;;  %1656 = vmatprep.mubr.bf16.mxu1 %v2953_v56 }
  0xbd   : > { %1683 = vmatprep.subr.bf16.mxu0 %v2759_v34  ;;  %1756 = vmatprep.subr.bf16.mxu1 %v2761_v35  ;;  %v2720_v34 = vcombine.low %v469_v19, %v481_v20  ;;  %v2743_v35 = vcombine.high %v492_v25, %v504_v27 }
  0xbf   : > { %1684 = vmatpush1.bf16.msra.mxu0 %v2758_v36  ;;  %1757 = vmatpush1.bf16.msra.mxu1 %v2760_v37  ;;  %v2745_v36 = vcombine.high %v493_v31, %v505_v32  ;;  %v516_v37 = vld [vmem:[%s3267_s30 + $0x290] sm:$0xff] }
  0xc0   : > { %1685 = vmatprep.subr.bf16.mxu0 %v3351_v22  ;;  %1758 = vmatprep.subr.bf16.mxu1 %v3362_v26  ;;  %v466_v22 = vld [vmem:[%s3267_s30 + $0x100] sm:$0xff] }
  0xc1   : > { %v478_v26 = vld [vmem:[%s3267_s30 + $0x160] sm:$0xff] }
  0xc2   : > { %2812 = vmatmul.mubr.msk.bf16.gmra.mrb[40].mxu0 %vm1150_vm2, %v3374_v29  ;;  %2816 = vmatmul.mubr.msk.bf16.gmra.mrb[40].mxu1 %vm1150_vm2, %v3374_v29  ;;  %v2715_v47 = vcombine.high %v466_v22, %v478_v26  ;;  %v2714_v58 = vcombine.low %v466_v22, %v478_v26 }
  0xc3   : > { %1593 = vmatprep.mubr.bf16.mxu0 %v2953_v56  ;;  %1666 = vmatprep.mubr.bf16.mxu1 %v2953_v56 }
  0xc4   : > { %1686 = vmatpush1.bf16.msra.mxu0 %v3354_v23  ;;  %1759 = vmatpush1.bf16.msra.mxu1 %v3357_v24  ;;  %v2690_v23 = vcombine.low %v442_v38, %v454_v39  ;;  %v2692_v24 = vcombine.low %v443_v40, %v455_v41  ;;  %v528_v38 = vld [vmem:[%s3267_s30 + $0x2f0] sm:$0xff]  ;;  %v2742_v39 = vcombine.low %v492_v25, %v504_v27  ;;  %v517_v40 = vld [vmem:[%s3267_s30 + $0x298] sm:$0xff] }
  0xc5   : > { %1823 = vmatprep.subr.bf16.mxu0 %v2691_v42  ;;  %1896 = vmatprep.subr.bf16.mxu1 %v2693_v43  ;;  %v529_v41 = vld [vmem:[%s3267_s30 + $0x2f8] sm:$0xff]  ;;  %v2744_v42 = vcombine.low %v493_v31, %v505_v32  ;;  %v2767_v43 = vcombine.high %v516_v37, %v528_v38  ;;  %v2766_v26 = vcombine.low %v516_v37, %v528_v38 }
  0xc6   : > { %v2769_v22 = vcombine.high %v517_v40, %v529_v41 }
  0xca   : > { %2813 = vmatmul.mubr.msk.bf16.gmra.mrb[44].mxu0 %vm1150_vm2, %v3420_v59  ;;  %2817 = vmatmul.mubr.msk.bf16.gmra.mrb[44].mxu1 %vm1150_vm2, %v3420_v59 }
  0xcb   : > { %1709 = vmatprep.mubr.bf16.mxu0 %v2953_v56  ;;  %1782 = vmatprep.mubr.bf16.mxu1 %v2953_v56 }
  0xd2   : > { %2818 = vmatmul.mubr.msk.bf16.vlgmr.msra.gmra.mrb[48].mxu0 %vm1150_vm2, %v3302_v46  ;;  %2822 = vmatmul.mubr.msk.bf16.vlgmr.msra.gmra.mrb[48].mxu1 %vm1150_vm2, %v3302_v46 }
  0xd3   : > { %1824 = vmatpush1.bf16.msra.mxu0 %v2690_v23  ;;  %1897 = vmatpush1.bf16.msra.mxu1 %v2692_v24  ;;  %v2768_v23 = vcombine.low %v517_v40, %v529_v41 }
  0xd4   : > { %1719 = vmatprep.mubr.bf16.mxu0 %v2953_v56  ;;  %1792 = vmatprep.mubr.bf16.mxu1 %v2953_v56 }
  0xd5   : > { %1825 = vmatprep.subr.bf16.mxu0 %v2715_v47  ;;  %1898 = vmatprep.subr.bf16.mxu1 %v2717_v50 }
  0xd7   : > { %1826 = vmatpush1.bf16.msra.mxu0 %v2714_v58  ;;  %1899 = vmatpush1.bf16.msra.mxu1 %v2716_v60 }
  0xd8   : > { %1827 = vmatprep.subr.bf16.mxu0 %v2739_v61  ;;  %1900 = vmatprep.subr.bf16.mxu1 %v2741_v62 }
  0xda   : > { %2819 = vmatmul.mubr.msk.bf16.gmra.mrb[52].mxu0 %vm1150_vm2, %v3323_v63  ;;  %2823 = vmatmul.mubr.msk.bf16.gmra.mrb[52].mxu1 %vm1150_vm2, %v3323_v63 }
  0xdb   : > { %1828 = vmatpush1.bf16.msra.mxu0 %v2738_v2  ;;  %1901 = vmatpush1.bf16.msra.mxu1 %v2740_v4 }
  0xdc   : > { %1729 = vmatprep.mubr.bf16.mxu0 %v2953_v56  ;;  %1802 = vmatprep.mubr.bf16.mxu1 %v2953_v56 }
  0xdd   : > { %1829 = vmatprep.subr.bf16.mxu0 %v2763_v7  ;;  %1902 = vmatprep.subr.bf16.mxu1 %v2765_v8 }
  0xdf   : > { %1830 = vmatpush1.bf16.msra.mxu0 %v2762_v11  ;;  %1903 = vmatpush1.bf16.msra.mxu1 %v2764_v12 }
  0xe0   : > { %1831 = vmatprep.subr.bf16.mxu0 %v3398_v51  ;;  %1904 = vmatprep.subr.bf16.mxu1 %v3406_v55  ;;  %v468_v51 = vld [vmem:[%s3267_s30 + $0x110] sm:$0xff] }
  0xe1   : > { %v480_v55 = vld [vmem:[%s3267_s30 + $0x170] sm:$0xff] }
  0xe2   : > { %2820 = vmatmul.mubr.msk.bf16.gmra.mrb[56].mxu0 %vm1150_vm2, %v3374_v29  ;;  %2824 = vmatmul.mubr.msk.bf16.gmra.mrb[56].mxu1 %vm1150_vm2, %v3374_v29  ;;  %v2719_v21 = vcombine.high %v468_v51, %v480_v55  ;;  %v2718_v33 = vcombine.low %v468_v51, %v480_v55 }
  0xe3   : > { %1739 = vmatprep.mubr.bf16.mxu0 %v2953_v56  ;;  %1812 = vmatprep.mubr.bf16.mxu1 %v2953_v56 }
  0xe4   : > { %1832 = vmatpush1.bf16.msra.mxu0 %v3401_v52  ;;  %1905 = vmatpush1.bf16.msra.mxu1 %v3409_v57  ;;  %v2694_v52 = vcombine.low %v444_v13, %v456_v14  ;;  %v2696_v57 = vcombine.low %v445_v15, %v457_v16 }
  0xe5   : > { %1969 = vmatprep.subr.bf16.mxu0 %v2695_v17  ;;  %2042 = vmatprep.subr.bf16.mxu1 %v2697_v18 }
  0xe8   : > { %v3643_v13 = vpop.permute.xlu0 %2263 }
  0xea   : > { %2821 = vmatmul.mubr.msk.bf16.gmra.mrb[60].mxu0 %vm1150_vm2, %v3420_v59  ;;  %2825 = vmatmul.mubr.msk.bf16.gmra.mrb[60].mxu1 %vm1150_vm2, %v3420_v59 }
  0xeb   : > { %1855 = vmatprep.mubr.bf16.mxu0 %v2953_v56  ;;  %1928 = vmatprep.mubr.bf16.mxu1 %v2953_v56 }
  0xf2   : > { %2826 = vmatmul.mubr.msk.bf16.vlgmr.msra.gmra.mrb[64].mxu0 %vm1150_vm2, %v3302_v46  ;;  %2830 = vmatmul.mubr.msk.bf16.vlgmr.msra.gmra.mrb[64].mxu1 %vm1150_vm2, %v3302_v46 }
  0xf3   : > { %1970 = vmatpush1.bf16.msra.mxu0 %v2694_v52  ;;  %2043 = vmatpush1.bf16.msra.mxu1 %v2696_v57 }
  0xf4   : > { %1865 = vmatprep.mubr.bf16.mxu0 %v2953_v56  ;;  %1938 = vmatprep.mubr.bf16.mxu1 %v2953_v56 }
  0xf5   : > { %1971 = vmatprep.subr.bf16.mxu0 %v2719_v21  ;;  %2044 = vmatprep.subr.bf16.mxu1 %v2721_v28 }
  0xf7   : > { %1972 = vmatpush1.bf16.msra.mxu0 %v2718_v33  ;;  %2045 = vmatpush1.bf16.msra.mxu1 %v2720_v34  ;;  %v3645_v34 = vpop.permute.xlu0 %2268 }
  0xf8   : > { %1973 = vmatprep.subr.bf16.mxu0 %v2743_v35  ;;  %2046 = vmatprep.subr.bf16.mxu1 %v2745_v36 }
  0xfa   : > { %2827 = vmatmul.mubr.msk.bf16.gmra.mrb[68].mxu0 %vm1150_vm2, %v3323_v63  ;;  %2831 = vmatmul.mubr.msk.bf16.gmra.mrb[68].mxu1 %vm1150_vm2, %v3323_v63 }
  0xfb   : > { %1974 = vmatpush1.bf16.msra.mxu0 %v2742_v39  ;;  %2047 = vmatpush1.bf16.msra.mxu1 %v2744_v42 }
  0xfc   : > { %1875 = vmatprep.mubr.bf16.mxu0 %v2953_v56  ;;  %1948 = vmatprep.mubr.bf16.mxu1 %v2953_v56 }
  0xfd   : > { %1975 = vmatprep.subr.bf16.mxu0 %v2767_v43  ;;  %2048 = vmatprep.subr.bf16.mxu1 %v2769_v22 }
  0xff   : > { %1976 = vmatpush1.bf16.msra.mxu0 %v2766_v26  ;;  %2049 = vmatpush1.bf16.msra.mxu1 %v2768_v23 }
 0x100   : > { %1977 = vmatprep.subr.bf16.mxu0 %v3433_v5  ;;  %2050 = vmatprep.subr.bf16.mxu1 %v3441_v9 }
 0x102   : > { %2828 = vmatmul.mubr.msk.bf16.gmra.mrb[72].mxu0 %vm1150_vm2, %v3374_v29  ;;  %2832 = vmatmul.mubr.msk.bf16.gmra.mrb[72].mxu1 %vm1150_vm2, %v3374_v29 }
 0x103   : > { %1885 = vmatprep.mubr.bf16.mxu0 %v2953_v56  ;;  %1958 = vmatprep.mubr.bf16.mxu1 %v2953_v56 }
 0x104   : > { %1978 = vmatpush1.bf16.msra.mxu0 %v3436_v6  ;;  %2051 = vmatpush1.bf16.msra.mxu1 %v3444_v10 }
 0x10a   : > { %2829 = vmatmul.mubr.msk.bf16.gmra.mrb[76].mxu0 %vm1150_vm2, %v3420_v59  ;;  %2833 = vmatmul.mubr.msk.bf16.gmra.mrb[76].mxu1 %vm1150_vm2, %v3420_v59 }
 0x10b   : > { %2001 = vmatprep.mubr.bf16.mxu0 %v2953_v56  ;;  %2074 = vmatprep.mubr.bf16.mxu1 %v2953_v56 }
 0x112   : > { %2834 = vmatmul.mubr.msk.bf16.vlgmr.msra.gmra.mrb[80].mxu0 %vm1150_vm2, %v3302_v46  ;;  %2838 = vmatmul.mubr.msk.bf16.vlgmr.msra.gmra.mrb[80].mxu1 %vm1150_vm2, %v3302_v46 }
 0x113   : > { %2011 = vmatprep.mubr.bf16.mxu0 %v2953_v56  ;;  %2084 = vmatprep.mubr.bf16.mxu1 %v2953_v56 }
 0x11a   : > { %2835 = vmatmul.mubr.msk.bf16.gmra.mrb[84].mxu0 %vm1150_vm2, %v3323_v63  ;;  %2839 = vmatmul.mubr.msk.bf16.gmra.mrb[84].mxu1 %vm1150_vm2, %v3323_v63 }
 0x11b   : > { %2021 = vmatprep.mubr.bf16.mxu0 %v2953_v56  ;;  %2094 = vmatprep.mubr.bf16.mxu1 %v2953_v56 }
 0x122   : > { %2836 = vmatmul.mubr.msk.bf16.gmra.mrb[88].mxu0 %vm1150_vm2, %v3374_v29  ;;  %2840 = vmatmul.mubr.msk.bf16.gmra.mrb[88].mxu1 %vm1150_vm2, %v3374_v29 }
 0x123   : > { %2031 = vmatprep.mubr.bf16.mxu0 %v2953_v56  ;;  %2104 = vmatprep.mubr.bf16.mxu1 %v2953_v56 }
 0x12a   : > { %2837 = vmatmul.mubr.msk.bf16.gmra.mrb[92].mxu0 %vm1150_vm2, %v3420_v59  ;;  %2841 = vmatmul.mubr.msk.bf16.gmra.mrb[92].mxu1 %vm1150_vm2, %v3420_v59 }
 0x145   : > { %v1273_v46 = vpop.f32.mrb[0].mxu0  ;;  %v1346_v63 = vpop.f32.mrb[0].mxu1 }
 0x146   : > { %v1275_v5 = vpop.f32.mrb[1].mxu0  ;;  %v1348_v6 = vpop.f32.mrb[1].mxu1 }
 0x147   : > { %v1277_v9 = vpop.f32.mrb[2].mxu0  ;;  %v1350_v10 = vpop.f32.mrb[2].mxu1 }
 0x148   : > { %v1279_v44 = vpop.f32.mrb[3].mxu0  ;;  %v1352_v45 = vpop.f32.mrb[3].mxu1 }
 0x14d   : > { %v1283_v24 = vpop.f32.mrb[4].mxu0  ;;  %v1356_v47 = vpop.f32.mrb[4].mxu1 }
 0x14e   : > { %v2115_v29 = vmax.f32 %v1273_v46, %v1283_v24  ;;  %v1285_v48 = vpop.f32.mrb[5].mxu0  ;;  %v2117_v49 = vmax.f32 %v1346_v63, %v1356_v47  ;;  %v1358_v50 = vpop.f32.mrb[5].mxu1 }
 0x14f   : > { %v2116_v56 = vmax.f32 %v1275_v5, %v1285_v48  ;;  %v1287_v53 = vpop.f32.mrb[6].mxu0  ;;  %v2118_v54 = vmax.f32 %v1348_v6, %v1358_v50  ;;  %v1360_v60 = vpop.f32.mrb[6].mxu1 }
 0x150   : > { %v2139_v58 = vmax.f32 %v1277_v9, %v1287_v53  ;;  %v1289_v59 = vpop.f32.mrb[7].mxu0  ;;  %v2141_v61 = vmax.f32 %v1350_v10, %v1360_v60  ;;  %v1362_v0 = vpop.f32.mrb[7].mxu1 }
 0x151   : > { %v2140_v62 = vmax.f32 %v1279_v44, %v1289_v59  ;;  %v2142_v1 = vmax.f32 %v1352_v45, %v1362_v0 }
 0x155   : > { %v1293_v2 = vpop.f32.mrb[8].mxu0  ;;  %v1366_v30 = vpop.f32.mrb[8].mxu1 }
 0x156   : > { %v1295_v3 = vpop.f32.mrb[9].mxu0  ;;  %v1368_v4 = vpop.f32.mrb[9].mxu1 }
 0x157   : > { %v1297_v7 = vpop.f32.mrb[10].mxu0  ;;  %v1370_v8 = vpop.f32.mrb[10].mxu1 }
 0x158   : > { %v1299_v11 = vpop.f32.mrb[11].mxu0  ;;  %v1372_v12 = vpop.f32.mrb[11].mxu1 }
 0x15d   : > { %v1303_v14 = vpop.f32.mrb[12].mxu0  ;;  %v1376_v16 = vpop.f32.mrb[12].mxu1 }
 0x15e   : > { %v2163_v15 = vmax.f32 %v1293_v2, %v1303_v14  ;;  %v1305_v17 = vpop.f32.mrb[13].mxu0  ;;  %v2165_v18 = vmax.f32 %v1366_v30, %v1376_v16  ;;  %v1378_v55 = vpop.f32.mrb[13].mxu1 }
 0x15f   : > { %v2164_v51 = vmax.f32 %v1295_v3, %v1305_v17  ;;  %v1307_v52 = vpop.f32.mrb[14].mxu0  ;;  %v2166_v20 = vmax.f32 %v1368_v4, %v1378_v55  ;;  %v1380_v21 = vpop.f32.mrb[14].mxu1 }
 0x160   : > { %v2211_v19 = vmax.f32 %v2115_v29, %v2163_v15  ;;  %v2187_v57 = vmax.f32 %v1297_v7, %v1307_v52  ;;  %v1309_v25 = vpop.f32.mrb[15].mxu0  ;;  %v2213_v27 = vmax.f32 %v2117_v49, %v2165_v18  ;;  %v2189_v31 = vmax.f32 %v1370_v8, %v1380_v21  ;;  %v1382_v33 = vpop.f32.mrb[15].mxu1 }
 0x161   : > { %v2212_v28 = vmax.f32 %v2116_v56, %v2164_v51  ;;  %v2188_v32 = vmax.f32 %v1299_v11, %v1309_v25  ;;  %v2214_v35 = vmax.f32 %v2118_v54, %v2166_v20  ;;  %v2190_v38 = vmax.f32 %v1372_v12, %v1382_v33 }
 0x162   : > { %v2271_v36 = vadd.f32 %v3643_v13, %v2211_v19  ;;  %v2235_v37 = vmax.f32 %v2139_v58, %v2187_v57  ;;  %v2273_v40 = vadd.f32 %v3643_v13, %v2213_v27  ;;  %v2237_v41 = vmax.f32 %v2141_v61, %v2189_v31 }
 0x163   : > { %v2272_v39 = vadd.f32 %v3643_v13, %v2212_v28  ;;  %v2236_v42 = vmax.f32 %v2140_v62, %v2188_v32  ;;  %v2274_v43 = vadd.f32 %v3643_v13, %v2214_v35  ;;  %v2238_v26 = vmax.f32 %v2142_v1, %v2190_v38 }
 0x164   : > { %v2319_v22 = vmax.f32 %v2271_v36, 0.0  ;;  %v2295_v23 = vadd.f32 %v3645_v34, %v2235_v37  ;;  %v2321_v63 = vmax.f32 %v2273_v40, 0.0  ;;  %v2297_v6 = vadd.f32 %v3645_v34, %v2237_v41 }
 0x165   : > { %v2320_v46 = vmax.f32 %v2272_v39, 0.0  ;;  %v2296_v5 = vadd.f32 %v3645_v34, %v2236_v42  ;;  %v1419_v9 = vpop.f32.mrb[16].mxu0  ;;  %v2322_v10 = vmax.f32 %v2274_v43, 0.0  ;;  %v2298_v44 = vadd.f32 %v3645_v34, %v2238_v26  ;;  %v1492_v24 = vpop.f32.mrb[16].mxu1 }
 0x166   : > { %v2343_v45 = vmax.f32 %v2295_v23, 0.0  ;;  %v1421_v29 = vpop.f32.mrb[17].mxu0  ;;  %v2345_v49 = vmax.f32 %v2297_v6, 0.0  ;;  %v1494_v56 = vpop.f32.mrb[17].mxu1 }
 0x167   : > { %v2870_v47 = vpack.c.bf16 %v2320_v46, %v2319_v22  ;;  %v2344_v48 = vmax.f32 %v2296_v5, 0.0  ;;  %v1423_v50 = vpop.f32.mrb[18].mxu0  ;;  %v2871_v53 = vpack.c.bf16 %v2322_v10, %v2321_v63  ;;  %v2346_v54 = vmax.f32 %v2298_v44, 0.0  ;;  %v1496_v58 = vpop.f32.mrb[18].mxu1 }
 0x168   : > { %v1425_v60 = vpop.f32.mrb[19].mxu0  ;;  %v1498_v61 = vpop.f32.mrb[19].mxu1 }
 0x169   : > { %v2882_v59 = vpack.c.bf16 %v2344_v48, %v2343_v45  ;;  %2511 = vst [vmem:[%s3657_s12] sm:$0xff] %v2870_v47  ;;  %v2883_v62 = vpack.c.bf16 %v2346_v54, %v2345_v49  ;;  %2512 = vst [vmem:[%s3657_s12 + $0x8] sm:$0xff] %v2871_v53 }
 0x16b   : > { %2523 = vst [vmem:[%s3657_s12 + $0x60] sm:$0xff] %v2882_v59  ;;  %2524 = vst [vmem:[%s3657_s12 + $0x68] sm:$0xff] %v2883_v62 }
 0x16d   : > { %v1429_v0 = vpop.f32.mrb[20].mxu0  ;;  %v1502_v2 = vpop.f32.mrb[20].mxu1 }
 0x16e   : > { %v2119_v1 = vmax.f32 %v1419_v9, %v1429_v0  ;;  %v1431_v30 = vpop.f32.mrb[21].mxu0  ;;  %v2121_v3 = vmax.f32 %v1492_v24, %v1502_v2  ;;  %v1504_v7 = vpop.f32.mrb[21].mxu1 }
 0x16f   : > { %v2120_v4 = vmax.f32 %v1421_v29, %v1431_v30  ;;  %v1433_v8 = vpop.f32.mrb[22].mxu0  ;;  %v2122_v11 = vmax.f32 %v1494_v56, %v1504_v7  ;;  %v1506_v14 = vpop.f32.mrb[22].mxu1 }
 0x170   : > { %v2143_v12 = vmax.f32 %v1423_v50, %v1433_v8  ;;  %v1435_v15 = vpop.f32.mrb[23].mxu0  ;;  %v2145_v16 = vmax.f32 %v1496_v58, %v1506_v14  ;;  %v1508_v18 = vpop.f32.mrb[23].mxu1 }
 0x171   : > { %v2144_v17 = vmax.f32 %v1425_v60, %v1435_v15  ;;  %v2146_v51 = vmax.f32 %v1498_v61, %v1508_v18 }
 0x175   : > { %v1439_v55 = vpop.f32.mrb[24].mxu0  ;;  %v1512_v52 = vpop.f32.mrb[24].mxu1 }
 0x176   : > { %v1441_v19 = vpop.f32.mrb[25].mxu0  ;;  %v1514_v20 = vpop.f32.mrb[25].mxu1 }
 0x177   : > { %v1443_v57 = vpop.f32.mrb[26].mxu0  ;;  %v1516_v21 = vpop.f32.mrb[26].mxu1 }
 0x178   : > { %v1445_v25 = vpop.f32.mrb[27].mxu0  ;;  %v1518_v27 = vpop.f32.mrb[27].mxu1 }
 0x17d   : > { %v1449_v28 = vpop.f32.mrb[28].mxu0  ;;  %v1522_v32 = vpop.f32.mrb[28].mxu1 }
 0x17e   : > { %v2167_v31 = vmax.f32 %v1439_v55, %v1449_v28  ;;  %v1451_v33 = vpop.f32.mrb[29].mxu0  ;;  %v2169_v35 = vmax.f32 %v1512_v52, %v1522_v32  ;;  %v1524_v37 = vpop.f32.mrb[29].mxu1 }
 0x17f   : > { %v2168_v36 = vmax.f32 %v1441_v19, %v1451_v33  ;;  %v1453_v38 = vpop.f32.mrb[30].mxu0  ;;  %v2170_v40 = vmax.f32 %v1514_v20, %v1524_v37  ;;  %v1526_v42 = vpop.f32.mrb[30].mxu1 }
 0x180   : > { %v2215_v39 = vmax.f32 %v2119_v1, %v2167_v31  ;;  %v2191_v41 = vmax.f32 %v1443_v57, %v1453_v38  ;;  %v1455_v43 = vpop.f32.mrb[31].mxu0  ;;  %v2217_v22 = vmax.f32 %v2121_v3, %v2169_v35  ;;  %v2193_v23 = vmax.f32 %v1516_v21, %v1526_v42  ;;  %v1528_v63 = vpop.f32.mrb[31].mxu1 }
 0x181   : > { %v2216_v26 = vmax.f32 %v2120_v4, %v2168_v36  ;;  %v2192_v46 = vmax.f32 %v1445_v25, %v1455_v43  ;;  %v2218_v6 = vmax.f32 %v2122_v11, %v2170_v40  ;;  %v2194_v10 = vmax.f32 %v1518_v27, %v1528_v63 }
 0x182   : > { %v2275_v5 = vadd.f32 %v3643_v13, %v2215_v39  ;;  %v2239_v9 = vmax.f32 %v2143_v12, %v2191_v41  ;;  %v2277_v44 = vadd.f32 %v3643_v13, %v2217_v22  ;;  %v2241_v24 = vmax.f32 %v2145_v16, %v2193_v23 }
 0x183   : > { %v2276_v45 = vadd.f32 %v3643_v13, %v2216_v26  ;;  %v2240_v29 = vmax.f32 %v2144_v17, %v2192_v46  ;;  %v2278_v48 = vadd.f32 %v3643_v13, %v2218_v6  ;;  %v2242_v56 = vmax.f32 %v2146_v51, %v2194_v10 }
 0x184   : > { %v2323_v47 = vmax.f32 %v2275_v5, 0.0  ;;  %v2299_v49 = vadd.f32 %v3645_v34, %v2239_v9  ;;  %v2325_v50 = vmax.f32 %v2277_v44, 0.0  ;;  %v2301_v54 = vadd.f32 %v3645_v34, %v2241_v24 }
 0x185   : > { %v2324_v53 = vmax.f32 %v2276_v45, 0.0  ;;  %v2300_v58 = vadd.f32 %v3645_v34, %v2240_v29  ;;  %v1565_v60 = vpop.f32.mrb[32].mxu0  ;;  %v2326_v59 = vmax.f32 %v2278_v48, 0.0  ;;  %v2302_v62 = vadd.f32 %v3645_v34, %v2242_v56  ;;  %v1638_v0 = vpop.f32.mrb[32].mxu1 }
 0x186   : > { %v2347_v61 = vmax.f32 %v2299_v49, 0.0  ;;  %v1567_v1 = vpop.f32.mrb[33].mxu0  ;;  %v2349_v30 = vmax.f32 %v2301_v54, 0.0  ;;  %v1640_v4 = vpop.f32.mrb[33].mxu1 }
 0x187   : > { %v2872_v2 = vpack.c.bf16 %v2324_v53, %v2323_v47  ;;  %v2348_v3 = vmax.f32 %v2300_v58, 0.0  ;;  %v1569_v7 = vpop.f32.mrb[34].mxu0  ;;  %v2873_v8 = vpack.c.bf16 %v2326_v59, %v2325_v50  ;;  %v2350_v11 = vmax.f32 %v2302_v62, 0.0  ;;  %v1642_v12 = vpop.f32.mrb[34].mxu1 }
 0x188   : > { %v1571_v14 = vpop.f32.mrb[35].mxu0  ;;  %v1644_v16 = vpop.f32.mrb[35].mxu1 }
 0x189   : > { %2513 = vst [vmem:[%s3657_s12 + $0x10] sm:$0xff] %v2872_v2  ;;  %v2884_v15 = vpack.c.bf16 %v2348_v3, %v2347_v61  ;;  %2514 = vst [vmem:[%s3657_s12 + $0x18] sm:$0xff] %v2873_v8  ;;  %v2885_v17 = vpack.c.bf16 %v2350_v11, %v2349_v30 }
 0x18b   : > { %2525 = vst [vmem:[%s3657_s12 + $0x70] sm:$0xff] %v2884_v15  ;;  %2526 = vst [vmem:[%s3657_s12 + $0x78] sm:$0xff] %v2885_v17 }
 0x18d   : > { %v1575_v18 = vpop.f32.mrb[36].mxu0  ;;  %v1648_v55 = vpop.f32.mrb[36].mxu1 }
 0x18e   : > { %v2123_v51 = vmax.f32 %v1565_v60, %v1575_v18  ;;  %v1577_v52 = vpop.f32.mrb[37].mxu0  ;;  %v2125_v19 = vmax.f32 %v1638_v0, %v1648_v55  ;;  %v1650_v57 = vpop.f32.mrb[37].mxu1 }
 0x18f   : > { %v2124_v20 = vmax.f32 %v1567_v1, %v1577_v52  ;;  %v1579_v21 = vpop.f32.mrb[38].mxu0  ;;  %v2126_v25 = vmax.f32 %v1640_v4, %v1650_v57  ;;  %v1652_v28 = vpop.f32.mrb[38].mxu1 }
 0x190   : > { %v2147_v27 = vmax.f32 %v1569_v7, %v1579_v21  ;;  %v1581_v31 = vpop.f32.mrb[39].mxu0  ;;  %v2149_v32 = vmax.f32 %v1642_v12, %v1652_v28  ;;  %v1654_v35 = vpop.f32.mrb[39].mxu1 }
 0x191   : > { %v2148_v33 = vmax.f32 %v1571_v14, %v1581_v31  ;;  %v2150_v36 = vmax.f32 %v1644_v16, %v1654_v35 }
 0x195   : > { %v1585_v37 = vpop.f32.mrb[40].mxu0  ;;  %v1658_v38 = vpop.f32.mrb[40].mxu1 }
 0x196   : > { %v1587_v39 = vpop.f32.mrb[41].mxu0  ;;  %v1660_v40 = vpop.f32.mrb[41].mxu1 }
 0x197   : > { %v1589_v41 = vpop.f32.mrb[42].mxu0  ;;  %v1662_v42 = vpop.f32.mrb[42].mxu1 }
 0x198   : > { %v1591_v43 = vpop.f32.mrb[43].mxu0  ;;  %v1664_v22 = vpop.f32.mrb[43].mxu1 }
 0x19d   : > { %v1595_v26 = vpop.f32.mrb[44].mxu0  ;;  %v1668_v46 = vpop.f32.mrb[44].mxu1 }
 0x19e   : > { %v2171_v23 = vmax.f32 %v1585_v37, %v1595_v26  ;;  %v1597_v63 = vpop.f32.mrb[45].mxu0  ;;  %v2173_v5 = vmax.f32 %v1658_v38, %v1668_v46  ;;  %v1670_v9 = vpop.f32.mrb[45].mxu1 }
 0x19f   : > { %v2172_v6 = vmax.f32 %v1587_v39, %v1597_v63  ;;  %v1599_v10 = vpop.f32.mrb[46].mxu0  ;;  %v2174_v45 = vmax.f32 %v1660_v40, %v1670_v9  ;;  %v1672_v29 = vpop.f32.mrb[46].mxu1 }
 0x1a0   : > { %v2219_v44 = vmax.f32 %v2123_v51, %v2171_v23  ;;  %v2195_v24 = vmax.f32 %v1589_v41, %v1599_v10  ;;  %v1601_v47 = vpop.f32.mrb[47].mxu0  ;;  %v2221_v48 = vmax.f32 %v2125_v19, %v2173_v5  ;;  %v2197_v56 = vmax.f32 %v1662_v42, %v1672_v29  ;;  %v1674_v53 = vpop.f32.mrb[47].mxu1 }
 0x1a1   : > { %v2220_v49 = vmax.f32 %v2124_v20, %v2172_v6  ;;  %v2196_v50 = vmax.f32 %v1591_v43, %v1601_v47  ;;  %v2222_v58 = vmax.f32 %v2126_v25, %v2174_v45  ;;  %v2198_v59 = vmax.f32 %v1664_v22, %v1674_v53 }
 0x1a2   : > { %v2279_v54 = vadd.f32 %v3643_v13, %v2219_v44  ;;  %v2243_v60 = vmax.f32 %v2147_v27, %v2195_v24  ;;  %v2281_v61 = vadd.f32 %v3643_v13, %v2221_v48  ;;  %v2245_v0 = vmax.f32 %v2149_v32, %v2197_v56 }
 0x1a3   : > { %v2280_v62 = vadd.f32 %v3643_v13, %v2220_v49  ;;  %v2244_v1 = vmax.f32 %v2148_v33, %v2196_v50  ;;  %v2282_v30 = vadd.f32 %v3643_v13, %v2222_v58  ;;  %v2246_v4 = vmax.f32 %v2150_v36, %v2198_v59 }
 0x1a4   : > { %v2327_v2 = vmax.f32 %v2279_v54, 0.0  ;;  %v2303_v3 = vadd.f32 %v3645_v34, %v2243_v60  ;;  %v2329_v7 = vmax.f32 %v2281_v61, 0.0  ;;  %v2305_v11 = vadd.f32 %v3645_v34, %v2245_v0 }
 0x1a5   : > { %v2328_v8 = vmax.f32 %v2280_v62, 0.0  ;;  %v2304_v12 = vadd.f32 %v3645_v34, %v2244_v1  ;;  %v1711_v14 = vpop.f32.mrb[48].mxu0  ;;  %v2330_v15 = vmax.f32 %v2282_v30, 0.0  ;;  %v2306_v17 = vadd.f32 %v3645_v34, %v2246_v4  ;;  %v1784_v18 = vpop.f32.mrb[48].mxu1 }
 0x1a6   : > { %v2351_v16 = vmax.f32 %v2303_v3, 0.0  ;;  %v1713_v51 = vpop.f32.mrb[49].mxu0  ;;  %v2353_v52 = vmax.f32 %v2305_v11, 0.0  ;;  %v1786_v20 = vpop.f32.mrb[49].mxu1 }
 0x1a7   : > { %v2874_v55 = vpack.c.bf16 %v2328_v8, %v2327_v2  ;;  %v2352_v19 = vmax.f32 %v2304_v12, 0.0  ;;  %v1715_v57 = vpop.f32.mrb[50].mxu0  ;;  %v2875_v21 = vpack.c.bf16 %v2330_v15, %v2329_v7  ;;  %v2354_v25 = vmax.f32 %v2306_v17, 0.0  ;;  %v1788_v27 = vpop.f32.mrb[50].mxu1 }
 0x1a8   : > { %v1717_v28 = vpop.f32.mrb[51].mxu0  ;;  %v1790_v32 = vpop.f32.mrb[51].mxu1 }
 0x1a9   : > { %2515 = vst [vmem:[%s3657_s12 + $0x20] sm:$0xff] %v2874_v55  ;;  %v2886_v31 = vpack.c.bf16 %v2352_v19, %v2351_v16  ;;  %2516 = vst [vmem:[%s3657_s12 + $0x28] sm:$0xff] %v2875_v21  ;;  %v2887_v33 = vpack.c.bf16 %v2354_v25, %v2353_v52 }
 0x1ab   : > { %2527 = vst [vmem:[%s3657_s12 + $0x80] sm:$0xff] %v2886_v31  ;;  %2528 = vst [vmem:[%s3657_s12 + $0x88] sm:$0xff] %v2887_v33 }
 0x1ad   : > { %v1721_v35 = vpop.f32.mrb[52].mxu0  ;;  %v1794_v37 = vpop.f32.mrb[52].mxu1 }
 0x1ae   : > { %v2127_v36 = vmax.f32 %v1711_v14, %v1721_v35  ;;  %v1723_v38 = vpop.f32.mrb[53].mxu0  ;;  %v2129_v39 = vmax.f32 %v1784_v18, %v1794_v37  ;;  %v1796_v41 = vpop.f32.mrb[53].mxu1 }
 0x1af   : > { %v2128_v40 = vmax.f32 %v1713_v51, %v1723_v38  ;;  %v1725_v42 = vpop.f32.mrb[54].mxu0  ;;  %v2130_v43 = vmax.f32 %v1786_v20, %v1796_v41  ;;  %v1798_v26 = vpop.f32.mrb[54].mxu1 }
 0x1b0   : > { %v2151_v22 = vmax.f32 %v1715_v57, %v1725_v42  ;;  %v1727_v23 = vpop.f32.mrb[55].mxu0  ;;  %v2153_v46 = vmax.f32 %v1788_v27, %v1798_v26  ;;  %v1800_v5 = vpop.f32.mrb[55].mxu1 }
 0x1b1   : > { %v2152_v63 = vmax.f32 %v1717_v28, %v1727_v23  ;;  %v2154_v6 = vmax.f32 %v1790_v32, %v1800_v5 }
 0x1b5   : > { %v1731_v9 = vpop.f32.mrb[56].mxu0  ;;  %v1804_v10 = vpop.f32.mrb[56].mxu1 }
 0x1b6   : > { %v1733_v44 = vpop.f32.mrb[57].mxu0  ;;  %v1806_v45 = vpop.f32.mrb[57].mxu1 }
 0x1b7   : > { %v1735_v24 = vpop.f32.mrb[58].mxu0  ;;  %v1808_v29 = vpop.f32.mrb[58].mxu1 }
 0x1b8   : > { %v1737_v47 = vpop.f32.mrb[59].mxu0  ;;  %v1810_v48 = vpop.f32.mrb[59].mxu1 }
 0x1bd   : > { %v1741_v49 = vpop.f32.mrb[60].mxu0  ;;  %v1814_v50 = vpop.f32.mrb[60].mxu1 }
 0x1be   : > { %v2175_v56 = vmax.f32 %v1731_v9, %v1741_v49  ;;  %v1743_v53 = vpop.f32.mrb[61].mxu0  ;;  %v2177_v54 = vmax.f32 %v1804_v10, %v1814_v50  ;;  %v1816_v60 = vpop.f32.mrb[61].mxu1 }
 0x1bf   : > { %v2176_v58 = vmax.f32 %v1733_v44, %v1743_v53  ;;  %v1745_v59 = vpop.f32.mrb[62].mxu0  ;;  %v2178_v62 = vmax.f32 %v1806_v45, %v1816_v60  ;;  %v1818_v1 = vpop.f32.mrb[62].mxu1 }
 0x1c0   : > { %v2223_v61 = vmax.f32 %v2127_v36, %v2175_v56  ;;  %v2199_v0 = vmax.f32 %v1735_v24, %v1745_v59  ;;  %v1747_v2 = vpop.f32.mrb[63].mxu0  ;;  %v2225_v30 = vmax.f32 %v2129_v39, %v2177_v54  ;;  %v2201_v4 = vmax.f32 %v1808_v29, %v1818_v1  ;;  %v1820_v8 = vpop.f32.mrb[63].mxu1 }
 0x1c1   : > { %v2224_v3 = vmax.f32 %v2128_v40, %v2176_v58  ;;  %v2200_v7 = vmax.f32 %v1737_v47, %v1747_v2  ;;  %v2226_v12 = vmax.f32 %v2130_v43, %v2178_v62  ;;  %v2202_v15 = vmax.f32 %v1810_v48, %v1820_v8 }
 0x1c2   : > { %v2283_v11 = vadd.f32 %v3643_v13, %v2223_v61  ;;  %v2247_v14 = vmax.f32 %v2151_v22, %v2199_v0  ;;  %v2285_v16 = vadd.f32 %v3643_v13, %v2225_v30  ;;  %v2249_v18 = vmax.f32 %v2153_v46, %v2201_v4 }
 0x1c3   : > { %v2284_v17 = vadd.f32 %v3643_v13, %v2224_v3  ;;  %v2248_v51 = vmax.f32 %v2152_v63, %v2200_v7  ;;  %v2286_v52 = vadd.f32 %v3643_v13, %v2226_v12  ;;  %v2250_v20 = vmax.f32 %v2154_v6, %v2202_v15 }
 0x1c4   : > { %v2331_v55 = vmax.f32 %v2283_v11, 0.0  ;;  %v2307_v19 = vadd.f32 %v3645_v34, %v2247_v14  ;;  %v2333_v57 = vmax.f32 %v2285_v16, 0.0  ;;  %v2309_v25 = vadd.f32 %v3645_v34, %v2249_v18 }
 0x1c5   : > { %v2332_v21 = vmax.f32 %v2284_v17, 0.0  ;;  %v2308_v27 = vadd.f32 %v3645_v34, %v2248_v51  ;;  %v1857_v28 = vpop.f32.mrb[64].mxu0  ;;  %v2334_v31 = vmax.f32 %v2286_v52, 0.0  ;;  %v2310_v33 = vadd.f32 %v3645_v34, %v2250_v20  ;;  %v1930_v35 = vpop.f32.mrb[64].mxu1 }
 0x1c6   : > { %v2355_v32 = vmax.f32 %v2307_v19, 0.0  ;;  %v1859_v36 = vpop.f32.mrb[65].mxu0  ;;  %v2357_v38 = vmax.f32 %v2309_v25, 0.0  ;;  %v1932_v40 = vpop.f32.mrb[65].mxu1 }
 0x1c7   : > { %v2876_v37 = vpack.c.bf16 %v2332_v21, %v2331_v55  ;;  %v2356_v39 = vmax.f32 %v2308_v27, 0.0  ;;  %v1861_v41 = vpop.f32.mrb[66].mxu0  ;;  %v2877_v42 = vpack.c.bf16 %v2334_v31, %v2333_v57  ;;  %v2358_v43 = vmax.f32 %v2310_v33, 0.0  ;;  %v1934_v22 = vpop.f32.mrb[66].mxu1 }
 0x1c8   : > { %v1863_v26 = vpop.f32.mrb[67].mxu0  ;;  %v1936_v46 = vpop.f32.mrb[67].mxu1 }
 0x1c9   : > { %2517 = vst [vmem:[%s3657_s12 + $0x30] sm:$0xff] %v2876_v37  ;;  %v2888_v23 = vpack.c.bf16 %v2356_v39, %v2355_v32  ;;  %2518 = vst [vmem:[%s3657_s12 + $0x38] sm:$0xff] %v2877_v42  ;;  %v2889_v63 = vpack.c.bf16 %v2358_v43, %v2357_v38 }
 0x1cb   : > { %2529 = vst [vmem:[%s3657_s12 + $0x90] sm:$0xff] %v2888_v23  ;;  %2530 = vst [vmem:[%s3657_s12 + $0x98] sm:$0xff] %v2889_v63 }
 0x1cd   : > { %v1867_v5 = vpop.f32.mrb[68].mxu0  ;;  %v1940_v9 = vpop.f32.mrb[68].mxu1 }
 0x1ce   : > { %v2131_v6 = vmax.f32 %v1857_v28, %v1867_v5  ;;  %v1869_v10 = vpop.f32.mrb[69].mxu0  ;;  %v2133_v44 = vmax.f32 %v1930_v35, %v1940_v9  ;;  %v1942_v24 = vpop.f32.mrb[69].mxu1 }
 0x1cf   : > { %v2132_v45 = vmax.f32 %v1859_v36, %v1869_v10  ;;  %v1871_v29 = vpop.f32.mrb[70].mxu0  ;;  %v2134_v47 = vmax.f32 %v1932_v40, %v1942_v24  ;;  %v1944_v49 = vpop.f32.mrb[70].mxu1 }
 0x1d0   : > { %v2155_v48 = vmax.f32 %v1861_v41, %v1871_v29  ;;  %v1873_v56 = vpop.f32.mrb[71].mxu0  ;;  %v2157_v50 = vmax.f32 %v1934_v22, %v1944_v49  ;;  %v1946_v54 = vpop.f32.mrb[71].mxu1 }
 0x1d1   : > { %v2156_v53 = vmax.f32 %v1863_v26, %v1873_v56  ;;  %v2158_v58 = vmax.f32 %v1936_v46, %v1946_v54 }
 0x1d5   : > { %v1877_v60 = vpop.f32.mrb[72].mxu0  ;;  %v1950_v59 = vpop.f32.mrb[72].mxu1 }
 0x1d6   : > { %v1879_v61 = vpop.f32.mrb[73].mxu0  ;;  %v1952_v62 = vpop.f32.mrb[73].mxu1 }
 0x1d7   : > { %v1881_v0 = vpop.f32.mrb[74].mxu0  ;;  %v1954_v1 = vpop.f32.mrb[74].mxu1 }
 0x1d8   : > { %v1883_v2 = vpop.f32.mrb[75].mxu0  ;;  %v1956_v30 = vpop.f32.mrb[75].mxu1 }
 0x1dd   : > { %v1887_v3 = vpop.f32.mrb[76].mxu0  ;;  %v1960_v7 = vpop.f32.mrb[76].mxu1 }
 0x1de   : > { %v2179_v4 = vmax.f32 %v1877_v60, %v1887_v3  ;;  %v1889_v8 = vpop.f32.mrb[77].mxu0  ;;  %v2181_v11 = vmax.f32 %v1950_v59, %v1960_v7  ;;  %v1962_v14 = vpop.f32.mrb[77].mxu1 }
 0x1df   : > { %v2180_v12 = vmax.f32 %v1879_v61, %v1889_v8  ;;  %v1891_v15 = vpop.f32.mrb[78].mxu0  ;;  %v2182_v17 = vmax.f32 %v1952_v62, %v1962_v14  ;;  %v1964_v51 = vpop.f32.mrb[78].mxu1 }
 0x1e0   : > { %v2227_v16 = vmax.f32 %v2131_v6, %v2179_v4  ;;  %v2203_v18 = vmax.f32 %v1881_v0, %v1891_v15  ;;  %v1893_v55 = vpop.f32.mrb[79].mxu0  ;;  %v2229_v52 = vmax.f32 %v2133_v44, %v2181_v11  ;;  %v2205_v20 = vmax.f32 %v1954_v1, %v1964_v51  ;;  %v1966_v21 = vpop.f32.mrb[79].mxu1 }
 0x1e1   : > { %v2228_v19 = vmax.f32 %v2132_v45, %v2180_v12  ;;  %v2204_v57 = vmax.f32 %v1883_v2, %v1893_v55  ;;  %v2230_v27 = vmax.f32 %v2134_v47, %v2182_v17  ;;  %v2206_v31 = vmax.f32 %v1956_v30, %v1966_v21 }
 0x1e2   : > { %v2287_v25 = vadd.f32 %v3643_v13, %v2227_v16  ;;  %v2251_v28 = vmax.f32 %v2155_v48, %v2203_v18  ;;  %v2289_v32 = vadd.f32 %v3643_v13, %v2229_v52  ;;  %v2253_v35 = vmax.f32 %v2157_v50, %v2205_v20 }
 0x1e3   : > { %v2288_v33 = vadd.f32 %v3643_v13, %v2228_v19  ;;  %v2252_v36 = vmax.f32 %v2156_v53, %v2204_v57  ;;  %v2290_v38 = vadd.f32 %v3643_v13, %v2230_v27  ;;  %v2254_v40 = vmax.f32 %v2158_v58, %v2206_v31 }
 0x1e4   : > { %v2335_v37 = vmax.f32 %v2287_v25, 0.0  ;;  %v2311_v39 = vadd.f32 %v3645_v34, %v2251_v28  ;;  %v2337_v41 = vmax.f32 %v2289_v32, 0.0  ;;  %v2313_v43 = vadd.f32 %v3645_v34, %v2253_v35 }
 0x1e5   : > { %v2336_v42 = vmax.f32 %v2288_v33, 0.0  ;;  %v2312_v22 = vadd.f32 %v3645_v34, %v2252_v36  ;;  %v2003_v26 = vpop.f32.mrb[80].mxu0  ;;  %v2338_v23 = vmax.f32 %v2290_v38, 0.0  ;;  %v2314_v63 = vadd.f32 %v3645_v34, %v2254_v40  ;;  %v2076_v5 = vpop.f32.mrb[80].mxu1 }
 0x1e6   : > { %v2359_v46 = vmax.f32 %v2311_v39, 0.0  ;;  %v2005_v6 = vpop.f32.mrb[81].mxu0  ;;  %v2361_v10 = vmax.f32 %v2313_v43, 0.0  ;;  %v2078_v45 = vpop.f32.mrb[81].mxu1 }
 0x1e7   : > { %v2878_v9 = vpack.c.bf16 %v2336_v42, %v2335_v37  ;;  %v2360_v44 = vmax.f32 %v2312_v22, 0.0  ;;  %v2007_v24 = vpop.f32.mrb[82].mxu0  ;;  %v2879_v29 = vpack.c.bf16 %v2338_v23, %v2337_v41  ;;  %v2362_v47 = vmax.f32 %v2314_v63, 0.0  ;;  %v2080_v48 = vpop.f32.mrb[82].mxu1 }
 0x1e8   : > { %v2009_v49 = vpop.f32.mrb[83].mxu0  ;;  %v2082_v50 = vpop.f32.mrb[83].mxu1 }
 0x1e9   : > { %2519 = vst [vmem:[%s3657_s12 + $0x40] sm:$0xff] %v2878_v9  ;;  %v2890_v56 = vpack.c.bf16 %v2360_v44, %v2359_v46  ;;  %2520 = vst [vmem:[%s3657_s12 + $0x48] sm:$0xff] %v2879_v29  ;;  %v2891_v53 = vpack.c.bf16 %v2362_v47, %v2361_v10 }
 0x1eb   : > { %2531 = vst [vmem:[%s3657_s12 + $0xa0] sm:$0xff] %v2890_v56  ;;  %2532 = vst [vmem:[%s3657_s12 + $0xa8] sm:$0xff] %v2891_v53 }
 0x1ed   : > { %v2013_v54 = vpop.f32.mrb[84].mxu0  ;;  %v2086_v60 = vpop.f32.mrb[84].mxu1 }
 0x1ee   : > { %v2135_v58 = vmax.f32 %v2003_v26, %v2013_v54  ;;  %v2015_v59 = vpop.f32.mrb[85].mxu0  ;;  %v2137_v61 = vmax.f32 %v2076_v5, %v2086_v60  ;;  %v2088_v0 = vpop.f32.mrb[85].mxu1 }
 0x1ef   : > { %v2136_v62 = vmax.f32 %v2005_v6, %v2015_v59  ;;  %v2017_v1 = vpop.f32.mrb[86].mxu0  ;;  %v2138_v2 = vmax.f32 %v2078_v45, %v2088_v0  ;;  %v2090_v3 = vpop.f32.mrb[86].mxu1  ;;  %v2561_v0 = vld [vmem:[%s3657_s12 + $0x10] sm:$0xff] (%p3005_p5) }
 0x1f0   : > { %v2159_v30 = vmax.f32 %v2007_v24, %v2017_v1  ;;  %v2019_v4 = vpop.f32.mrb[87].mxu0  ;;  %v2161_v7 = vmax.f32 %v2080_v48, %v2090_v3  ;;  %v2092_v11 = vpop.f32.mrb[87].mxu1  ;;  %v2563_v1 = vld [vmem:[%s3657_s12 + $0x18] sm:$0xff] (%p3005_p5)  ;;  %v2569_v3 = vld [vmem:[%s3657_s12 + $0x30] sm:$0xff] (%p3005_p5)  ;;  %2562 = vst [vmem:[%s3736_s25 + $0x10] sm:$0xff] (%p3005_p5), %v2561_v0 }
 0x1f1   : > { %v2160_v8 = vmax.f32 %v2009_v49, %v2019_v4  ;;  %v2162_v12 = vmax.f32 %v2082_v50, %v2092_v11  ;;  %v2571_v4 = vld [vmem:[%s3657_s12 + $0x38] sm:$0xff] (%p3005_p5)  ;;  %2564 = vst [vmem:[%s3736_s25 + $0x18] sm:$0xff] (%p3005_p5), %v2563_v1  ;;  %2570 = vst [vmem:[%s3736_s25 + $0x30] sm:$0xff] (%p3005_p5), %v2569_v3 }
 0x1f2   : > { %2572 = vst [vmem:[%s3736_s25 + $0x38] sm:$0xff] (%p3005_p5), %v2571_v4 }
 0x1f5   : > { %v2023_v14 = vpop.f32.mrb[88].mxu0  ;;  %v2096_v15 = vpop.f32.mrb[88].mxu1 }
 0x1f6   : > { %v2025_v16 = vpop.f32.mrb[89].mxu0  ;;  %v2098_v17 = vpop.f32.mrb[89].mxu1 }
 0x1f7   : > { %v2027_v18 = vpop.f32.mrb[90].mxu0  ;;  %v2100_v51 = vpop.f32.mrb[90].mxu1 }
 0x1f8   : > { %v2029_v55 = vpop.f32.mrb[91].mxu0  ;;  %v2102_v52 = vpop.f32.mrb[91].mxu1 }
 0x1fd   : > { %v2033_v19 = vpop.f32.mrb[92].mxu0  ;;  %v2106_v57 = vpop.f32.mrb[92].mxu1 }
 0x1fe   : > { %v2183_v20 = vmax.f32 %v2023_v14, %v2033_v19  ;;  %v2035_v21 = vpop.f32.mrb[93].mxu0  ;;  %v2185_v25 = vmax.f32 %v2096_v15, %v2106_v57  ;;  %v2108_v28 = vpop.f32.mrb[93].mxu1  ;;  %v2581_v14 = vld [vmem:[%s3657_s12 + $0x60] sm:$0xff] (%p3005_p5)  ;;  %v2583_v15 = vld [vmem:[%s3657_s12 + $0x68] sm:$0xff] (%p3005_p5) }
 0x1ff   : > { %v2184_v27 = vmax.f32 %v2025_v16, %v2035_v21  ;;  %v2037_v31 = vpop.f32.mrb[94].mxu0  ;;  %v2186_v33 = vmax.f32 %v2098_v17, %v2108_v28  ;;  %v2110_v36 = vpop.f32.mrb[94].mxu1  ;;  %v2585_v16 = vld [vmem:[%s3657_s12 + $0x70] sm:$0xff] (%p3005_p5)  ;;  %2582 = vst [vmem:[%s3736_s25 + $0xc0] sm:$0xff] (%p3005_p5), %v2581_v14  ;;  %2584 = vst [vmem:[%s3736_s25 + $0xc8] sm:$0xff] (%p3005_p5), %v2583_v15  ;;  %v2587_v17 = vld [vmem:[%s3657_s12 + $0x78] sm:$0xff] (%p3005_p5) }
 0x200   : > { %v2231_v32 = vmax.f32 %v2135_v58, %v2183_v20  ;;  %v2207_v35 = vmax.f32 %v2027_v18, %v2037_v31  ;;  %v2039_v37 = vpop.f32.mrb[95].mxu0  ;;  %v2233_v38 = vmax.f32 %v2137_v61, %v2185_v25  ;;  %v2209_v40 = vmax.f32 %v2100_v51, %v2110_v36  ;;  %v2112_v42 = vpop.f32.mrb[95].mxu1  ;;  %2586 = vst [vmem:[%s3736_s25 + $0xd0] sm:$0xff] (%p3005_p5), %v2585_v16  ;;  %v2589_v18 = vld [vmem:[%s3657_s12 + $0x80] sm:$0xff] (%p3005_p5)  ;;  %v2591_v51 = vld [vmem:[%s3657_s12 + $0x88] sm:$0xff] (%p3005_p5) }
 0x201   : > { %v2232_v39 = vmax.f32 %v2136_v62, %v2184_v27  ;;  %v2208_v41 = vmax.f32 %v2029_v55, %v2039_v37  ;;  %v2234_v22 = vmax.f32 %v2138_v2, %v2186_v33  ;;  %v2210_v23 = vmax.f32 %v2102_v52, %v2112_v42  ;;  %v2559_v62 = vld [vmem:[%s3657_s12 + $0x8] sm:$0xff] (%p3005_p5)  ;;  %v2565_v2 = vld [vmem:[%s3657_s12 + $0x20] sm:$0xff] (%p3005_p5)  ;;  %2588 = vst [vmem:[%s3736_s25 + $0xd8] sm:$0xff] (%p3005_p5), %v2587_v17  ;;  %v2593_v55 = vld [vmem:[%s3657_s12 + $0x90] sm:$0xff] (%p3005_p5) }
 0x202   : > { %v2291_v43 = vadd.f32 %v3643_v13, %v2231_v32  ;;  %v2255_v26 = vmax.f32 %v2159_v30, %v2207_v35  ;;  %v2293_v46 = vadd.f32 %v3643_v13, %v2233_v38  ;;  %v2257_v5 = vmax.f32 %v2161_v7, %v2209_v40  ;;  %v2567_v30 = vld [vmem:[%s3657_s12 + $0x28] sm:$0xff] (%p3005_p5)  ;;  %v2573_v7 = vld [vmem:[%s3657_s12 + $0x40] sm:$0xff] (%p3005_p5)  ;;  %2560 = vst [vmem:[%s3736_s25 + $0x8] sm:$0xff] (%p3005_p5), %v2559_v62  ;;  %v2595_v52 = vld [vmem:[%s3657_s12 + $0x98] sm:$0xff] (%p3005_p5) }
 0x203   : > { %v2292_v63 = vadd.f32 %v3643_v13, %v2232_v39  ;;  %v2256_v6 = vmax.f32 %v2160_v8, %v2208_v41  ;;  %v2294_v10 = vadd.f32 %v3643_v13, %v2234_v22  ;;  %v2258_v45 = vmax.f32 %v2162_v12, %v2210_v23  ;;  %2566 = vst [vmem:[%s3736_s25 + $0x20] sm:$0xff] (%p3005_p5), %v2565_v2  ;;  %v2575_v8 = vld [vmem:[%s3657_s12 + $0x48] sm:$0xff] (%p3005_p5)  ;;  %v2597_v19 = vld [vmem:[%s3657_s12 + $0xa0] sm:$0xff] (%p3005_p5) }
 0x204   : > { %v2339_v9 = vmax.f32 %v2291_v43, 0.0  ;;  %v2315_v44 = vadd.f32 %v3645_v34, %v2255_v26  ;;  %v2341_v24 = vmax.f32 %v2293_v46, 0.0  ;;  %v2317_v47 = vadd.f32 %v3645_v34, %v2257_v5  ;;  %2568 = vst [vmem:[%s3736_s25 + $0x28] sm:$0xff] (%p3005_p5), %v2567_v30  ;;  %2574 = vst [vmem:[%s3736_s25 + $0x40] sm:$0xff] (%p3005_p5), %v2573_v7  ;;  %v2599_v20 = vld [vmem:[%s3657_s12 + $0xa8] sm:$0xff] (%p3005_p5) }
 0x205   : > { %v2340_v29 = vmax.f32 %v2292_v63, 0.0  ;;  %v2316_v48 = vadd.f32 %v3645_v34, %v2256_v6  ;;  %v2342_v49 = vmax.f32 %v2294_v10, 0.0  ;;  %v2318_v50 = vadd.f32 %v3645_v34, %v2258_v45  ;;  %2541 = sbr.rel (!%p3005_p5) target bundleno = 532 (0x214), region = 59  ;;  %v2557_v34 = vld [vmem:[%s3657_s12] sm:$0xff] (%p3005_p5)  ;;  %2576 = vst [vmem:[%s3736_s25 + $0x48] sm:$0xff] (%p3005_p5), %v2575_v8  ;;  %2590 = vst [vmem:[%s3736_s25 + $0xe0] sm:$0xff] (%p3005_p5), %v2589_v18 }
 0x206   : > { %v2363_v56 = vmax.f32 %v2315_v44, 0.0  ;;  %v2365_v54 = vmax.f32 %v2317_v47, 0.0  ;;  %2558 = vst [vmem:[%s3736_s25] sm:$0xff] (%p3005_p5), %v2557_v34  ;;  %2592 = vst [vmem:[%s3736_s25 + $0xe8] sm:$0xff] (%p3005_p5), %v2591_v51 }
 0x207   : > { %v2880_v53 = vpack.c.bf16 %v2340_v29, %v2339_v9  ;;  %v2364_v58 = vmax.f32 %v2316_v48, 0.0  ;;  %v2881_v13 = vpack.c.bf16 %v2342_v49, %v2341_v24  ;;  %v2366_v60 = vmax.f32 %v2318_v50, 0.0  ;;  %2594 = vst [vmem:[%s3736_s25 + $0xf0] sm:$0xff] (%p3005_p5), %v2593_v55  ;;  %2596 = vst [vmem:[%s3736_s25 + $0xf8] sm:$0xff] (%p3005_p5), %v2595_v52 }
 0x208   : > { %2598 = vst [vmem:[%s3736_s25 + $0x100] sm:$0xff] (%p3005_p5), %v2597_v19  ;;  %2600 = vst [vmem:[%s3736_s25 + $0x108] sm:$0xff] (%p3005_p5), %v2599_v20 }
 0x209   : > { %2521 = vst [vmem:[%s3657_s12 + $0x50] sm:$0xff] %v2880_v53  ;;  %v2892_v59 = vpack.c.bf16 %v2364_v58, %v2363_v56  ;;  %2522 = vst [vmem:[%s3657_s12 + $0x58] sm:$0xff] %v2881_v13  ;;  %v2893_v61 = vpack.c.bf16 %v2366_v60, %v2365_v54 }
 0x20b   : > { %2533 = vst [vmem:[%s3657_s12 + $0xb0] sm:$0xff] %v2892_v59  ;;  %2534 = vst [vmem:[%s3657_s12 + $0xb8] sm:$0xff] %v2893_v61 }
 0x210   : > { %v2577_v11 = vld [vmem:[%s3657_s12 + $0x50] sm:$0xff]  ;;  %v2579_v12 = vld [vmem:[%s3657_s12 + $0x58] sm:$0xff] }
 0x211   : > { %2578 = vst [vmem:[%s3736_s25 + $0x50] sm:$0xff] %v2577_v11  ;;  %2580 = vst [vmem:[%s3736_s25 + $0x58] sm:$0xff] %v2579_v12 }
 0x212   : > { %v2601_v57 = vld [vmem:[%s3657_s12 + $0xb0] sm:$0xff]  ;;  %v2603_v21 = vld [vmem:[%s3657_s12 + $0xb8] sm:$0xff] }
 0x213   : > { %2602 = vst [vmem:[%s3736_s25 + $0x110] sm:$0xff] %v2601_v57  ;;  %2604 = vst [vmem:[%s3736_s25 + $0x118] sm:$0xff] %v2603_v21 }
 0x214 PF: > { %p10_p10 = scmp.ge.s32.totalorder %s2992_s16, 4   ;;  %s3795_s12 = smov %s2947_s13 }
 0x215   : > { %s3796_s13 = smov %s3003_s19  ;;  %s3797_s14 = smov %s2992_s16 }
 0x216   :  { %12 = sbr.rel (!%p10_p10) target bundleno = 2 (0x2), region = 113 }

// kernel: cnn_forward.4
= control target key start
LH: loop header
LB: loop body
LE: loop exit
PB: predicated region body
PF: predicated region fallthrough
CT: control target
= control target key end

     0   :  { %v1667_v1 = vmov 0   ;;  %vm699_vm0 = vcmask 130048   ;;  %vm1269_vm1 = vcmask 666624   ;;  %s2244_s0 = inlined_call_operand.vmem [shape: bf16[400,338], index: 0, kind: input, shape index: {}]   ;;  %s2245_s1 = inlined_call_operand.vmem [shape: bf16[128,400], index: 1, kind: input, shape index: {}]   ;;  %s2246_s2 = inlined_call_operand.vmem [shape: f32[32,1], index: 2, kind: input, shape index: {}]   ;;  %s2247_s3 = inlined_call_operand.vmem [shape: bf16[32,338], index: 3, kind: output, shape index: {}]  }
   0x1   :  { %v1519_v0 = vld [vmem:[%s2244_s0 + $0x4] ss:$12 sps:$4 sm:$0xff]   ;;  %1517 = vset.pattern.permute.xlu0 %v1667_v1  ;;  %1518 = vset.pattern.permute.xlu1 %v1667_v1  ;;  %v1521_v2 = vld [vmem:[%s2244_s0 + $0xc8] ss:$12 sps:$4 sm:$0xff]   ;;  %v1522_v3 = vld [vmem:[%s2244_s0] ss:$12 sps:$4 sm:$0xff]  }
   0x2   :  { %724 = vmatprep.subr.bf16.mxu0 %v1519_v0  ;;  %1420 = vmatprep.subr.bf16.mxu1 %v1521_v2  ;;  %v1523_v4 = vld [vmem:[%s2244_s0 + $0x8] ss:$12 sps:$4 sm:$0xff]   ;;  %v1526_v6 = vld [vmem:[%s2244_s0 + $0xe0] ss:$12 sps:$4 sm:$0xff]   ;;  %v1527_v7 = vld [vmem:[%s2244_s0 + $0x18] ss:$12 sps:$4 sm:$0xff]  }
   0x3   :  { %725 = vmatpush1.bf16.msra.mxu0 %v1522_v3  ;;  %v1524_v5 = vld [vmem:[%s2244_s0 + $0x1c] ss:$12 sps:$4 sm:$0xff]   ;;  %1421 = vmatpush3.bf16.msra.mxu1 %v1523_v4  ;;  %v1528_v8 = vld [vmem:[%s2244_s0 + $0x20] ss:$12 sps:$4 sm:$0xff]   ;;  %v1531_v10 = vld [vmem:[%s2244_s0 + $0xf8] ss:$12 sps:$4 sm:$0xff]  }
   0x4   :  { %726 = vmatprep.subr.bf16.mxu0 %v1524_v5  ;;  %1422 = vmatprep.subr.bf16.mxu1 %v1526_v6  ;;  %v1529_v9 = vld [vmem:[%s2244_s0 + $0x34] ss:$12 sps:$4 sm:$0xff]   ;;  %v1532_v11 = vld [vmem:[%s2244_s0 + $0x30] ss:$12 sps:$4 sm:$0xff]   ;;  %v1533_v12 = vld [vmem:[%s2244_s0 + $0x38] ss:$12 sps:$4 sm:$0xff]  }
   0x5   :  { %v1534_v13 = vld [vmem:[%s2244_s0 + $0x4c] ss:$12 sps:$4 sm:$0xff]   ;;  %v1536_v14 = vld [vmem:[%s2244_s0 + $0x110] ss:$12 sps:$4 sm:$0xff]   ;;  %v1537_v15 = vld [vmem:[%s2244_s0 + $0x48] ss:$12 sps:$4 sm:$0xff]  }
   0x6   :  { %v1538_v16 = vld [vmem:[%s2244_s0 + $0x50] ss:$12 sps:$4 sm:$0xff]   ;;  %v1541_v18 = vld [vmem:[%s2244_s0 + $0x128] ss:$12 sps:$4 sm:$0xff]   ;;  %v1542_v19 = vld [vmem:[%s2244_s0 + $0x60] ss:$12 sps:$4 sm:$0xff]  }
   0x7   :  { %727 = vmatpush1.bf16.msra.mxu0 %v1527_v7  ;;  %1423 = vmatpush3.bf16.msra.mxu1 %v1528_v8  ;;  %v1539_v17 = vld [vmem:[%s2244_s0 + $0x64] ss:$12 sps:$4 sm:$0xff]   ;;  %v1543_v20 = vld [vmem:[%s2244_s0 + $0x68] ss:$12 sps:$4 sm:$0xff]   ;;  %v1546_v22 = vld [vmem:[%s2244_s0 + $0x140] ss:$12 sps:$4 sm:$0xff]  }
   0x8   :  { %728 = vmatprep.subr.bf16.mxu0 %v1529_v9  ;;  %1424 = vmatprep.subr.bf16.mxu1 %v1531_v10  ;;  %v1544_v21 = vld [vmem:[%s2244_s0 + $0x7c] ss:$12 sps:$4 sm:$0xff]   ;;  %v1547_v23 = vld [vmem:[%s2244_s0 + $0x78] ss:$12 sps:$4 sm:$0xff]   ;;  %v1548_v24 = vld [vmem:[%s2244_s0 + $0x80] ss:$12 sps:$4 sm:$0xff]  }
   0x9   :  { %v1549_v25 = vld [vmem:[%s2244_s0 + $0x94] ss:$12 sps:$4 sm:$0xff]   ;;  %v1551_v26 = vld [vmem:[%s2244_s0 + $0x158] ss:$12 sps:$4 sm:$0xff]   ;;  %v1552_v27 = vld [vmem:[%s2244_s0 + $0x90] ss:$12 sps:$4 sm:$0xff]  }
   0xa   :  { %v1553_v28 = vld [vmem:[%s2244_s0 + $0x98] ss:$12 sps:$4 sm:$0xff]   ;;  %v1556_v30 = vld [vmem:[%s2244_s0 + $0x170] ss:$12 sps:$4 sm:$0xff]   ;;  %v1557_v31 = vld [vmem:[%s2244_s0 + $0xa8] ss:$12 sps:$4 sm:$0xff]  }
   0xb   :  { %729 = vmatpush1.bf16.msra.mxu0 %v1532_v11  ;;  %1425 = vmatpush3.bf16.msra.mxu1 %v1533_v12  ;;  %v1554_v29 = vld [vmem:[%s2244_s0 + $0xac] ss:$12 sps:$4 sm:$0xff]   ;;  %v1561_v32 = vld [vmem:[%s2245_s1 + $0x4] ss:$16 sps:$4 sm:$0xff]   ;;  %v1558_v33 = vld [vmem:[%s2244_s0 + $0xb0] ss:$12 sps:$4 sm:$0xff]  }
   0xc   :  { %730 = vmatprep.subr.bf16.mxu0 %v1534_v13  ;;  %1426 = vmatprep.subr.bf16.mxu1 %v1536_v14  ;;  %v1562_v34 = vld [vmem:[%s2244_s0 + $0xc4] ss:$12 sps:$4 sm:$0xff]   ;;  %v1564_v36 = vld [vmem:[%s2244_s0 + $0xc0] ss:$12 sps:$4 sm:$0xff]   ;;  %v1565_v37 = vld [vmem:[%s2244_s0 + $0xdc] ss:$12 sps:$4 sm:$0xff]  }
   0xd   :  { %982 = vmatprep.mubr.bf16.mxu1 %v1561_v32  ;;  %v1795_v35 = vld [vmem:[%s2245_s1] ss:$16 sps:$4 sm:$0xff]   ;;  %756 = vmatprep.mubr.bf16.mxu0 %v1561_v32  ;;  %v1806_v38 = vld [vmem:[%s2245_s1 + $0x24] ss:$16 sps:$4 sm:$0xff]   ;;  %v1574_v43 = vld [vmem:[%s2244_s0 + $0x10c] ss:$12 sps:$4 sm:$0xff]  }
   0xe   :  { %v1567_v39 = vld [vmem:[%s2244_s0 + $0xd8] ss:$12 sps:$4 sm:$0xff]   ;;  %v1570_v40 = vld [vmem:[%s2244_s0 + $0xf4] ss:$12 sps:$4 sm:$0xff]   ;;  %v1573_v42 = vld [vmem:[%s2244_s0 + $0xf0] ss:$12 sps:$4 sm:$0xff]  }
   0xf   :  { %731 = vmatpush1.bf16.msra.mxu0 %v1537_v15  ;;  %1427 = vmatpush3.bf16.msra.mxu1 %v1538_v16  ;;  %v1820_v41 = vld [vmem:[%s2245_s1 + $0x20] ss:$16 sps:$4 sm:$0xff]   ;;  %v1831_v44 = vld [vmem:[%s2245_s1 + $0x44] ss:$16 sps:$4 sm:$0xff]   ;;  %v1583_v51 = vld [vmem:[%s2244_s0 + $0x13c] ss:$12 sps:$4 sm:$0xff]  }
  0x10   :  { %732 = vmatprep.subr.bf16.mxu0 %v1539_v17  ;;  %1428 = vmatprep.subr.bf16.mxu1 %v1541_v18  ;;  %v1595_v45 = vld [vmem:[%s2244_s0 + $0x188] ss:$12 sps:$4 sm:$0xff]   ;;  %v1579_v47 = vld [vmem:[%s2244_s0 + $0x124] ss:$12 sps:$4 sm:$0xff]   ;;  %v1582_v49 = vld [vmem:[%s2244_s0 + $0x120] ss:$12 sps:$4 sm:$0xff]  }
  0x11   :  { %v1576_v46 = vld [vmem:[%s2244_s0 + $0x108] ss:$12 sps:$4 sm:$0xff]   ;;  %v1847_v48 = vld [vmem:[%s2245_s1 + $0x40] ss:$16 sps:$4 sm:$0xff]   ;;  %v1603_v53 = vld [vmem:[%s2244_s0 + $0x1b8] ss:$12 sps:$4 sm:$0xff]  }
  0x12   :  { %v1602_v50 = vld [vmem:[%s2244_s0 + $0x1a0] ss:$12 sps:$4 sm:$0xff]   ;;  %v1862_v52 = vld [vmem:[%s2245_s1 + $0x64] ss:$16 sps:$4 sm:$0xff]   ;;  %v1610_v56 = vld [vmem:[%s2244_s0 + $0x1d0] ss:$12 sps:$4 sm:$0xff]  }
  0x13   :  { %733 = vmatpush1.bf16.msra.mxu0 %v1542_v19  ;;  %1429 = vmatpush3.bf16.msra.mxu1 %v1543_v20  ;;  %v1585_v54 = vld [vmem:[%s2244_s0 + $0x138] ss:$12 sps:$4 sm:$0xff]   ;;  %v1588_v55 = vld [vmem:[%s2244_s0 + $0x154] ss:$12 sps:$4 sm:$0xff]   ;;  %v1591_v58 = vld [vmem:[%s2244_s0 + $0x150] ss:$12 sps:$4 sm:$0xff]  }
  0x14   :  { %734 = vmatprep.subr.bf16.mxu0 %v1544_v21  ;;  %1430 = vmatprep.subr.bf16.mxu1 %v1546_v22  ;;  %v1882_v57 = vld [vmem:[%s2245_s1 + $0x60] ss:$16 sps:$4 sm:$0xff]   ;;  %v1592_v59 = vld [vmem:[%s2244_s0 + $0x16c] ss:$12 sps:$4 sm:$0xff]   ;;  %v1894_v60 = vld [vmem:[%s2245_s1 + $0x84] ss:$16 sps:$4 sm:$0xff]  }
  0x15   :  { %v1611_v61 = vld [vmem:[%s2244_s0 + $0x1e8] ss:$12 sps:$4 sm:$0xff]   ;;  %v1600_v63 = vld [vmem:[%s2244_s0 + $0x184] ss:$12 sps:$4 sm:$0xff]   ;;  %v1618_v0 = vld [vmem:[%s2244_s0 + $0x200] ss:$12 sps:$4 sm:$0xff]  }
  0x16   :  { %v1594_v62 = vld [vmem:[%s2244_s0 + $0x168] ss:$12 sps:$4 sm:$0xff]   ;;  %v1598_v2 = vld [vmem:[%s2244_s0 + $0x180] ss:$12 sps:$4 sm:$0xff]   ;;  %v1619_v6 = vld [vmem:[%s2244_s0 + $0x218] ss:$12 sps:$4 sm:$0xff]  }
  0x17   :  { %735 = vmatpush1.bf16.msra.mxu0 %v1547_v23  ;;  %1431 = vmatpush3.bf16.msra.mxu1 %v1548_v24  ;;  %v1918_v3 = vld [vmem:[%s2245_s1 + $0x80] ss:$16 sps:$4 sm:$0xff]   ;;  %v1923_v4 = vld [vmem:[%s2245_s1 + $0xa4] ss:$16 sps:$4 sm:$0xff]   ;;  %v1608_v5 = vld [vmem:[%s2244_s0 + $0x19c] ss:$12 sps:$4 sm:$0xff]  }
  0x18   :  { %736 = vmatprep.subr.bf16.mxu0 %v1549_v25  ;;  %1432 = vmatprep.subr.bf16.mxu1 %v1551_v26  ;;  %v1606_v7 = vld [vmem:[%s2244_s0 + $0x198] ss:$12 sps:$4 sm:$0xff]   ;;  %v1614_v8 = vld [vmem:[%s2244_s0 + $0x1b4] ss:$12 sps:$4 sm:$0xff]   ;;  %v1626_v9 = vld [vmem:[%s2244_s0 + $0x230] ss:$12 sps:$4 sm:$0xff]  }
  0x19   :  { %v1948_v10 = vld [vmem:[%s2245_s1 + $0xa0] ss:$16 sps:$4 sm:$0xff]   ;;  %v1957_v12 = vld [vmem:[%s2245_s1 + $0xc4] ss:$16 sps:$4 sm:$0xff]   ;;  %v1622_v13 = vld [vmem:[%s2244_s0 + $0x1cc] ss:$12 sps:$4 sm:$0xff]  }
  0x1a   :  { %v1612_v11 = vld [vmem:[%s2244_s0 + $0x1b0] ss:$12 sps:$4 sm:$0xff]   ;;  %v1630_v14 = vld [vmem:[%s2244_s0 + $0x248] ss:$12 sps:$4 sm:$0xff]   ;;  %v1627_v20 = vld [vmem:[%s2244_s0 + $0x1e0] ss:$12 sps:$4 sm:$0xff]  }
  0x1b   :  { %737 = vmatpush1.bf16.msra.mxu0 %v1552_v27  ;;  %1433 = vmatpush3.bf16.msra.mxu1 %v1553_v28  ;;  %v1620_v15 = vld [vmem:[%s2244_s0 + $0x1c8] ss:$12 sps:$4 sm:$0xff]   ;;  %v1629_v16 = vld [vmem:[%s2244_s0 + $0x1e4] ss:$12 sps:$4 sm:$0xff]   ;;  %v1183_v23 = vld [vmem:[%s2246_s2 + $0x18] sm:$0xff] }
  0x1c   :  { %738 = vmatprep.subr.bf16.mxu0 %v1554_v29  ;;  %1434 = vmatprep.subr.bf16.mxu1 %v1556_v30  ;;  %v1617_v17 = vld [vmem:[%s2245_s1 + $0xc0] ss:$16 sps:$4 sm:$0xff]   ;;  %v1623_v19 = vld [vmem:[%s2245_s1 + $0xe4] ss:$16 sps:$4 sm:$0xff]   ;;  %v1636_v21 = vld [vmem:[%s2244_s0 + $0x1fc] ss:$12 sps:$4 sm:$0xff]  }
  0x1d   :  { %v1182_v18 = vld [vmem:[%s2246_s2 + $0x10] sm:$0xff]  ;;  %v1181_v22 = vld [vmem:[%s2246_s2 + $0x8] sm:$0xff]  ;;  %v1634_v24 = vld [vmem:[%s2244_s0 + $0x1f8] ss:$12 sps:$4 sm:$0xff]  }
  0x1e   :  { %1196 = vperm.xlu1 %1518, %v1182_v18   ;;  %v1642_v25 = vld [vmem:[%s2244_s0 + $0x214] ss:$12 sps:$4 sm:$0xff]   ;;  %v1633_v27 = vld [vmem:[%s2245_s1 + $0xc] ss:$16 sps:$4 sm:$0xff]   ;;  %v1631_v32 = vld [vmem:[%s2245_s1 + $0x8] ss:$16 sps:$4 sm:$0xff]  }
  0x1f   :  { %739 = vmatpush1.bf16.msra.mxu0 %v1557_v31  ;;  %1435 = vmatpush3.bf16.msra.mxu1 %v1558_v33  ;;  %v1625_v26 = vld [vmem:[%s2245_s1 + $0xe0] ss:$16 sps:$4 sm:$0xff]   ;;  %v1648_v29 = vld [vmem:[%s2244_s0 + $0x22c] ss:$12 sps:$4 sm:$0xff]   ;;  %v1646_v30 = vld [vmem:[%s2244_s0 + $0x228] ss:$12 sps:$4 sm:$0xff]  }
  0x20   :  { %740 = vmatprep.subr.bf16.mxu0 %v1562_v34  ;;  %1047 = vmatprep.subr.bf16.mxu1 %v1667_v1  ;;  %v1640_v28 = vld [vmem:[%s2244_s0 + $0x210] ss:$12 sps:$4 sm:$0xff]   ;;  %v1652_v34 = vld [vmem:[%s2244_s0 + $0x240] ss:$12 sps:$4 sm:$0xff]  }
  0x21   :  { %v1654_v31 = vld [vmem:[%s2244_s0 + $0x244] ss:$12 sps:$4 sm:$0xff]   ;;  %v1637_v33 = vld [vmem:[%s2245_s1 + $0x2c] ss:$16 sps:$4 sm:$0xff]  }
  0x22   :  { %983 = vmatmul.mubr.bf16.vlgmr.msra.gmra.mrb[0].mxu1 %v1795_v35  ;;  %1201 = vperm.xlu1 %1518, %v1183_v23  }
  0x23   :  { %741 = vmatpush1.bf16.msra.mxu0 %v1564_v36  ;;  %990 = vmatprep.mubr.bf16.mxu1 %v1806_v38  ;;  %v1643_v36 = vld [vmem:[%s2245_s1 + $0x4c] ss:$16 sps:$4 sm:$0xff]  }
  0x24   :  { %742 = vmatprep.subr.bf16.mxu0 %v1565_v37  ;;  %1048 = vmatpush1.bf16.msra.mxu1 %v1595_v45  ;;  %v1645_v37 = vld [vmem:[%s2245_s1 + $0x48] ss:$16 sps:$4 sm:$0xff]  }
  0x25   :  { %1049 = vmatprep.subr.bf16.mxu1 %v1667_v1  ;;  %v1663_v45 = vld [vmem:[%s2245_s1 + $0xc8] ss:$16 sps:$4 sm:$0xff]  }
  0x27   :  { %743 = vmatpush1.bf16.msra.mxu0 %v1567_v39  ;;  %v1651_v39 = vld [vmem:[%s2245_s1 + $0x68] ss:$16 sps:$4 sm:$0xff]  }
  0x28   :  { %744 = vmatprep.subr.bf16.mxu0 %v1570_v40  ;;  %1050 = vmatpush1.bf16.msra.mxu1 %v1602_v50  ;;  %v1655_v40 = vld [vmem:[%s2245_s1 + $0x8c] ss:$16 sps:$4 sm:$0xff]  }
  0x29   :  { %1051 = vmatprep.subr.bf16.mxu1 %v1667_v1 }
  0x2a   :  { %991 = vmatmul.mubr.bf16.gmra.mrb[4].mxu1 %v1820_v41 }
  0x2b   :  { %745 = vmatpush1.bf16.msra.mxu0 %v1573_v42  ;;  %998 = vmatprep.mubr.bf16.mxu1 %v1831_v44  ;;  %v1658_v42 = vld [vmem:[%s2245_s1 + $0xac] ss:$16 sps:$4 sm:$0xff]  }
  0x2c   :  { %746 = vmatprep.subr.bf16.mxu0 %v1574_v43  ;;  %1052 = vmatpush1.bf16.msra.mxu1 %v1603_v53  ;;  %v1660_v43 = vld [vmem:[%s2245_s1 + $0xa8] ss:$16 sps:$4 sm:$0xff]  }
  0x2d   :  { %1053 = vmatprep.subr.bf16.mxu1 %v1667_v1 }
  0x2f   :  { %747 = vmatpush1.bf16.msra.mxu0 %v1576_v46  ;;  %v1664_v46 = vld [vmem:[%s2245_s1 + $0xec] ss:$16 sps:$4 sm:$0xff]  }
  0x30   :  { %748 = vmatprep.subr.bf16.mxu0 %v1579_v47  ;;  %1054 = vmatpush1.bf16.msra.mxu1 %v1610_v56  ;;  %v1666_v47 = vld [vmem:[%s2245_s1 + $0xe8] ss:$16 sps:$4 sm:$0xff]  }
  0x31   :  { %1055 = vmatprep.subr.bf16.mxu1 %v1667_v1 }
  0x32   :  { %999 = vmatmul.mubr.bf16.gmra.mrb[8].mxu1 %v1847_v48 }
  0x33   :  { %749 = vmatpush1.bf16.msra.mxu0 %v1582_v49  ;;  %1006 = vmatprep.mubr.bf16.mxu1 %v1862_v52 }
  0x34   :  { %750 = vmatprep.subr.bf16.mxu0 %v1583_v51  ;;  %1056 = vmatpush1.bf16.msra.mxu1 %v1611_v61 }
  0x35   :  { %1057 = vmatprep.subr.bf16.mxu1 %v1667_v1 }
  0x37   :  { %751 = vmatpush1.bf16.msra.mxu0 %v1585_v54 }
  0x38   :  { %752 = vmatprep.subr.bf16.mxu0 %v1588_v55  ;;  %1058 = vmatpush1.bf16.msra.mxu1 %v1618_v0 }
  0x39   :  { %1059 = vmatprep.subr.bf16.mxu1 %v1667_v1 }
  0x3a   :  { %1007 = vmatmul.mubr.bf16.gmra.mrb[12].mxu1 %v1882_v57 }
  0x3b   :  { %753 = vmatpush1.bf16.msra.mxu0 %v1591_v58  ;;  %1014 = vmatprep.mubr.bf16.mxu1 %v1894_v60 }
  0x3c   :  { %754 = vmatprep.subr.bf16.mxu0 %v1592_v59  ;;  %1060 = vmatpush1.bf16.msra.mxu1 %v1619_v6 }
  0x3d   :  { %1061 = vmatprep.subr.bf16.mxu1 %v1667_v1 }
  0x3f   :  { %755 = vmatpush1.bf16.msra.mxu0 %v1594_v62 }
  0x40   :  { %837 = vmatprep.subr.bf16.mxu0 %v1600_v63  ;;  %1062 = vmatpush1.bf16.msra.mxu1 %v1626_v9 }
  0x41   :  { %1063 = vmatprep.subr.bf16.mxu1 %v1667_v1  ;;  %v1180_v1 = vld [vmem:[%s2246_s2] sm:$0xff] }
  0x42   :  { %757 = vmatmul.mubr.bf16.vlgmr.msra.gmra.mrb[0].mxu0 %v1795_v35  ;;  %1015 = vmatmul.mubr.bf16.gmra.mrb[16].mxu1 %v1918_v3  ;;  %v1639_v35 = vld [vmem:[%s2245_s1 + $0x28] ss:$16 sps:$4 sm:$0xff]  }
  0x43   :  { %838 = vmatpush1.bf16.msra.mxu0 %v1598_v2  ;;  %766 = vmatprep.mubr.bf16.mxu0 %v1806_v38  ;;  %v1649_v38 = vld [vmem:[%s2245_s1 + $0x6c] ss:$16 sps:$4 sm:$0xff]  }
  0x44   :  { %1022 = vmatprep.mubr.bf16.mxu1 %v1923_v4  ;;  %839 = vmatprep.subr.bf16.mxu0 %v1608_v5 }
  0x45   :  { %1064 = vmatpush1.bf16.msra.mxu1 %v1630_v14  ;;  %1186 = vperm.xlu0 %1517, %v1180_v1  }
  0x47   :  { %840 = vmatpush1.bf16.msra.mxu0 %v1606_v7 }
  0x48   :  { %841 = vmatprep.subr.bf16.mxu0 %v1614_v8 }
  0x49   :  { %1191 = vperm.xlu0 %1517, %v1181_v22  }
  0x4a   :  { %767 = vmatmul.mubr.bf16.gmra.mrb[4].mxu0 %v1820_v41  ;;  %1023 = vmatmul.mubr.bf16.gmra.mrb[20].mxu1 %v1948_v10  ;;  %v1657_v41 = vld [vmem:[%s2245_s1 + $0x88] ss:$16 sps:$4 sm:$0xff]  }
  0x4b   :  { %776 = vmatprep.mubr.bf16.mxu0 %v1831_v44  ;;  %1030 = vmatprep.mubr.bf16.mxu1 %v1957_v12  ;;  %v1661_v44 = vld [vmem:[%s2245_s1 + $0xcc] ss:$16 sps:$4 sm:$0xff]  }
  0x4c   :  { %842 = vmatpush1.bf16.msra.mxu0 %v1612_v11 }
  0x4d   :  { %843 = vmatprep.subr.bf16.mxu0 %v1622_v13 }
  0x50   :  { %844 = vmatpush1.bf16.msra.mxu0 %v1620_v15 }
  0x51   :  { %845 = vmatprep.subr.bf16.mxu0 %v1629_v16 }
  0x52   :  { %777 = vmatmul.mubr.bf16.gmra.mrb[8].mxu0 %v1847_v48  ;;  %1031 = vmatmul.mubr.bf16.gmra.mrb[24].mxu1 %v1617_v17 }
  0x53   :  { %786 = vmatprep.mubr.bf16.mxu0 %v1862_v52  ;;  %1038 = vmatprep.mubr.bf16.mxu1 %v1623_v19 }
  0x54   :  { %846 = vmatpush1.bf16.msra.mxu0 %v1627_v20 }
  0x55   :  { %847 = vmatprep.subr.bf16.mxu0 %v1636_v21 }
  0x58   :  { %848 = vmatpush1.bf16.msra.mxu0 %v1634_v24 }
  0x59   :  { %849 = vmatprep.subr.bf16.mxu0 %v1642_v25 }
  0x5a   :  { %787 = vmatmul.mubr.bf16.gmra.mrb[12].mxu0 %v1882_v57  ;;  %1039 = vmatmul.mubr.bf16.gmra.mrb[28].mxu1 %v1625_v26 }
  0x5b   :  { %796 = vmatprep.mubr.bf16.mxu0 %v1894_v60  ;;  %1396 = vmatprep.mubr.msk.bf16.mxu1 %vm699_vm0, %v1633_v27 }
  0x5c   :  { %850 = vmatpush1.bf16.msra.mxu0 %v1640_v28 }
  0x5d   :  { %851 = vmatprep.subr.bf16.mxu0 %v1648_v29 }
  0x60   :  { %852 = vmatpush1.bf16.msra.mxu0 %v1646_v30 }
  0x61   :  { %853 = vmatprep.subr.bf16.mxu0 %v1654_v31 }
  0x62   :  { %797 = vmatmul.mubr.bf16.gmra.mrb[16].mxu0 %v1918_v3  ;;  %1080 = vmatmul.mubr.bf16.vlgmr.msra.gmra.mrb[32].mxu1 %v1631_v32 }
  0x63   :  { %806 = vmatprep.mubr.bf16.mxu0 %v1923_v4  ;;  %1397 = vmatprep.mubr.msk.bf16.mxu1 %vm699_vm0, %v1637_v33 }
  0x64   :  { %854 = vmatpush1.bf16.msra.mxu0 %v1652_v34 }
  0x6a   :  { %807 = vmatmul.mubr.bf16.gmra.mrb[20].mxu0 %v1948_v10  ;;  %1088 = vmatmul.mubr.bf16.gmra.mrb[36].mxu1 %v1639_v35 }
  0x6b   :  { %816 = vmatprep.mubr.bf16.mxu0 %v1957_v12  ;;  %1398 = vmatprep.mubr.msk.bf16.mxu1 %vm699_vm0, %v1643_v36 }
  0x72   :  { %817 = vmatmul.mubr.bf16.gmra.mrb[24].mxu0 %v1617_v17  ;;  %1096 = vmatmul.mubr.bf16.gmra.mrb[40].mxu1 %v1645_v37 }
  0x73   :  { %826 = vmatprep.mubr.bf16.mxu0 %v1623_v19  ;;  %1399 = vmatprep.mubr.msk.bf16.mxu1 %vm699_vm0, %v1649_v38 }
  0x7a   :  { %827 = vmatmul.mubr.bf16.gmra.mrb[28].mxu0 %v1625_v26  ;;  %1104 = vmatmul.mubr.bf16.gmra.mrb[44].mxu1 %v1651_v39 }
  0x7b   :  { %1388 = vmatprep.mubr.msk.bf16.mxu0 %vm699_vm0, %v1633_v27  ;;  %1400 = vmatprep.mubr.msk.bf16.mxu1 %vm699_vm0, %v1655_v40 }
  0x82   :  { %870 = vmatmul.mubr.bf16.vlgmr.msra.gmra.mrb[0].mxu0 %v1631_v32  ;;  %1112 = vmatmul.mubr.bf16.gmra.mrb[48].mxu1 %v1657_v41 }
  0x83   :  { %1389 = vmatprep.mubr.msk.bf16.mxu0 %vm699_vm0, %v1637_v33  ;;  %1401 = vmatprep.mubr.msk.bf16.mxu1 %vm699_vm0, %v1658_v42 }
  0x8a   :  { %880 = vmatmul.mubr.bf16.gmra.mrb[4].mxu0 %v1639_v35  ;;  %1120 = vmatmul.mubr.bf16.gmra.mrb[52].mxu1 %v1660_v43 }
  0x8b   :  { %1390 = vmatprep.mubr.msk.bf16.mxu0 %vm699_vm0, %v1643_v36  ;;  %1402 = vmatprep.mubr.msk.bf16.mxu1 %vm699_vm0, %v1661_v44 }
  0x92   :  { %890 = vmatmul.mubr.bf16.gmra.mrb[8].mxu0 %v1645_v37  ;;  %1128 = vmatmul.mubr.bf16.gmra.mrb[56].mxu1 %v1663_v45 }
  0x93   :  { %1391 = vmatprep.mubr.msk.bf16.mxu0 %vm699_vm0, %v1649_v38  ;;  %1403 = vmatprep.mubr.msk.bf16.mxu1 %vm699_vm0, %v1664_v46 }
  0x9a   :  { %900 = vmatmul.mubr.bf16.gmra.mrb[12].mxu0 %v1651_v39  ;;  %1136 = vmatmul.mubr.bf16.gmra.mrb[60].mxu1 %v1666_v47 }
  0x9b   :  { %1392 = vmatprep.mubr.msk.bf16.mxu0 %vm699_vm0, %v1655_v40 }
  0xa2   :  { %910 = vmatmul.mubr.bf16.gmra.mrb[16].mxu0 %v1657_v41 }
  0xa3   :  { %1393 = vmatprep.mubr.msk.bf16.mxu0 %vm699_vm0, %v1658_v42 }
  0xaa   :  { %920 = vmatmul.mubr.bf16.gmra.mrb[20].mxu0 %v1660_v43 }
  0xab   :  { %1394 = vmatprep.mubr.msk.bf16.mxu0 %vm699_vm0, %v1661_v44 }
  0xb2   :  { %930 = vmatmul.mubr.bf16.gmra.mrb[24].mxu0 %v1663_v45 }
  0xb3   :  { %1395 = vmatprep.mubr.msk.bf16.mxu0 %vm699_vm0, %v1664_v46 }
  0xba   :  { %940 = vmatmul.mubr.bf16.gmra.mrb[28].mxu0 %v1666_v47 }
  0xf5   :  { %v1436_v48 = vpop.f32.mrb[0].mxu1 }
  0xf6   :  { %v1437_v49 = vpop.f32.mrb[1].mxu1 }
  0xf7   :  { %v1438_v50 = vadd.f32 %v1437_v49, %v1436_v48  ;;  %v1439_v51 = vpop.f32.mrb[2].mxu1 }
  0xf8   :  { %v1440_v52 = vpop.f32.mrb[3].mxu1 }
  0xf9   :  { %v1441_v53 = vadd.f32 %v1440_v52, %v1439_v51 }
  0xfd   :  { %v1442_v54 = vpop.f32.mrb[4].mxu1 }
  0xfe   :  { %v1443_v55 = vpop.f32.mrb[5].mxu1 }
  0xff   :  { %v1444_v56 = vadd.f32 %v1443_v55, %v1442_v54  ;;  %v1445_v57 = vpop.f32.mrb[6].mxu1 }
 0x100   :  { %v1446_v58 = vpop.f32.mrb[7].mxu1 }
 0x101   :  { %v1447_v59 = vadd.f32 %v1446_v58, %v1445_v57 }
 0x105   :  { %v1448_v60 = vpop.f32.mrb[8].mxu1 }
 0x106   :  { %v1449_v61 = vpop.f32.mrb[9].mxu1 }
 0x107   :  { %v1450_v62 = vadd.f32 %v1449_v61, %v1448_v60  ;;  %v1451_v63 = vpop.f32.mrb[10].mxu1 }
 0x108   :  { %v1452_v0 = vpop.f32.mrb[11].mxu1 }
 0x109   :  { %v1453_v2 = vadd.f32 %v1452_v0, %v1451_v63 }
 0x10d   :  { %v1454_v3 = vpop.f32.mrb[12].mxu1 }
 0x10e   :  { %v1455_v4 = vpop.f32.mrb[13].mxu1 }
 0x10f   :  { %v1456_v5 = vadd.f32 %v1455_v4, %v1454_v3  ;;  %v1457_v6 = vpop.f32.mrb[14].mxu1 }
 0x110   :  { %v1458_v7 = vpop.f32.mrb[15].mxu1 }
 0x111   :  { %v1459_v8 = vadd.f32 %v1458_v7, %v1457_v6 }
 0x115   :  { %v1460_v9 = vpop.f32.mrb[16].mxu1 }
 0x116   :  { %v1461_v10 = vpop.f32.mrb[17].mxu1 }
 0x117   :  { %v1462_v11 = vadd.f32 %v1461_v10, %v1460_v9  ;;  %v1463_v12 = vpop.f32.mrb[18].mxu1 }
 0x118   :  { %v1464_v13 = vpop.f32.mrb[19].mxu1 }
 0x119   :  { %v1465_v14 = vadd.f32 %v1464_v13, %v1463_v12 }
 0x11d   :  { %v1466_v15 = vpop.f32.mrb[20].mxu1 }
 0x11e   :  { %v1467_v16 = vpop.f32.mrb[21].mxu1 }
 0x11f   :  { %v1468_v1 = vadd.f32 %v1467_v16, %v1466_v15  ;;  %v1469_v17 = vpop.f32.mrb[22].mxu1 }
 0x120   :  { %v1470_v18 = vpop.f32.mrb[23].mxu1 }
 0x121   :  { %v1471_v19 = vadd.f32 %v1470_v18, %v1469_v17 }
 0x125   :  { %v1472_v20 = vpop.f32.mrb[24].mxu1 }
 0x126   :  { %v1473_v21 = vpop.f32.mrb[25].mxu1 }
 0x127   :  { %v2096_v22 = vadd.f32 %v1473_v21, %v1472_v20  ;;  %v1475_v23 = vpop.f32.mrb[26].mxu1  ;;  %v2140_v20 = vpop.permute.xlu0 %1186 }
 0x128   :  { %v1476_v24 = vpop.f32.mrb[27].mxu1 }
 0x129   :  { %v2098_v25 = vadd.f32 %v1476_v24, %v1475_v23 }
 0x12d   :  { %v1478_v26 = vpop.f32.mrb[28].mxu1 }
 0x12e   :  { %v1479_v27 = vpop.f32.mrb[29].mxu1 }
 0x12f   :  { %v2100_v28 = vadd.f32 %v1479_v27, %v1478_v26  ;;  %v1481_v29 = vpop.f32.mrb[30].mxu1 }
 0x130   :  { %v1482_v30 = vpop.f32.mrb[31].mxu1 }
 0x131   :  { %v2102_v31 = vadd.f32 %v1482_v30, %v1481_v29 }
 0x135   :  { %v1081_v32 = vpop.f32.mrb[32].mxu1 }
 0x136   :  { %v2104_v33 = vadd.f32 %v1438_v50, %v1081_v32  ;;  %v1083_v34 = vpop.f32.mrb[33].mxu1 }
 0x137   :  { %v1084_v35 = vpop.f32.mrb[34].mxu1 }
 0x138   :  { %v2106_v36 = vadd.f32 %v1441_v53, %v1084_v35  ;;  %v1086_v37 = vpop.f32.mrb[35].mxu1 }
 0x139   :  { %v2158_v37 = vpop.permute.xlu0 %1191 }
 0x13d   :  { %v1089_v38 = vpop.f32.mrb[36].mxu1 }
 0x13e   :  { %v2108_v39 = vadd.f32 %v1444_v56, %v1089_v38  ;;  %v1091_v40 = vpop.f32.mrb[37].mxu1 }
 0x13f   :  { %v1092_v41 = vpop.f32.mrb[38].mxu1 }
 0x140   :  { %v2110_v42 = vadd.f32 %v1447_v59, %v1092_v41  ;;  %v1094_v43 = vpop.f32.mrb[39].mxu1 }
 0x141   :  { %v2163_v43 = vpop.permute.xlu1 %1196 }
 0x145   :  { %v1097_v44 = vpop.f32.mrb[40].mxu1 }
 0x146   :  { %v1098_v45 = vadd.f32 %v1450_v62, %v1097_v44  ;;  %v1099_v46 = vpop.f32.mrb[41].mxu1 }
 0x147   :  { %v1100_v47 = vpop.f32.mrb[42].mxu1 }
 0x148   :  { %v1146_v48 = vmax.f32 %v2104_v33, %v1098_v45  ;;  %v1101_v49 = vadd.f32 %v1453_v2, %v1100_v47  ;;  %v1102_v50 = vpop.f32.mrb[43].mxu1 }
 0x14a   :  { %v1149_v51 = vmax.f32 %v2106_v36, %v1101_v49 }
 0x14d   :  { %v1105_v52 = vpop.f32.mrb[44].mxu1 }
 0x14e   :  { %v2114_v53 = vadd.f32 %v1456_v5, %v1105_v52  ;;  %v1107_v54 = vpop.f32.mrb[45].mxu1 }
 0x14f   :  { %v1108_v55 = vpop.f32.mrb[46].mxu1 }
 0x150   :  { %v1152_v56 = vmax.f32 %v2108_v39, %v2114_v53  ;;  %v2118_v57 = vadd.f32 %v1459_v8, %v1108_v55  ;;  %v1110_v58 = vpop.f32.mrb[47].mxu1 }
 0x152   :  { %v1155_v59 = vmax.f32 %v2110_v42, %v2118_v57 }
 0x155   :  { %v2122_v60 = vpop.f32.mrb[0].mxu0  ;;  %v1113_v61 = vpop.f32.mrb[48].mxu1 }
 0x156   :  { %v2124_v62 = vpop.f32.mrb[1].mxu0  ;;  %v1114_v63 = vadd.f32 %v1462_v11, %v1113_v61  ;;  %v1115_v0 = vpop.f32.mrb[49].mxu1 }
 0x157   :  { %v2126_v2 = vpop.f32.mrb[2].mxu0  ;;  %v1116_v3 = vpop.f32.mrb[50].mxu1 }
 0x158   :  { %v2128_v4 = vpop.f32.mrb[3].mxu0  ;;  %v1117_v5 = vadd.f32 %v1465_v14, %v1116_v3  ;;  %v1118_v6 = vpop.f32.mrb[51].mxu1 }
 0x15d   :  { %v2130_v7 = vpop.f32.mrb[4].mxu0  ;;  %v1121_v8 = vpop.f32.mrb[52].mxu1 }
 0x15e   :  { %v2132_v9 = vpop.f32.mrb[5].mxu0  ;;  %v1122_v10 = vadd.f32 %v1468_v1, %v1121_v8  ;;  %v1123_v12 = vpop.f32.mrb[53].mxu1 }
 0x15f   :  { %v2134_v13 = vpop.f32.mrb[6].mxu0  ;;  %v1124_v15 = vpop.f32.mrb[54].mxu1 }
 0x160   :  { %v2136_v16 = vpop.f32.mrb[7].mxu0  ;;  %v1125_v11 = vadd.f32 %v1471_v19, %v1124_v15  ;;  %v1126_v17 = vpop.f32.mrb[55].mxu1 }
 0x161   :  { %v1202_v12 = vpop.permute.xlu1 %1201 }
 0x165   :  { %v2138_v18 = vpop.f32.mrb[8].mxu0  ;;  %v1129_v21 = vpop.f32.mrb[56].mxu1 }
 0x166   :  { %v1144_v14 = vmax.f32 %v2122_v60, %v2138_v18  ;;  %v2144_v23 = vpop.f32.mrb[9].mxu0  ;;  %v1130_v1 = vadd.f32 %v2096_v22, %v1129_v21  ;;  %v1131_v26 = vpop.f32.mrb[57].mxu1 }
 0x167   :  { %v1145_v24 = vmax.f32 %v2124_v62, %v2144_v23  ;;  %v2149_v27 = vpop.f32.mrb[10].mxu0  ;;  %v1132_v29 = vpop.f32.mrb[58].mxu1 }
 0x168   :  { %v1147_v19 = vmax.f32 %v2126_v2, %v2149_v27  ;;  %v2153_v30 = vpop.f32.mrb[11].mxu0  ;;  %v1158_v32 = vmax.f32 %v1114_v63, %v1130_v1  ;;  %v1133_v33 = vadd.f32 %v2098_v25, %v1132_v29  ;;  %v1134_v35 = vpop.f32.mrb[59].mxu1 }
 0x169   :  { %v1148_v34 = vmax.f32 %v2128_v4, %v2153_v30 }
 0x16a   :  { %v1170_v22 = vmax.f32 %v1146_v48, %v1158_v32  ;;  %v1161_v36 = vmax.f32 %v1117_v5, %v1133_v33 }
 0x16c   :  { %v1206_v38 = vadd.f32 %v2140_v20, %v1170_v22  ;;  %v1173_v40 = vmax.f32 %v1149_v51, %v1161_v36 }
 0x16d   :  { %v2161_v41 = vpop.f32.mrb[12].mxu0  ;;  %v1137_v45 = vpop.f32.mrb[60].mxu1 }
 0x16e   :  { %v1150_v44 = vmax.f32 %v2130_v7, %v2161_v41  ;;  %v2167_v25 = vpop.f32.mrb[13].mxu0  ;;  %v1218_v46 = vmax.f32 %v1206_v38, 0.0  ;;  %v1209_v47 = vadd.f32 %v2158_v37, %v1173_v40  ;;  %v1138_v48 = vadd.f32 %v2100_v28, %v1137_v45  ;;  %v1139_v50 = vpop.f32.mrb[61].mxu1 }
 0x16f   :  { %v1151_v49 = vmax.f32 %v2132_v9, %v2167_v25  ;;  %v2173_v51 = vpop.f32.mrb[14].mxu0  ;;  %v1140_v54 = vpop.f32.mrb[62].mxu1 }
 0x170   :  { %v1153_v52 = vmax.f32 %v2134_v13, %v2173_v51  ;;  %v2177_v55 = vpop.f32.mrb[15].mxu0  ;;  %v1413_v58 = vpack.c.bf16 %v1218_v46, %v1218_v46  ;;  %v1221_v61 = vmax.f32 %v1209_v47, 0.0  ;;  %v1164_v63 = vmax.f32 %v1122_v10, %v1138_v48  ;;  %v1142_v3 = vpop.f32.mrb[63].mxu1 }
 0x171   :  { %v1141_v0 = vadd.f32 %v2102_v31, %v1140_v54  ;;  %v1154_v28 = vmax.f32 %v2136_v16, %v2177_v55 }
 0x172   :  { %1270 = vst.msk [vmem:[%s2247_s3 + $0x8] sm:$0xf] %vm1269_vm1, %v1413_v58  ;;  %v1415_v5 = vpack.c.bf16 %v1221_v61, %v1221_v61  ;;  %v1176_v6 = vmax.f32 %v1152_v56, %v1164_v63 }
 0x173   :  { %v1167_v8 = vmax.f32 %v1125_v11, %v1141_v0 }
 0x174   :  { %1272 = vst.msk [vmem:[%s2247_s3 + $0x14] sm:$0xf] %vm1269_vm1, %v1415_v5  ;;  %v1212_v31 = vadd.f32 %v2163_v43, %v1176_v6 }
 0x175   :  { %v1179_v10 = vmax.f32 %v1155_v59, %v1167_v8  ;;  %v911_v15 = vpop.f32.mrb[16].mxu0 }
 0x176   :  { %v913_v16 = vpop.f32.mrb[17].mxu0  ;;  %v1224_v17 = vmax.f32 %v1212_v31, 0.0 }
 0x177   :  { %v1215_v21 = vadd.f32 %v1202_v12, %v1179_v10  ;;  %v915_v1 = vpop.f32.mrb[18].mxu0 }
 0x178   :  { %v917_v39 = vpop.f32.mrb[19].mxu0  ;;  %v1417_v53 = vpack.c.bf16 %v1224_v17, %v1224_v17 }
 0x179   :  { %v1227_v56 = vmax.f32 %v1215_v21, 0.0 }
 0x17a   :  { %1274 = vst.msk [vmem:[%s2247_s3 + $0x20] sm:$0xf] %vm1269_vm1, %v1417_v53 }
 0x17b   :  { %v1419_v11 = vpack.c.bf16 %v1227_v56, %v1227_v56 }
 0x17d   :  { %1276 = vst.msk [vmem:[%s2247_s3 + $0x2c] sm:$0xf] %vm1269_vm1, %v1419_v11  ;;  %v921_v42 = vpop.f32.mrb[20].mxu0 }
 0x17e   :  { %v923_v57 = vpop.f32.mrb[21].mxu0 }
 0x17f   :  { %v925_v59 = vpop.f32.mrb[22].mxu0 }
 0x180   :  { %v927_v26 = vpop.f32.mrb[23].mxu0 }
 0x185   :  { %v931_v29 = vpop.f32.mrb[24].mxu0 }
 0x186   :  { %v1156_v32 = vmax.f32 %v911_v15, %v931_v29  ;;  %v933_v33 = vpop.f32.mrb[25].mxu0 }
 0x187   :  { %v1157_v35 = vmax.f32 %v913_v16, %v933_v33  ;;  %v935_v22 = vpop.f32.mrb[26].mxu0 }
 0x188   :  { %v1168_v36 = vmax.f32 %v1144_v14, %v1156_v32  ;;  %v1159_v38 = vmax.f32 %v915_v1, %v935_v22  ;;  %v937_v40 = vpop.f32.mrb[27].mxu0 }
 0x189   :  { %v1169_v45 = vmax.f32 %v1145_v24, %v1157_v35  ;;  %v1160_v46 = vmax.f32 %v917_v39, %v937_v40 }
 0x18a   :  { %v1204_v47 = vadd.f32 %v2140_v20, %v1168_v36  ;;  %v1171_v48 = vmax.f32 %v1147_v19, %v1159_v38 }
 0x18b   :  { %v1205_v50 = vadd.f32 %v2140_v20, %v1169_v45  ;;  %v1172_v60 = vmax.f32 %v1148_v34, %v1160_v46 }
 0x18c   :  { %v1216_v18 = vmax.f32 %v1204_v47, 0.0  ;;  %v1207_v14 = vadd.f32 %v2158_v37, %v1171_v48 }
 0x18d   :  { %v1217_v54 = vmax.f32 %v1205_v50, 0.0  ;;  %v1208_v62 = vadd.f32 %v2158_v37, %v1172_v60  ;;  %v941_v23 = vpop.f32.mrb[28].mxu0 }
 0x18e   :  { %v1219_v24 = vmax.f32 %v1207_v14, 0.0  ;;  %v1162_v55 = vmax.f32 %v921_v42, %v941_v23  ;;  %v943_v58 = vpop.f32.mrb[29].mxu0 }
 0x18f   :  { %v1412_v61 = vpack.c.bf16 %v1217_v54, %v1216_v18  ;;  %v1220_v63 = vmax.f32 %v1208_v62, 0.0  ;;  %v1163_v2 = vmax.f32 %v923_v57, %v943_v58  ;;  %v945_v27 = vpop.f32.mrb[30].mxu0 }
 0x190   :  { %v1174_v20 = vmax.f32 %v1150_v44, %v1162_v55  ;;  %v1165_v4 = vmax.f32 %v925_v59, %v945_v27  ;;  %v947_v19 = vpop.f32.mrb[31].mxu0 }
 0x191   :  { %1268 = vst [vmem:[%s2247_s3] sm:$0xff] %v1412_v61  ;;  %v1414_v30 = vpack.c.bf16 %v1220_v63, %v1219_v24  ;;  %v1175_v34 = vmax.f32 %v1151_v49, %v1163_v2  ;;  %v1166_v37 = vmax.f32 %v927_v26, %v947_v19 }
 0x192   :  { %v1210_v0 = vadd.f32 %v2163_v43, %v1174_v20  ;;  %v1177_v3 = vmax.f32 %v1153_v52, %v1165_v4 }
 0x193   :  { %1271 = vst [vmem:[%s2247_s3 + $0xc] sm:$0xff] %v1414_v30  ;;  %v1211_v7 = vadd.f32 %v2163_v43, %v1175_v34  ;;  %v1178_v41 = vmax.f32 %v1154_v28, %v1166_v37 }
 0x194   :  { %v1222_v44 = vmax.f32 %v1210_v0, 0.0  ;;  %v1213_v5 = vadd.f32 %v1202_v12, %v1177_v3 }
 0x195   :  { %v1223_v6 = vmax.f32 %v1211_v7, 0.0  ;;  %v1214_v8 = vadd.f32 %v1202_v12, %v1178_v41 }
 0x196   :  { %v1225_v9 = vmax.f32 %v1213_v5, 0.0 }
 0x197   :  { %v1416_v25 = vpack.c.bf16 %v1223_v6, %v1222_v44  ;;  %v1226_v49 = vmax.f32 %v1214_v8, 0.0 }
 0x199   :  { %1273 = vst [vmem:[%s2247_s3 + $0x18] sm:$0xff] %v1416_v25  ;;  %v1418_v13 = vpack.c.bf16 %v1226_v49, %v1225_v9 }
 0x19b   :  { %1275 = vst [vmem:[%s2247_s3 + $0x24] sm:$0xff] %v1418_v13 }

// kernel: cnn_forward.5
= control target key start
LH: loop header
LB: loop body
LE: loop exit
PB: predicated region body
PF: predicated region fallthrough
CT: control target
= control target key end

     0   :  { %vm5889_vm0 = vmmov 0   ;;  %vm629_vm1 = vcmask 261120   ;;  %vm3069_vm2 = vcmask 523264   ;;  %vm3819_vm3 = vcmask 1041408   ;;  %s7521_s1 = inlined_call_operand.vmem [shape: bf16[4,800,64], index: 1, kind: input, shape index: {}]   ;;  %s7522_s0 = inlined_call_operand.vmem [shape: bf16[72,800], index: 0, kind: input, shape index: {}]   ;;  %s7523_s3 = inlined_call_operand.vmem [shape: f32[9,64,10], index: 3, kind: input, shape index: {}]   ;;  %s7524_s2 = inlined_call_operand.vmem [shape: f32[1,64], index: 2, kind: input, shape index: {}]   ;;  %s7525_s5 = inlined_call_operand.vmem [shape: f32[10,1], index: 5, kind: input, shape index: {}]   ;;  %s7526_s6 = inlined_call_operand.<no memory space> [shape: f32[1,1], index: 6, kind: input, shape index: {}]   ;;  %s7527_s4 = inlined_call_operand.vmem [shape: f32[1,10], index: 4, kind: input, shape index: {}]   ;;  %s7528_s7 = inlined_call_operand.vmem [shape: f32[8,1], index: 7, kind: output, shape index: {}]  }
   0x1   :  { %v5608_v0 = vld [vmem:[%s7521_s1 + $0x40] sm:$0xff]   ;;  %v5612_v4 = vld [vmem:[%s7521_s1 + $0x48] sm:$0xff]   ;;  %v5616_v8 = vld [vmem:[%s7521_s1 + $0x50] sm:$0xff]   ;;  %vm5891_vm4 = vmmov 1   ;;  %vm3815_vm6 = vcmask 80896   ;;  %vm3899_vm7 = vcmask 7168  }
   0x2   :  { %v5609_v1 = vld [vmem:[%s7521_s1 + $0xc0] sm:$0xff]   ;;  %4538 = vmatprep.subr.bf16.mxu0 %v5608_v0  ;;  %v5613_v5 = vld [vmem:[%s7521_s1 + $0xc8] sm:$0xff]   ;;  %v5617_v9 = vld [vmem:[%s7521_s1 + $0xd0] sm:$0xff]  }
   0x3   :  { %v5610_v2 = vld [vmem:[%s7521_s1] sm:$0xff]   ;;  %4584 = vmatprep.subr.bf16.mxu1 %v5609_v1  ;;  %v5614_v6 = vld [vmem:[%s7521_s1 + $0x8] sm:$0xff]   ;;  %v5618_v10 = vld [vmem:[%s7521_s1 + $0x10] sm:$0xff]  }
   0x4   :  { %v5611_v3 = vld [vmem:[%s7521_s1 + $0x80] sm:$0xff]   ;;  %4539 = vmatpush3.bf16.msra.mxu0 %v5610_v2  ;;  %v5615_v7 = vld [vmem:[%s7521_s1 + $0x88] sm:$0xff]   ;;  %v5619_v11 = vld [vmem:[%s7521_s1 + $0x90] sm:$0xff]  }
   0x5   :  { %4585 = vmatpush3.bf16.msra.mxu1 %v5611_v3  ;;  %4540 = vmatprep.subr.bf16.mxu0 %v5612_v4  ;;  %v5620_v12 = vld [vmem:[%s7521_s1 + $0x58] sm:$0xff]   ;;  %v5624_v16 = vld [vmem:[%s7521_s1 + $0x60] sm:$0xff]   ;;  %v5628_v20 = vld [vmem:[%s7521_s1 + $0x68] sm:$0xff]  }
   0x6   :  { %4586 = vmatprep.subr.bf16.mxu1 %v5613_v5  ;;  %v5621_v13 = vld [vmem:[%s7521_s1 + $0xd8] sm:$0xff]   ;;  %v5625_v17 = vld [vmem:[%s7521_s1 + $0xe0] sm:$0xff]   ;;  %v5629_v21 = vld [vmem:[%s7521_s1 + $0xe8] sm:$0xff]  }
   0x7   :  { %v5622_v14 = vld [vmem:[%s7521_s1 + $0x18] sm:$0xff]   ;;  %v5626_v18 = vld [vmem:[%s7521_s1 + $0x20] sm:$0xff]   ;;  %v5630_v22 = vld [vmem:[%s7521_s1 + $0x28] sm:$0xff]  }
   0x8   :  { %4541 = vmatpush3.bf16.msra.mxu0 %v5614_v6  ;;  %v5623_v15 = vld [vmem:[%s7521_s1 + $0x98] sm:$0xff]   ;;  %v5627_v19 = vld [vmem:[%s7521_s1 + $0xa0] sm:$0xff]   ;;  %v5631_v23 = vld [vmem:[%s7521_s1 + $0xa8] sm:$0xff]  }
   0x9   :  { %4587 = vmatpush3.bf16.msra.mxu1 %v5615_v7  ;;  %4542 = vmatprep.subr.bf16.mxu0 %v5616_v8  ;;  %v5632_v24 = vld [vmem:[%s7521_s1 + $0x70] sm:$0xff]   ;;  %v5636_v28 = vld [vmem:[%s7521_s1 + $0x78] sm:$0xff]   ;;  %v6031_v32 = vld [vmem:[%s7522_s0 + $0x4] ss:$28 sps:$4 sm:$0xff]  }
   0xa   :  { %4588 = vmatprep.subr.bf16.mxu1 %v5617_v9  ;;  %v5633_v25 = vld [vmem:[%s7521_s1 + $0xf0] sm:$0xff]   ;;  %v5637_v29 = vld [vmem:[%s7521_s1 + $0xf8] sm:$0xff]   ;;  %v6036_v33 = vld [vmem:[%s7522_s0 + $0xc] ss:$28 sps:$4 sm:$0xff]   ;;  %677 = vmatprep.mubr.bf16.mxu0 %v6031_v32 }
   0xb   :  { %v5634_v26 = vld [vmem:[%s7521_s1 + $0x30] sm:$0xff]   ;;  %v5638_v30 = vld [vmem:[%s7521_s1 + $0x38] sm:$0xff]   ;;  %v6047_v35 = vld [vmem:[%s7522_s0 + $0x8] ss:$28 sps:$4 sm:$0xff]   ;;  %749 = vmatprep.mubr.bf16.mxu1 %v6036_v33 }
   0xc   :  { %4543 = vmatpush3.bf16.msra.mxu0 %v5618_v10  ;;  %v5635_v27 = vld [vmem:[%s7521_s1 + $0xb0] sm:$0xff]   ;;  %v5639_v31 = vld [vmem:[%s7521_s1 + $0xb8] sm:$0xff]   ;;  %v5646_v36 = vld [vmem:[%s7521_s1 + $0x140] sm:$0xff]   ;;  %v5888_v10 = vmov 0.0  }
   0xd   :  { %4589 = vmatpush3.bf16.msra.mxu1 %v5619_v11  ;;  %4544 = vmatprep.subr.bf16.mxu0 %v5620_v12  ;;  %v6042_v34 = vld [vmem:[%s7522_s0] ss:$28 sps:$4 sm:$0xff]   ;;  %v5648_v38 = vld [vmem:[%s7521_s1 + $0x148] sm:$0xff]   ;;  %v6077_v42 = vld [vmem:[%s7522_s0 + $0x38] ss:$28 sps:$4 sm:$0xff]  }
   0xe   :  { %4590 = vmatprep.subr.bf16.mxu1 %v5621_v13  ;;  %v5647_v37 = vld [vmem:[%s7521_s1 + $0x100] sm:$0xff]   ;;  %v5649_v39 = vld [vmem:[%s7521_s1 + $0x108] sm:$0xff]   ;;  %v6067_v40 = vld [vmem:[%s7522_s0 + $0x3c] ss:$28 sps:$4 sm:$0xff]  }
   0xf   :  { %v6072_v41 = vld [vmem:[%s7522_s0 + $0x44] ss:$28 sps:$4 sm:$0xff]   ;;  %v5656_v44 = vld [vmem:[%s7521_s1 + $0x150] sm:$0xff]   ;;  %v6102_v47 = vld [vmem:[%s7522_s0 + $0x7c] ss:$28 sps:$4 sm:$0xff]  }
  0x10   :  { %4545 = vmatpush3.bf16.msra.mxu0 %v5622_v14  ;;  %v6083_v43 = vld [vmem:[%s7522_s0 + $0x40] ss:$28 sps:$4 sm:$0xff]   ;;  %v5657_v45 = vld [vmem:[%s7521_s1 + $0x110] sm:$0xff]   ;;  %v6131_v54 = vld [vmem:[%s7522_s0 + $0xac] ss:$28 sps:$4 sm:$0xff]  }
  0x11   :  { %4591 = vmatpush3.bf16.msra.mxu1 %v5623_v15  ;;  %4546 = vmatprep.subr.bf16.mxu0 %v5624_v16  ;;  %v6097_v46 = vld [vmem:[%s7522_s0 + $0x74] ss:$28 sps:$4 sm:$0xff]   ;;  %v5662_v48 = vld [vmem:[%s7521_s1 + $0x158] sm:$0xff]   ;;  %v5666_v52 = vld [vmem:[%s7521_s1 + $0x160] sm:$0xff]  }
  0x12   :  { %4592 = vmatprep.subr.bf16.mxu1 %v5625_v17  ;;  %v6111_v49 = vld [vmem:[%s7522_s0 + $0x70] ss:$28 sps:$4 sm:$0xff]   ;;  %v6116_v50 = vld [vmem:[%s7522_s0 + $0x78] ss:$28 sps:$4 sm:$0xff]   ;;  %v5667_v53 = vld [vmem:[%s7521_s1 + $0x120] sm:$0xff]  }
  0x13   :  { %v5665_v51 = vld [vmem:[%s7521_s1 + $0x118] sm:$0xff]   ;;  %v6136_v55 = vld [vmem:[%s7522_s0 + $0xb4] ss:$28 sps:$4 sm:$0xff]   ;;  %v5674_v56 = vld [vmem:[%s7521_s1 + $0x168] sm:$0xff]  }
  0x14   :  { %4547 = vmatpush3.bf16.msra.mxu0 %v5626_v18  ;;  %v6148_v57 = vld [vmem:[%s7522_s0 + $0xa8] ss:$28 sps:$4 sm:$0xff]   ;;  %v6153_v58 = vld [vmem:[%s7522_s0 + $0xb0] ss:$28 sps:$4 sm:$0xff]   ;;  %v5682_v2 = vld [vmem:[%s7521_s1 + $0x178] sm:$0xff]  }
  0x15   :  { %4593 = vmatpush3.bf16.msra.mxu1 %v5627_v19  ;;  %4548 = vmatprep.subr.bf16.mxu0 %v5628_v20  ;;  %v5675_v59 = vld [vmem:[%s7521_s1 + $0x128] sm:$0xff]   ;;  %v5676_v60 = vld [vmem:[%s7521_s1 + $0x170] sm:$0xff]   ;;  %v61_v61 = vld [vmem:[%s7522_s0 + $0xe0] sm:$0xff] }
  0x16   :  { %4594 = vmatprep.subr.bf16.mxu1 %v5629_v21  ;;  %v62_v62 = vld [vmem:[%s7522_s0 + $0xe8] sm:$0xff]  ;;  %v6167_v63 = vcombine.high %v61_v61, %v61_v61  ;;  %v5679_v1 = vld [vmem:[%s7521_s1 + $0x130] sm:$0xff]   ;;  %v5683_v3 = vld [vmem:[%s7521_s1 + $0x138] sm:$0xff]   ;;  %v6187_v5 = vcombine.low %v61_v61, %v61_v61 }
  0x17   :  { %v6169_v0 = vcombine.high %v62_v62, %v62_v62  ;;  %v63_v4 = vld [vmem:[%s7522_s0 + $0xf0] sm:$0xff]  ;;  %v6189_v6 = vcombine.low %v62_v62, %v62_v62  ;;  %v5690_v13 = vld [vmem:[%s7521_s1 + $0x180] sm:$0xff]   ;;  %v5692_v15 = vld [vmem:[%s7521_s1 + $0x1d8] sm:$0xff]  }
  0x18   :  { %4549 = vmatpush3.bf16.msra.mxu0 %v5630_v22  ;;  %v6194_v7 = vld [vmem:[%s7522_s0 + $0x14] ss:$28 sps:$4 sm:$0xff]   ;;  %v6196_v8 = vcombine.high %v63_v4, %v63_v4  ;;  %v6211_v12 = vcombine.low %v63_v4, %v63_v4  ;;  %v6225_v16 = vld [vmem:[%s7522_s0 + $0x4c] ss:$28 sps:$4 sm:$0xff]   ;;  %v5694_v18 = vld [vmem:[%s7521_s1 + $0x198] sm:$0xff]  }
  0x19   :  { %4595 = vmatpush3.bf16.msra.mxu1 %v5631_v23  ;;  %4550 = vmatprep.subr.bf16.mxu0 %v5632_v24  ;;  %v5689_v9 = vld [vmem:[%s7521_s1 + $0x1d0] sm:$0xff]   ;;  %v5693_v17 = vld [vmem:[%s7521_s1 + $0x188] sm:$0xff]   ;;  %v5699_v21 = vld [vmem:[%s7521_s1 + $0x1e0] sm:$0xff]  }
  0x1a   :  { %4596 = vmatprep.subr.bf16.mxu1 %v5633_v25  ;;  %v6209_v11 = vld [vmem:[%s7522_s0 + $0x10] ss:$28 sps:$4 sm:$0xff]   ;;  %v6239_v19 = vld [vmem:[%s7522_s0 + $0x48] ss:$28 sps:$4 sm:$0xff]   ;;  %v6244_v20 = vld [vmem:[%s7522_s0 + $0x18] ss:$28 sps:$4 sm:$0xff]  }
  0x1b   :  { %v5691_v14 = vld [vmem:[%s7521_s1 + $0x190] sm:$0xff]   ;;  %v5701_v23 = vld [vmem:[%s7521_s1 + $0x1a0] sm:$0xff]   ;;  %v5703_v25 = vld [vmem:[%s7521_s1 + $0x1e8] sm:$0xff]  }
  0x1c   :  { %4551 = vmatpush3.bf16.msra.mxu0 %v5634_v26  ;;  %v5700_v22 = vld [vmem:[%s7521_s1 + $0x250] sm:$0xff]   ;;  %v5705_v26 = vld [vmem:[%s7521_s1 + $0x258] sm:$0xff]   ;;  %v5724_v61 = vld [vmem:[%s7521_s1 + $0x1c0] sm:$0xff]  }
  0x1d   :  { %4597 = vmatpush3.bf16.msra.mxu1 %v5635_v27  ;;  %4552 = vmatprep.subr.bf16.mxu0 %v5636_v28  ;;  %v5702_v24 = vld [vmem:[%s7521_s1 + $0x210] sm:$0xff]   ;;  %v5704_v27 = vld [vmem:[%s7521_s1 + $0x1a8] sm:$0xff]   ;;  %v6273_v28 = vld [vmem:[%s7522_s0 + $0x84] ss:$28 sps:$4 sm:$0xff]  }
  0x1e   :  { %4598 = vmatprep.subr.bf16.mxu1 %v5637_v29  ;;  %v5706_v29 = vld [vmem:[%s7521_s1 + $0x218] sm:$0xff]   ;;  %v5728_v62 = vld [vmem:[%s7521_s1 + $0x230] sm:$0xff]   ;;  %vm5586_vm5 = vmpackc.low %vm3819_vm3, %vm5891_vm4 }
  0x1f   :  { %v5731_v4 = vld [vmem:[%s7521_s1 + $0x238] sm:$0xff]  }
  0x20   :  { %4553 = vmatpush3.bf16.msra.mxu0 %v5638_v30  ;;  %v5711_v30 = vld [vmem:[%s7521_s1 + $0x1f0] sm:$0xff]  }
  0x21   :  { %4599 = vmatpush3.bf16.msra.mxu1 %v5639_v31  ;;  %4630 = vmatprep.subr.bf16.mxu0 %v5646_v36  ;;  %v6287_v31 = vld [vmem:[%s7522_s0 + $0x80] ss:$28 sps:$4 sm:$0xff]  }
  0x22   :  { %5588 = vmatprep.subr.bf16.mxu1 %v5646_v36  ;;  %v5713_v36 = vld [vmem:[%s7521_s1 + $0x260] sm:$0xff]  }
  0x23   :  { %678 = vmatmul.mubr.bf16.vlgmr.msra.gmra.mrb[0].mxu0 %v6042_v34 }
  0x24   :  { %750 = vmatmul.mubr.bf16.vlgmr.msra.gmra.mrb[0].mxu1 %v6047_v35  ;;  %4631 = vmatpush3.bf16.msra.mxu0 %v5647_v37 }
  0x25   :  { %5596 = vmatpush3.bf16.msra.mxu1 %v5647_v37  ;;  %4632 = vmatprep.subr.bf16.mxu0 %v5648_v38  ;;  %v6298_v37 = vld [vmem:[%s7522_s0 + $0x50] ss:$28 sps:$4 sm:$0xff]  }
  0x26   :  { %5589 = vmatprep.subr.bf16.mxu1 %v5648_v38  ;;  %685 = vmatprep.mubr.bf16.mxu0 %v6067_v40  ;;  %v5712_v38 = vld [vmem:[%s7521_s1 + $0x1b0] sm:$0xff]  }
  0x27   :  { %757 = vmatprep.mubr.bf16.mxu1 %v6072_v41 }
  0x28   :  { %4633 = vmatpush3.bf16.msra.mxu0 %v5649_v39 }
  0x29   :  { %5597 = vmatpush3.bf16.msra.mxu1 %v5649_v39  ;;  %4634 = vmatprep.subr.bf16.mxu0 %v5656_v44  ;;  %v5714_v39 = vld [vmem:[%s7521_s1 + $0x220] sm:$0xff]  }
  0x2a   :  { %5590 = vmatprep.subr.bf16.mxu1 %v5656_v44  ;;  %v5715_v44 = vld [vmem:[%s7521_s1 + $0x1f8] sm:$0xff]  }
  0x2b   :  { %686 = vmatmul.mubr.bf16.gmra.mrb[4].mxu0 %v6077_v42 }
  0x2c   :  { %758 = vmatmul.mubr.bf16.gmra.mrb[4].mxu1 %v6083_v43  ;;  %693 = vmatprep.mubr.bf16.mxu0 %v6097_v46 }
  0x2d   :  { %5598 = vmatpush3.bf16.msra.mxu1 %v5657_v45  ;;  %765 = vmatprep.mubr.bf16.mxu1 %v6102_v47 }
  0x2e   :  { %4635 = vmatpush3.bf16.msra.mxu0 %v5657_v45  ;;  %5591 = vmatprep.subr.bf16.mxu1 %v5662_v48  ;;  %v6312_v45 = vld [vmem:[%s7522_s0 + $0xbc] ss:$28 sps:$4 sm:$0xff]  }
  0x2f   :  { %4636 = vmatprep.subr.bf16.mxu0 %v5662_v48  ;;  %v5716_v48 = vld [vmem:[%s7521_s1 + $0x1b8] sm:$0xff]  }
  0x31   :  { %5599 = vmatpush3.bf16.msra.mxu1 %v5665_v51 }
  0x32   :  { %5592 = vmatprep.subr.bf16.mxu1 %v5666_v52  ;;  %4637 = vmatpush3.bf16.msra.mxu0 %v5665_v51  ;;  %v5719_v51 = vld [vmem:[%s7521_s1 + $0x268] sm:$0xff]  }
  0x33   :  { %694 = vmatmul.mubr.bf16.gmra.mrb[8].mxu0 %v6111_v49  ;;  %4638 = vmatprep.subr.bf16.mxu0 %v5666_v52  ;;  %v5722_v52 = vld [vmem:[%s7521_s1 + $0x200] sm:$0xff]  }
  0x34   :  { %766 = vmatmul.mubr.bf16.gmra.mrb[8].mxu1 %v6116_v50  ;;  %701 = vmatprep.mubr.bf16.mxu0 %v6131_v54 }
  0x35   :  { %773 = vmatprep.mubr.bf16.mxu1 %v6136_v55  ;;  %5600 = vmatpush3.bf16.msra.mxu1 %v5667_v53 }
  0x36   :  { %4639 = vmatpush3.bf16.msra.mxu0 %v5667_v53  ;;  %5593 = vmatprep.subr.bf16.mxu1 %v5674_v56  ;;  %v5723_v53 = vld [vmem:[%s7521_s1 + $0x228] sm:$0xff]  }
  0x37   :  { %4640 = vmatprep.subr.bf16.mxu0 %v5674_v56  ;;  %v6333_v56 = vld [vmem:[%s7522_s0 + $0xb8] ss:$28 sps:$4 sm:$0xff]  }
  0x39   :  { %5601 = vmatpush3.bf16.msra.mxu1 %v5675_v59 }
  0x3a   :  { %4641 = vmatpush3.bf16.msra.mxu0 %v5675_v59  ;;  %5594 = vmatprep.subr.bf16.mxu1 %v5676_v60  ;;  %v5726_v59 = vld [vmem:[%s7521_s1 + $0x270] sm:$0xff]  }
  0x3b   :  { %702 = vmatmul.mubr.bf16.gmra.mrb[12].mxu0 %v6148_v57  ;;  %4642 = vmatprep.subr.bf16.mxu0 %v5676_v60  ;;  %v6343_v60 = vld [vmem:[%s7522_s0 + $0x88] ss:$28 sps:$4 sm:$0xff]  }
  0x3c   :  { %774 = vmatmul.mubr.bf16.gmra.mrb[12].mxu1 %v6153_v58  ;;  %709 = vmatprep.mubr.bf16.mxu0 %v6167_v63 }
  0x3d   :  { %781 = vmatprep.mubr.bf16.mxu1 %v6169_v0  ;;  %5602 = vmatpush3.bf16.msra.mxu1 %v5679_v1 }
  0x3e   :  { %4643 = vmatpush3.bf16.msra.mxu0 %v5679_v1  ;;  %5595 = vmatprep.subr.bf16.mxu1 %v5682_v2  ;;  %v5725_v1 = vld [vmem:[%s7521_s1 + $0x208] sm:$0xff]  }
  0x3f   :  { %4644 = vmatprep.subr.bf16.mxu0 %v5682_v2  ;;  %v5727_v2 = vld [vmem:[%s7521_s1 + $0x1c8] sm:$0xff]  }
  0x41   :  { %5603 = vmatpush3.bf16.msra.mxu1 %v5683_v3 }
  0x42   :  { %4645 = vmatpush3.bf16.msra.mxu0 %v5683_v3  ;;  %5202 = vmatprep.subr.bf16.mxu1 %v5888_v10  ;;  %v5730_v3 = vld [vmem:[%s7521_s1 + $0x278] sm:$0xff]  }
  0x43   :  { %710 = vmatmul.mubr.bf16.gmra.mrb[16].mxu0 %v6187_v5  ;;  %4683 = vmatprep.subr.bf16.mxu0 %v5689_v9  ;;  %v5732_v9 = vld [vmem:[%s7521_s1 + $0x280] sm:$0xff]  }
  0x44   :  { %782 = vmatmul.mubr.bf16.gmra.mrb[16].mxu1 %v6189_v6  ;;  %821 = vmatprep.mubr.bf16.mxu0 %v6194_v7 }
  0x45   :  { %853 = vmatprep.mubr.bf16.mxu1 %v6196_v8 }
  0x4b   :  { %822 = vmatmul.mubr.bf16.vlgmr.msra.gmra.mrb[20].mxu0 %v6209_v11 }
  0x4c   :  { %854 = vmatmul.mubr.bf16.vlgmr.msra.gmra.mrb[20].mxu1 %v6211_v12  ;;  %4684 = vmatpush3.bf16.msra.mxu0 %v5691_v14  ;;  %v6378_v14 = vld [vmem:[%s7522_s0 + $0xc0] ss:$28 sps:$4 sm:$0xff]  }
  0x4d   :  { %5203 = vmatpush3.bf16.msra.mxu1 %v5690_v13  ;;  %4685 = vmatprep.subr.bf16.mxu0 %v5692_v15  ;;  %v5735_v13 = vld [vmem:[%s7521_s1 + $0x2d0] sm:$0xff]   ;;  %v5733_v15 = vld [vmem:[%s7521_s1 + $0x240] sm:$0xff]  }
  0x4e   :  { %5204 = vmatprep.subr.bf16.mxu1 %v5888_v10  ;;  %829 = vmatprep.mubr.bf16.mxu0 %v6225_v16 }
  0x4f   :  { %5206 = vmatprep.mubr.msk.bf16.mxu1 %vm5889_vm0, %v5888_v10 }
  0x50   :  { %4686 = vmatpush3.bf16.msra.mxu0 %v5694_v18  ;;  %v5739_v18 = vld [vmem:[%s7521_s1 + $0x2d8] sm:$0xff]  }
  0x51   :  { %5205 = vmatpush3.bf16.msra.mxu1 %v5693_v17  ;;  %4687 = vmatprep.subr.bf16.mxu0 %v5699_v21  ;;  %v5736_v17 = vld [vmem:[%s7521_s1 + $0x290] sm:$0xff]   ;;  %v5738_v21 = vld [vmem:[%s7521_s1 + $0x248] sm:$0xff]  }
  0x52   :  { %4729 = vmatprep.subr.bf16.mxu1 %v5700_v22  ;;  %v5740_v22 = vld [vmem:[%s7521_s1 + $0x298] sm:$0xff]  }
  0x53   :  { %830 = vmatmul.mubr.bf16.gmra.mrb[24].mxu0 %v6239_v19 }
  0x54   :  { %5207 = vmatmul.mubr.msk.bf16.vlgmr.msra.gmra.mrb[24].mxu1 %vm629_vm1, %v6244_v20  ;;  %4688 = vmatpush3.bf16.msra.mxu0 %v5701_v23  ;;  %v5742_v23 = vld [vmem:[%s7521_s1 + $0x2a0] sm:$0xff]  }
  0x55   :  { %4730 = vmatpush3.bf16.msra.mxu1 %v5702_v24  ;;  %4689 = vmatprep.subr.bf16.mxu0 %v5703_v25  ;;  %v5744_v24 = vld [vmem:[%s7521_s1 + $0x2e8] sm:$0xff]  }
  0x56   :  { %4731 = vmatprep.subr.bf16.mxu1 %v5705_v26  ;;  %837 = vmatprep.mubr.bf16.mxu0 %v6273_v28  ;;  %v5745_v25 = vld [vmem:[%s7521_s1 + $0x2a8] sm:$0xff]   ;;  %v5746_v26 = vld [vmem:[%s7521_s1 + $0x2f0] sm:$0xff]  }
  0x57   :  { %5210 = vmatprep.mubr.msk.bf16.mxu1 %vm5889_vm0, %v5888_v10 }
  0x58   :  { %4690 = vmatpush3.bf16.msra.mxu0 %v5704_v27  ;;  %v5743_v27 = vld [vmem:[%s7521_s1 + $0x310] sm:$0xff]  }
  0x59   :  { %4732 = vmatpush3.bf16.msra.mxu1 %v5706_v29  ;;  %4691 = vmatprep.subr.bf16.mxu0 %v5711_v30  ;;  %v5754_v29 = vld [vmem:[%s7521_s1 + $0x318] sm:$0xff]   ;;  %v5753_v30 = vld [vmem:[%s7521_s1 + $0x2c8] sm:$0xff]  }
  0x5a   :  { %4733 = vmatprep.subr.bf16.mxu1 %v5713_v36  ;;  %v5755_v36 = vld [vmem:[%s7521_s1 + $0x360] sm:$0xff]  }
  0x5b   :  { %838 = vmatmul.mubr.bf16.gmra.mrb[28].mxu0 %v6287_v31 }
  0x5c   :  { %5211 = vmatmul.mubr.msk.bf16.gmra.mrb[28].mxu1 %vm629_vm1, %v6298_v37  ;;  %4692 = vmatpush3.bf16.msra.mxu0 %v5712_v38  ;;  %v5771_v38 = vld [vmem:[%s7521_s1 + $0x388] sm:$0xff]  }
  0x5d   :  { %4734 = vmatpush3.bf16.msra.mxu1 %v5714_v39  ;;  %4693 = vmatprep.subr.bf16.mxu0 %v5715_v44  ;;  %v5766_v39 = vld [vmem:[%s7521_s1 + $0x3a8] sm:$0xff]   ;;  %v5770_v44 = vld [vmem:[%s7521_s1 + $0x3b0] sm:$0xff]  }
  0x5e   :  { %845 = vmatprep.mubr.bf16.mxu0 %v6312_v45  ;;  %5214 = vmatprep.mubr.msk.bf16.mxu1 %vm5889_vm0, %v5888_v10 }
  0x5f   :  { %4735 = vmatprep.subr.bf16.mxu1 %v5719_v51  ;;  %v5775_v51 = vld [vmem:[%s7521_s1 + $0x3b8] sm:$0xff]  }
  0x60   :  { %4694 = vmatpush3.bf16.msra.mxu0 %v5716_v48  ;;  %v5774_v48 = vld [vmem:[%s7521_s1 + $0x390] sm:$0xff]  }
  0x61   :  { %4736 = vmatpush3.bf16.msra.mxu1 %v5723_v53  ;;  %4695 = vmatprep.subr.bf16.mxu0 %v5722_v52  ;;  %v5776_v52 = vld [vmem:[%s7521_s1 + $0x350] sm:$0xff]   ;;  %v5777_v53 = vld [vmem:[%s7521_s1 + $0x398] sm:$0xff]  }
  0x62   :  { %4737 = vmatprep.subr.bf16.mxu1 %v5726_v59  ;;  %v5780_v59 = vld [vmem:[%s7521_s1 + $0x3c0] sm:$0xff]  }
  0x63   :  { %846 = vmatmul.mubr.bf16.gmra.mrb[32].mxu0 %v6333_v56 }
  0x64   :  { %5215 = vmatmul.mubr.msk.bf16.gmra.mrb[32].mxu1 %vm629_vm1, %v6343_v60  ;;  %4696 = vmatpush3.bf16.msra.mxu0 %v5724_v61  ;;  %v5781_v61 = vld [vmem:[%s7521_s1 + $0x408] sm:$0xff]  }
  0x65   :  { %4738 = vmatpush3.bf16.msra.mxu1 %v5728_v62  ;;  %4697 = vmatprep.subr.bf16.mxu0 %v5725_v1  ;;  %v5785_v62 = vld [vmem:[%s7521_s1 + $0x460] sm:$0xff]   ;;  %v5782_v1 = vld [vmem:[%s7521_s1 + $0x3c8] sm:$0xff]  }
  0x66   :  { %5218 = vmatprep.mubr.msk.bf16.mxu1 %vm5889_vm0, %v5888_v10  ;;  %1366 = vmatprep.mubr.bf16.mxu0 %v6031_v32  ;;  %v5737_v32 = vld [vmem:[%s7521_s1 + $0x288] sm:$0xff]  }
  0x67   :  { %4739 = vmatprep.subr.bf16.mxu1 %v5730_v3  ;;  %v5784_v3 = vld [vmem:[%s7521_s1 + $0x3d0] sm:$0xff]  }
  0x68   :  { %4698 = vmatpush3.bf16.msra.mxu0 %v5727_v2  ;;  %v6586_v2 = vld [vmem:[%s7522_s0 + $0x4] ss:$28 sps:$4 sm:$0xff]  }
  0x69   :  { %4740 = vmatpush3.bf16.msra.mxu1 %v5731_v4  ;;  %4775 = vmatprep.subr.bf16.mxu0 %v5735_v13  ;;  %v5786_v4 = vld [vmem:[%s7521_s1 + $0x420] sm:$0xff]   ;;  %v5789_v13 = vld [vmem:[%s7521_s1 + $0x468] sm:$0xff]  }
  0x6a   :  { %4741 = vmatprep.subr.bf16.mxu1 %v5732_v9  ;;  %v5787_v9 = vld [vmem:[%s7521_s1 + $0x418] sm:$0xff]  }
  0x6b   :  { %1367 = vmatmul.mubr.bf16.vlgmr.msra.gmra.mrb[36].mxu0 %v6042_v34  ;;  %v5741_v34 = vld [vmem:[%s7521_s1 + $0x2e0] sm:$0xff]  }
  0x6c   :  { %5219 = vmatmul.mubr.msk.bf16.gmra.mrb[36].mxu1 %vm629_vm1, %v6378_v14  ;;  %1374 = vmatprep.mubr.bf16.mxu0 %v6067_v40  ;;  %v6410_v40 = vld [vmem:[%s7522_s0 + $0xf8] ss:$0 sps:$4 sm:$0xff]  }
  0x6d   :  { %5222 = vmatprep.mubr.msk.bf16.mxu1 %vm5889_vm0, %v5888_v10  ;;  %4742 = vmatpush3.bf16.msra.mxu1 %v5733_v15  ;;  %v6609_v15 = vld [vmem:[%s7522_s0] ss:$28 sps:$4 sm:$0xff]  }
  0x6e   :  { %4776 = vmatpush3.bf16.msra.mxu0 %v5736_v17  ;;  %4743 = vmatprep.subr.bf16.mxu1 %v5737_v32  ;;  %v6617_v17 = vld [vmem:[%s7522_s0 + $0x3c] ss:$28 sps:$4 sm:$0xff]   ;;  %v5790_v32 = vld [vmem:[%s7521_s1 + $0x428] sm:$0xff]  }
  0x6f   :  { %4777 = vmatprep.subr.bf16.mxu0 %v5739_v18  ;;  %v5791_v18 = vld [vmem:[%s7521_s1 + $0x470] sm:$0xff]  }
  0x71   :  { %4744 = vmatpush3.bf16.msra.mxu1 %v5738_v21  ;;  %v5792_v21 = vld [vmem:[%s7521_s1 + $0x430] sm:$0xff]  }
  0x72   :  { %4778 = vmatpush3.bf16.msra.mxu0 %v5740_v22  ;;  %5226 = vmatprep.subr.bf16.mxu1 %v5888_v10  ;;  %v5794_v22 = vld [vmem:[%s7521_s1 + $0x478] sm:$0xff]  }
  0x73   :  { %4779 = vmatprep.subr.bf16.mxu0 %v5741_v34  ;;  %1375 = vmatmul.mubr.bf16.gmra.mrb[40].mxu0 %v6077_v42  ;;  %v5747_v42 = vld [vmem:[%s7521_s1 + $0x2b0] sm:$0xff]  }
  0x74   :  { %5223 = vmatmul.mubr.msk.bf16.gmra.mrb[40].mxu1 %vm629_vm1, %v6410_v40  ;;  %1382 = vmatprep.mubr.bf16.mxu0 %v6097_v46  ;;  %v5749_v46 = vld [vmem:[%s7521_s1 + $0x2b8] sm:$0xff]  }
  0x75   :  { %1438 = vmatprep.mubr.bf16.mxu1 %v6036_v33  ;;  %v5748_v33 = vld [vmem:[%s7521_s1 + $0x2f8] sm:$0xff]  }
  0x76   :  { %4780 = vmatpush3.bf16.msra.mxu0 %v5742_v23  ;;  %v6641_v34 = vld [vmem:[%s7522_s0 + $0x38] ss:$28 sps:$4 sm:$0xff]  }
  0x77   :  { %4781 = vmatprep.subr.bf16.mxu0 %v5744_v24  ;;  %v6647_v23 = vld [vmem:[%s7522_s0 + $0x74] ss:$28 sps:$4 sm:$0xff]   ;;  %v6653_v24 = vld [vmem:[%s7522_s0 + $0xc] ss:$28 sps:$4 sm:$0xff]  }
  0x7a   :  { %4782 = vmatpush3.bf16.msra.mxu0 %v5745_v25  ;;  %v5796_v25 = vld [vmem:[%s7521_s1 + $0x480] sm:$0xff]  }
  0x7b   :  { %4783 = vmatprep.subr.bf16.mxu0 %v5746_v26  ;;  %1383 = vmatmul.mubr.bf16.gmra.mrb[44].mxu0 %v6111_v49  ;;  %v5750_v49 = vld [vmem:[%s7521_s1 + $0x300] sm:$0xff]  }
  0x7c   :  { %1439 = vmatmul.mubr.bf16.vlgmr.msra.gmra.mrb[44].mxu1 %v6047_v35  ;;  %1390 = vmatprep.mubr.bf16.mxu0 %v6131_v54  ;;  %v5760_v35 = vld [vmem:[%s7521_s1 + $0x3e0] sm:$0xff]  }
  0x7d   :  { %5227 = vmatpush3.bf16.msra.mxu1 %v5743_v27  ;;  %1446 = vmatprep.mubr.bf16.mxu1 %v6072_v41  ;;  %v5751_v54 = vld [vmem:[%s7521_s1 + $0x2c0] sm:$0xff]   ;;  %v5752_v41 = vld [vmem:[%s7521_s1 + $0x308] sm:$0xff]  }
  0x7e   :  { %4784 = vmatpush3.bf16.msra.mxu0 %v5747_v42  ;;  %5228 = vmatprep.subr.bf16.mxu1 %v5888_v10  ;;  %v5793_v26 = vld [vmem:[%s7521_s1 + $0x4a0] sm:$0xff]   ;;  %v5798_v42 = vld [vmem:[%s7521_s1 + $0x488] sm:$0xff]  }
  0x7f   :  { %4785 = vmatprep.subr.bf16.mxu0 %v5748_v33  ;;  %v5797_v27 = vld [vmem:[%s7521_s1 + $0x440] sm:$0xff]   ;;  %v6674_v33 = vld [vmem:[%s7522_s0 + $0x70] ss:$28 sps:$4 sm:$0xff]  }
  0x81   :  { %5229 = vmatpush3.bf16.msra.mxu1 %v5754_v29  ;;  %v5799_v29 = vld [vmem:[%s7521_s1 + $0x448] sm:$0xff]  }
  0x82   :  { %4786 = vmatpush3.bf16.msra.mxu0 %v5749_v46  ;;  %4874 = vmatprep.subr.bf16.mxu1 %v5760_v35  ;;  %v6680_v46 = vld [vmem:[%s7522_s0 + $0x8] ss:$28 sps:$4 sm:$0xff]  }
  0x83   :  { %4787 = vmatprep.subr.bf16.mxu0 %v5750_v49  ;;  %1391 = vmatmul.mubr.bf16.gmra.mrb[48].mxu0 %v6148_v57  ;;  %v5761_v57 = vld [vmem:[%s7521_s1 + $0x330] sm:$0xff]   ;;  %v6689_v49 = vld [vmem:[%s7522_s0 + $0xac] ss:$28 sps:$4 sm:$0xff]  }
  0x84   :  { %1447 = vmatmul.mubr.bf16.gmra.mrb[48].mxu1 %v6083_v43  ;;  %1398 = vmatprep.mubr.bf16.mxu0 %v6167_v63  ;;  %v5756_v43 = vld [vmem:[%s7521_s1 + $0x320] sm:$0xff]   ;;  %v5804_v35 = vld [vmem:[%s7521_s1 + $0x4a8] sm:$0xff]  }
  0x85   :  { %1454 = vmatprep.mubr.bf16.mxu1 %v6102_v47  ;;  %v5757_v47 = vld [vmem:[%s7521_s1 + $0x368] sm:$0xff]  }
  0x86   :  { %4788 = vmatpush3.bf16.msra.mxu0 %v5751_v54  ;;  %v6698_v54 = vld [vmem:[%s7522_s0 + $0x44] ss:$28 sps:$4 sm:$0xff]  }
  0x87   :  { %4789 = vmatprep.subr.bf16.mxu0 %v5752_v41  ;;  %v5810_v41 = vld [vmem:[%s7521_s1 + $0x570] sm:$0xff]  }
  0x8a   :  { %4790 = vmatpush3.bf16.msra.mxu0 %v5753_v30  ;;  %v5800_v30 = vld [vmem:[%s7521_s1 + $0x490] sm:$0xff]  }
  0x8b   :  { %4828 = vmatprep.subr.bf16.mxu0 %v5755_v36  ;;  %1399 = vmatmul.mubr.bf16.gmra.mrb[52].mxu0 %v6187_v5  ;;  %v5801_v36 = vld [vmem:[%s7521_s1 + $0x450] sm:$0xff]  }
  0x8c   :  { %1455 = vmatmul.mubr.bf16.gmra.mrb[52].mxu1 %v6116_v50  ;;  %1510 = vmatprep.mubr.bf16.mxu0 %v6194_v7  ;;  %v5758_v50 = vld [vmem:[%s7521_s1 + $0x328] sm:$0xff]   ;;  %v5764_v7 = vld [vmem:[%s7521_s1 + $0x338] sm:$0xff]  }
  0x8d   :  { %1462 = vmatprep.mubr.bf16.mxu1 %v6136_v55  ;;  %v5759_v55 = vld [vmem:[%s7521_s1 + $0x370] sm:$0xff]  }
  0x93   :  { %1511 = vmatmul.mubr.bf16.vlgmr.msra.gmra.mrb[56].mxu0 %v6209_v11  ;;  %v5767_v11 = vld [vmem:[%s7521_s1 + $0x380] sm:$0xff]  }
  0x94   :  { %1463 = vmatmul.mubr.bf16.gmra.mrb[56].mxu1 %v6153_v58  ;;  %1518 = vmatprep.mubr.bf16.mxu0 %v6225_v16  ;;  %v5763_v58 = vld [vmem:[%s7521_s1 + $0x378] sm:$0xff]   ;;  %v5762_v16 = vld [vmem:[%s7521_s1 + $0x3a0] sm:$0xff]  }
  0x95   :  { %1470 = vmatprep.mubr.bf16.mxu1 %v6169_v0  ;;  %4829 = vmatpush3.bf16.msra.mxu0 %v5756_v43  ;;  %v5802_v43 = vld [vmem:[%s7521_s1 + $0x498] sm:$0xff]  }
  0x96   :  { %4830 = vmatprep.subr.bf16.mxu0 %v5757_v47  ;;  %v6717_v47 = vld [vmem:[%s7522_s0 + $0xa8] ss:$28 sps:$4 sm:$0xff]  }
  0x99   :  { %4831 = vmatpush3.bf16.msra.mxu0 %v5758_v50  ;;  %v6723_v50 = vld [vmem:[%s7522_s0 + $0x40] ss:$28 sps:$4 sm:$0xff]  }
  0x9a   :  { %4832 = vmatprep.subr.bf16.mxu0 %v5759_v55  ;;  %v6730_v55 = vld [vmem:[%s7522_s0 + $0x7c] ss:$28 sps:$4 sm:$0xff]  }
  0x9b   :  { %1519 = vmatmul.mubr.bf16.gmra.mrb[60].mxu0 %v6239_v19  ;;  %v5765_v19 = vld [vmem:[%s7521_s1 + $0x3e8] sm:$0xff]  }
  0x9c   :  { %1471 = vmatmul.mubr.bf16.gmra.mrb[60].mxu1 %v6189_v6  ;;  %1526 = vmatprep.mubr.bf16.mxu0 %v6273_v28  ;;  %v5768_v28 = vld [vmem:[%s7521_s1 + $0x340] sm:$0xff]  }
  0x9d   :  { %5230 = vmatprep.mubr.msk.bf16.mxu1 %vm5889_vm0, %v5888_v10  ;;  %4833 = vmatpush3.bf16.msra.mxu0 %v5761_v57  ;;  %v5803_v57 = vld [vmem:[%s7521_s1 + $0x458] sm:$0xff]  }
  0x9e   :  { %4834 = vmatprep.subr.bf16.mxu0 %v5763_v58  ;;  %v5805_v58 = vld [vmem:[%s7521_s1 + $0x4f0] sm:$0xff]  }
  0xa1   :  { %4835 = vmatpush3.bf16.msra.mxu0 %v5764_v7  ;;  %v6743_v7 = vld [vmem:[%s7522_s0 + $0x78] ss:$28 sps:$4 sm:$0xff]  }
  0xa2   :  { %4836 = vmatprep.subr.bf16.mxu0 %v5767_v11  ;;  %v6749_v11 = vld [vmem:[%s7522_s0 + $0xb4] ss:$28 sps:$4 sm:$0xff]  }
  0xa3   :  { %1527 = vmatmul.mubr.bf16.gmra.mrb[64].mxu0 %v6287_v31  ;;  %v5769_v31 = vld [vmem:[%s7521_s1 + $0x3f0] sm:$0xff]  }
  0xa4   :  { %5231 = vmatmul.mubr.msk.bf16.vlgmr.msra.gmra.mrb[64].mxu1 %vm629_vm1, %v6244_v20  ;;  %1534 = vmatprep.mubr.bf16.mxu0 %v6312_v45  ;;  %v5772_v20 = vld [vmem:[%s7521_s1 + $0x348] sm:$0xff]   ;;  %v5773_v45 = vld [vmem:[%s7521_s1 + $0x3f8] sm:$0xff]  }
  0xa5   :  { %4875 = vmatpush3.bf16.msra.mxu1 %v5762_v16  ;;  %5234 = vmatprep.mubr.msk.bf16.mxu1 %vm5889_vm0, %v5888_v10  ;;  %v6755_v16 = vld [vmem:[%s7522_s0 + $0x14] ss:$28 sps:$4 sm:$0xff]  }
  0xa6   :  { %4876 = vmatprep.subr.bf16.mxu1 %v5765_v19  ;;  %4837 = vmatpush3.bf16.msra.mxu0 %v5768_v28  ;;  %v5806_v19 = vld [vmem:[%s7521_s1 + $0x4b0] sm:$0xff]   ;;  %v5807_v28 = vld [vmem:[%s7521_s1 + $0x4f8] sm:$0xff]  }
  0xa7   :  { %4838 = vmatprep.subr.bf16.mxu0 %v5771_v38  ;;  %v6767_v38 = vld [vmem:[%s7522_s0 + $0xb0] ss:$28 sps:$4 sm:$0xff]  }
  0xa9   :  { %4877 = vmatpush3.bf16.msra.mxu1 %v5766_v39  ;;  %v6773_v39 = vld [vmem:[%s7522_s0 + $0x10] ss:$28 sps:$4 sm:$0xff]  }
  0xaa   :  { %4878 = vmatprep.subr.bf16.mxu1 %v5769_v31  ;;  %4839 = vmatpush3.bf16.msra.mxu0 %v5772_v20  ;;  %v6780_v31 = vld [vmem:[%s7522_s0 + $0x4c] ss:$28 sps:$4 sm:$0xff]   ;;  %v5808_v20 = vld [vmem:[%s7521_s1 + $0x4b8] sm:$0xff]  }
  0xab   :  { %1535 = vmatmul.mubr.bf16.gmra.mrb[68].mxu0 %v6333_v56  ;;  %v5778_v56 = vld [vmem:[%s7521_s1 + $0x400] sm:$0xff]   ;;  %4840 = vmatprep.subr.bf16.mxu0 %v5774_v48  ;;  %v5813_v48 = vld [vmem:[%s7521_s1 + $0x508] sm:$0xff]  }
  0xac   :  { %5235 = vmatmul.mubr.msk.bf16.gmra.mrb[68].mxu1 %vm629_vm1, %v6298_v37  ;;  %1542 = vmatprep.mubr.bf16.mxu0 %v6196_v8  ;;  %v5779_v37 = vld [vmem:[%s7521_s1 + $0x358] sm:$0xff]  }
  0xad   :  { %4879 = vmatpush3.bf16.msra.mxu1 %v5770_v44  ;;  %5238 = vmatprep.mubr.msk.bf16.mxu1 %vm5889_vm0, %v5888_v10  ;;  %v5809_v44 = vld [vmem:[%s7521_s1 + $0x500] sm:$0xff]  }
  0xae   :  { %4880 = vmatprep.subr.bf16.mxu1 %v5773_v45  ;;  %4841 = vmatpush3.bf16.msra.mxu0 %v5776_v52  ;;  %v5811_v45 = vld [vmem:[%s7521_s1 + $0x4c0] sm:$0xff]  }
  0xaf   :  { %4842 = vmatprep.subr.bf16.mxu0 %v5777_v53  ;;  %v6805_v52 = vld [vmem:[%s7522_s0 + $0x84] ss:$28 sps:$4 sm:$0xff]   ;;  %v5814_v53 = vld [vmem:[%s7521_s1 + $0x4c8] sm:$0xff]  }
  0xb1   :  { %4881 = vmatpush3.bf16.msra.mxu1 %v5775_v51  ;;  %v6799_v51 = vld [vmem:[%s7522_s0 + $0x48] ss:$28 sps:$4 sm:$0xff]  }
  0xb2   :  { %4882 = vmatprep.subr.bf16.mxu1 %v5778_v56  ;;  %4843 = vmatpush3.bf16.msra.mxu0 %v5779_v37  ;;  %v5817_v56 = vld [vmem:[%s7521_s1 + $0x510] sm:$0xff]  }
  0xb3   :  { %1543 = vmatmul.mubr.bf16.gmra.mrb[72].mxu0 %v6211_v12  ;;  %4920 = vmatprep.subr.bf16.mxu0 %v5785_v62  ;;  %v5812_v37 = vld [vmem:[%s7521_s1 + $0x530] sm:$0xff]   ;;  %v6828_v62 = vld [vmem:[%s7522_s0 + $0x80] ss:$28 sps:$4 sm:$0xff]  }
  0xb4   :  { %5239 = vmatmul.mubr.msk.bf16.gmra.mrb[72].mxu1 %vm629_vm1, %v6343_v60  ;;  %2064 = vmatprep.mubr.bf16.mxu0 %v6586_v2  ;;  %v5783_v60 = vld [vmem:[%s7521_s1 + $0x410] sm:$0xff]  }
  0xb5   :  { %4883 = vmatpush3.bf16.msra.mxu1 %v5780_v59  ;;  %5242 = vmatprep.mubr.msk.bf16.mxu1 %vm5889_vm0, %v5888_v10  ;;  %v5815_v59 = vld [vmem:[%s7521_s1 + $0x578] sm:$0xff]  }
  0xb6   :  { %4884 = vmatprep.subr.bf16.mxu1 %v5781_v61  ;;  %v5818_v61 = vld [vmem:[%s7521_s1 + $0x4d0] sm:$0xff]  }
  0xb9   :  { %4885 = vmatpush3.bf16.msra.mxu1 %v5782_v1  ;;  %v6834_v1 = vld [vmem:[%s7522_s0 + $0x18] ss:$28 sps:$4 sm:$0xff]  }
  0xba   :  { %4886 = vmatprep.subr.bf16.mxu1 %v5783_v60  ;;  %v5821_v60 = vld [vmem:[%s7521_s1 + $0x518] sm:$0xff]  }
  0xbb   :  { %2065 = vmatmul.mubr.bf16.vlgmr.msra.gmra.mrb[76].mxu0 %v6609_v15 }
  0xbc   :  { %5243 = vmatmul.mubr.msk.bf16.gmra.mrb[76].mxu1 %vm629_vm1, %v6378_v14  ;;  %2072 = vmatprep.mubr.bf16.mxu0 %v6617_v17  ;;  %v5788_v14 = vld [vmem:[%s7521_s1 + $0x3d8] sm:$0xff]  }
  0xbd   :  { %5246 = vmatprep.mubr.msk.bf16.mxu1 %vm5889_vm0, %v5888_v10  ;;  %4887 = vmatpush3.bf16.msra.mxu1 %v5784_v3  ;;  %v5816_v3 = vld [vmem:[%s7521_s1 + $0x538] sm:$0xff]  }
  0xbe   :  { %4921 = vmatpush3.bf16.msra.mxu0 %v5786_v4  ;;  %4888 = vmatprep.subr.bf16.mxu1 %v5787_v9  ;;  %v6847_v4 = vld [vmem:[%s7522_s0 + $0xbc] ss:$28 sps:$4 sm:$0xff]   ;;  %v5819_v9 = vld [vmem:[%s7521_s1 + $0x580] sm:$0xff]  }
  0xbf   :  { %4922 = vmatprep.subr.bf16.mxu0 %v5789_v13 }
  0xc1   :  { %4889 = vmatpush3.bf16.msra.mxu1 %v5788_v14 }
  0xc2   :  { %4923 = vmatpush3.bf16.msra.mxu0 %v5790_v32  ;;  %5250 = vmatprep.subr.bf16.mxu1 %v5888_v10  ;;  %v5822_v32 = vld [vmem:[%s7521_s1 + $0x4d8] sm:$0xff]  }
  0xc3   :  { %4924 = vmatprep.subr.bf16.mxu0 %v5791_v18  ;;  %2073 = vmatmul.mubr.bf16.gmra.mrb[80].mxu0 %v6641_v34 }
  0xc4   :  { %5247 = vmatmul.mubr.msk.bf16.gmra.mrb[80].mxu1 %vm629_vm1, %v6410_v40  ;;  %2080 = vmatprep.mubr.bf16.mxu0 %v6647_v23  ;;  %v5795_v40 = vld [vmem:[%s7521_s1 + $0x438] sm:$0xff]  }
  0xc5   :  { %2136 = vmatprep.mubr.bf16.mxu1 %v6653_v24 }
  0xc6   :  { %4925 = vmatpush3.bf16.msra.mxu0 %v5792_v21 }
  0xc7   :  { %4926 = vmatprep.subr.bf16.mxu0 %v5794_v22 }
  0xca   :  { %4927 = vmatpush3.bf16.msra.mxu0 %v5795_v40 }
  0xcb   :  { %4928 = vmatprep.subr.bf16.mxu0 %v5796_v25  ;;  %2081 = vmatmul.mubr.bf16.gmra.mrb[84].mxu0 %v6674_v33 }
  0xcc   :  { %2137 = vmatmul.mubr.bf16.vlgmr.msra.gmra.mrb[84].mxu1 %v6680_v46  ;;  %2088 = vmatprep.mubr.bf16.mxu0 %v6689_v49 }
  0xcd   :  { %5251 = vmatpush3.bf16.msra.mxu1 %v5793_v26  ;;  %2144 = vmatprep.mubr.bf16.mxu1 %v6698_v54 }
  0xce   :  { %4929 = vmatpush3.bf16.msra.mxu0 %v5797_v27  ;;  %5252 = vmatprep.subr.bf16.mxu1 %v5888_v10  ;;  %v5820_v27 = vld [vmem:[%s7521_s1 + $0x540] sm:$0xff]  }
  0xcf   :  { %4930 = vmatprep.subr.bf16.mxu0 %v5798_v42 }
  0xd1   :  { %5253 = vmatpush3.bf16.msra.mxu1 %v5804_v35  ;;  %v5823_v35 = vld [vmem:[%s7521_s1 + $0x588] sm:$0xff]  }
  0xd2   :  { %4931 = vmatpush3.bf16.msra.mxu0 %v5799_v29  ;;  %5019 = vmatprep.subr.bf16.mxu1 %v5810_v41 }
  0xd3   :  { %4932 = vmatprep.subr.bf16.mxu0 %v5800_v30  ;;  %2089 = vmatmul.mubr.bf16.gmra.mrb[88].mxu0 %v6717_v47 }
  0xd4   :  { %2145 = vmatmul.mubr.bf16.gmra.mrb[88].mxu1 %v6723_v50  ;;  %2096 = vmatprep.mubr.bf16.mxu0 %v6167_v63 }
  0xd5   :  { %2152 = vmatprep.mubr.bf16.mxu1 %v6730_v55 }
  0xd6   :  { %4933 = vmatpush3.bf16.msra.mxu0 %v5801_v36 }
  0xd7   :  { %4934 = vmatprep.subr.bf16.mxu0 %v5802_v43  ;;  %v5824_v43 = vld [vmem:[%s7521_s1 + $0x520] sm:$0xff]  }
  0xda   :  { %4935 = vmatpush3.bf16.msra.mxu0 %v5803_v57  ;;  %v6872_v57 = vld [vmem:[%s7522_s0 + $0xb8] ss:$28 sps:$4 sm:$0xff]  }
  0xdb   :  { %4973 = vmatprep.subr.bf16.mxu0 %v5805_v58  ;;  %2097 = vmatmul.mubr.bf16.gmra.mrb[92].mxu0 %v6187_v5  ;;  %v6878_v58 = vld [vmem:[%s7522_s0 + $0x50] ss:$28 sps:$4 sm:$0xff]  }
  0xdc   :  { %2153 = vmatmul.mubr.bf16.gmra.mrb[92].mxu1 %v6743_v7  ;;  %2208 = vmatprep.mubr.bf16.mxu0 %v6755_v16 }
  0xdd   :  { %2160 = vmatprep.mubr.bf16.mxu1 %v6749_v11 }
  0xe3   :  { %2209 = vmatmul.mubr.bf16.vlgmr.msra.gmra.mrb[96].mxu0 %v6773_v39 }
  0xe4   :  { %2161 = vmatmul.mubr.bf16.gmra.mrb[96].mxu1 %v6767_v38  ;;  %2216 = vmatprep.mubr.bf16.mxu0 %v6780_v31 }
  0xe5   :  { %2168 = vmatprep.mubr.bf16.mxu1 %v6169_v0  ;;  %4974 = vmatpush3.bf16.msra.mxu0 %v5806_v19  ;;  %v5826_v19 = vld [vmem:[%s7521_s1 + $0x4e0] sm:$0xff]  }
  0xe6   :  { %4975 = vmatprep.subr.bf16.mxu0 %v5807_v28 }
  0xe9   :  { %4976 = vmatpush3.bf16.msra.mxu0 %v5808_v20  ;;  %v5825_v20 = vld [vmem:[%s7521_s1 + $0x548] sm:$0xff]  }
  0xea   :  { %4977 = vmatprep.subr.bf16.mxu0 %v5809_v44  ;;  %v5827_v44 = vld [vmem:[%s7521_s1 + $0x528] sm:$0xff]  }
  0xeb   :  { %2217 = vmatmul.mubr.bf16.gmra.mrb[100].mxu0 %v6799_v51 }
  0xec   :  { %2169 = vmatmul.mubr.bf16.gmra.mrb[100].mxu1 %v6189_v6  ;;  %2224 = vmatprep.mubr.bf16.mxu0 %v6805_v52 }
  0xed   :  { %5254 = vmatprep.mubr.msk.bf16.mxu1 %vm5889_vm0, %v5888_v10  ;;  %4978 = vmatpush3.bf16.msra.mxu0 %v5811_v45  ;;  %v5828_v45 = vld [vmem:[%s7521_s1 + $0x590] sm:$0xff]  }
  0xee   :  { %4979 = vmatprep.subr.bf16.mxu0 %v5813_v48 }
  0xf1   :  { %4980 = vmatpush3.bf16.msra.mxu0 %v5814_v53 }
  0xf2   :  { %4981 = vmatprep.subr.bf16.mxu0 %v5817_v56 }
  0xf3   :  { %2225 = vmatmul.mubr.bf16.gmra.mrb[104].mxu0 %v6828_v62 }
  0xf4   :  { %5255 = vmatmul.mubr.msk.bf16.vlgmr.msra.gmra.mrb[104].mxu1 %vm629_vm1, %v6834_v1  ;;  %2232 = vmatprep.mubr.bf16.mxu0 %v6847_v4 }
  0xf5   :  { %5020 = vmatpush3.bf16.msra.mxu1 %v5812_v37  ;;  %5258 = vmatprep.mubr.msk.bf16.mxu1 %vm5889_vm0, %v5888_v10 }
  0xf6   :  { %5021 = vmatprep.subr.bf16.mxu1 %v5815_v59  ;;  %v4554_v13 = vpop.f32.mrb[0].mxu0  ;;  %4982 = vmatpush3.bf16.msra.mxu0 %v5818_v61 }
  0xf7   :  { %v4600_v14 = vpop.f32.mrb[0].mxu1  ;;  %v4555_v18 = vpop.f32.mrb[1].mxu0  ;;  %4983 = vmatprep.subr.bf16.mxu0 %v5821_v60 }
  0xf8   :  { %v4601_v21 = vpop.f32.mrb[1].mxu1  ;;  %v4556_v22 = vadd.f32 %v4555_v18, %v4554_v13  ;;  %v4557_v25 = vpop.f32.mrb[2].mxu0  ;;  %v5830_v13 = vld [vmem:[%s7521_s1 + $0x550] sm:$0xff]  }
  0xf9   :  { %v4602_v40 = vadd.f32 %v4601_v21, %v4600_v14  ;;  %v4603_v26 = vpop.f32.mrb[2].mxu1  ;;  %5022 = vmatpush3.bf16.msra.mxu1 %v5816_v3  ;;  %v4558_v42 = vpop.f32.mrb[3].mxu0 }
  0xfa   :  { %v4604_v29 = vpop.f32.mrb[3].mxu1  ;;  %5023 = vmatprep.subr.bf16.mxu1 %v5819_v9  ;;  %v4559_v30 = vadd.f32 %v4558_v42, %v4557_v25  ;;  %4984 = vmatpush3.bf16.msra.mxu0 %v5822_v32  ;;  %v5829_v9 = vld [vmem:[%s7521_s1 + $0x4e8] sm:$0xff]   ;;  %v5835_v25 = vld [vmem:[%s7521_s1 + $0x5f0] sm:$0xff]   ;;  %v5832_v42 = vld [vmem:[%s7521_s1 + $0x558] sm:$0xff]  }
  0xfb   :  { %v6864_v41 = vadd.f32 %v4602_v40, %v4556_v22  ;;  %v4605_v36 = vadd.f32 %v4604_v29, %v4603_v26  ;;  %2233 = vmatmul.mubr.bf16.gmra.mrb[108].mxu0 %v6872_v57  ;;  %4985 = vmatprep.subr.bf16.mxu0 %v5824_v43  ;;  %v5831_v40 = vld [vmem:[%s7521_s1 + $0x598] sm:$0xff]   ;;  %v6917_v26 = vld [vmem:[%s7522_s0 + $0x88] ss:$28 sps:$4 sm:$0xff]  }
  0xfc   :  { %5259 = vmatmul.mubr.msk.bf16.gmra.mrb[108].mxu1 %vm629_vm1, %v6878_v58  ;;  %2240 = vmatprep.mubr.bf16.mxu0 %v6196_v8  ;;  %v5833_v29 = vld [vmem:[%s7521_s1 + $0x5a0] sm:$0xff]  }
  0xfd   :  { %v6885_v28 = vadd.f32 %v4605_v36, %v4559_v30  ;;  %5024 = vmatpush3.bf16.msra.mxu1 %v5820_v27  ;;  %5262 = vmatprep.mubr.msk.bf16.mxu1 %vm5889_vm0, %v5888_v10 }
  0xfe   :  { %5025 = vmatprep.subr.bf16.mxu1 %v5823_v35  ;;  %v4560_v48 = vpop.f32.mrb[4].mxu0  ;;  %4986 = vmatpush3.bf16.msra.mxu0 %v5826_v19 }
  0xff   :  { %v4606_v53 = vpop.f32.mrb[4].mxu1  ;;  %v4561_v56 = vpop.f32.mrb[5].mxu0  ;;  %4987 = vmatprep.subr.bf16.mxu0 %v5827_v44 }
 0x100   :  { %v4607_v37 = vpop.f32.mrb[5].mxu1  ;;  %v4562_v59 = vadd.f32 %v4561_v56, %v4560_v48  ;;  %v4563_v60 = vpop.f32.mrb[6].mxu0  ;;  %v5836_v56 = vld [vmem:[%s7521_s1 + $0x5b0] sm:$0xff]  }
 0x101   :  { %v4608_v61 = vadd.f32 %v4607_v37, %v4606_v53  ;;  %v4609_v3 = vpop.f32.mrb[6].mxu1  ;;  %5026 = vmatpush3.bf16.msra.mxu1 %v5825_v20  ;;  %v4564_v14 = vpop.f32.mrb[7].mxu0 }
 0x102   :  { %v4610_v32 = vpop.f32.mrb[7].mxu1  ;;  %5027 = vmatprep.subr.bf16.mxu1 %v5828_v45  ;;  %v4565_v21 = vadd.f32 %v4564_v14, %v4563_v60  ;;  %4988 = vmatpush3.bf16.msra.mxu0 %v5829_v9  ;;  %v5837_v60 = vld [vmem:[%s7521_s1 + $0x5a8] sm:$0xff]   ;;  %v6949_v9 = vld [vmem:[%s7522_s0 + $0xc0] ss:$28 sps:$4 sm:$0xff]  }
 0x103   :  { %v6905_v18 = vadd.f32 %v4608_v61, %v4562_v59  ;;  %v4611_v22 = vadd.f32 %v4610_v32, %v4609_v3  ;;  %2241 = vmatmul.mubr.bf16.gmra.mrb[112].mxu0 %v6211_v12  ;;  %5065 = vmatprep.subr.bf16.mxu0 %v5835_v25  ;;  %v5839_v3 = vld [vmem:[%s7521_s1 + $0x5f8] sm:$0xff]   ;;  %v5838_v14 = vld [vmem:[%s7521_s1 + $0x568] sm:$0xff]  }
 0x104   :  { %5263 = vmatmul.mubr.msk.bf16.gmra.mrb[112].mxu1 %vm629_vm1, %v6917_v26  ;;  %2753 = vmatprep.mubr.bf16.mxu0 %v6586_v2  ;;  %v5834_v2 = vld [vmem:[%s7521_s1 + $0x560] sm:$0xff]   ;;  %v5840_v32 = vld [vmem:[%s7521_s1 + $0x5b8] sm:$0xff]  }
 0x105   :  { %v6921_v27 = vadd.f32 %v4611_v22, %v4565_v21  ;;  %5028 = vmatpush3.bf16.msra.mxu1 %v5830_v13  ;;  %5266 = vmatprep.mubr.msk.bf16.mxu1 %vm5889_vm0, %v5888_v10 }
 0x106   :  { %v4566_v35 = vpop.f32.mrb[8].mxu0  ;;  %5029 = vmatprep.subr.bf16.mxu1 %v5831_v40 }
 0x107   :  { %v4612_v30 = vpop.f32.mrb[8].mxu1  ;;  %v4567_v36 = vpop.f32.mrb[9].mxu0 }
 0x108   :  { %v4613_v43 = vpop.f32.mrb[9].mxu1  ;;  %v4568_v19 = vadd.f32 %v4567_v36, %v4566_v35  ;;  %v4569_v44 = vpop.f32.mrb[10].mxu0 }
 0x109   :  { %v4614_v20 = vadd.f32 %v4613_v43, %v4612_v30  ;;  %v4615_v45 = vpop.f32.mrb[10].mxu1  ;;  %5030 = vmatpush3.bf16.msra.mxu1 %v5832_v42  ;;  %v4570_v48 = vpop.f32.mrb[11].mxu0  ;;  %v5842_v43 = vld [vmem:[%s7521_s1 + $0x5c0] sm:$0xff]  }
 0x10a   :  { %v4616_v53 = vpop.f32.mrb[11].mxu1  ;;  %5031 = vmatprep.subr.bf16.mxu1 %v5833_v29  ;;  %v4571_v59 = vadd.f32 %v4570_v48, %v4569_v44  ;;  %v6980_v48 = vld [vmem:[%s7522_s0 + $0xf8] ss:$0 sps:$4 sm:$0xff]  }
 0x10b   :  { %v6938_v37 = vadd.f32 %v4614_v20, %v4568_v19  ;;  %v4617_v61 = vadd.f32 %v4616_v53, %v4615_v45  ;;  %2754 = vmatmul.mubr.bf16.vlgmr.msra.gmra.mrb[116].mxu0 %v6609_v15  ;;  %v5841_v15 = vld [vmem:[%s7521_s1 + $0x600] sm:$0xff]   ;;  %v5844_v45 = vld [vmem:[%s7521_s1 + $0x608] sm:$0xff]  }
 0x10c   :  { %5267 = vmatmul.mubr.msk.bf16.gmra.mrb[116].mxu1 %vm629_vm1, %v6949_v9  ;;  %2761 = vmatprep.mubr.bf16.mxu0 %v6617_v17 }
 0x10d   :  { %v6954_v13 = vadd.f32 %v4617_v61, %v4571_v59  ;;  %5270 = vmatprep.mubr.msk.bf16.mxu1 %vm5889_vm0, %v5888_v10  ;;  %5032 = vmatpush3.bf16.msra.mxu1 %v5834_v2  ;;  %v5845_v2 = vld [vmem:[%s7521_s1 + $0x5c8] sm:$0xff]   ;;  %v5846_v61 = vld [vmem:[%s7521_s1 + $0x610] sm:$0xff]  }
 0x10e   :  { %5066 = vmatpush3.bf16.msra.mxu0 %v5836_v56  ;;  %v4572_v21 = vpop.f32.mrb[12].mxu0  ;;  %5033 = vmatprep.subr.bf16.mxu1 %v5837_v60 }
 0x10f   :  { %v4618_v22 = vpop.f32.mrb[12].mxu1  ;;  %5067 = vmatprep.subr.bf16.mxu0 %v5839_v3  ;;  %v4573_v40 = vpop.f32.mrb[13].mxu0 }
 0x110   :  { %v4619_v17 = vpop.f32.mrb[13].mxu1  ;;  %v4574_v25 = vadd.f32 %v4573_v40, %v4572_v21  ;;  %v4575_v29 = vpop.f32.mrb[14].mxu0 }
 0x111   :  { %v4620_v42 = vadd.f32 %v4619_v17, %v4618_v22  ;;  %v4621_v35 = vpop.f32.mrb[14].mxu1  ;;  %v4576_v30 = vpop.f32.mrb[15].mxu0  ;;  %5034 = vmatpush3.bf16.msra.mxu1 %v5838_v14  ;;  %v5848_v17 = vld [vmem:[%s7521_s1 + $0x618] sm:$0xff]  }
 0x112   :  { %v4622_v36 = vpop.f32.mrb[15].mxu1  ;;  %5068 = vmatpush3.bf16.msra.mxu0 %v5840_v32  ;;  %v4577_v20 = vadd.f32 %v4576_v30, %v4575_v29  ;;  %5274 = vmatprep.subr.bf16.mxu1 %v5888_v10 }
 0x113   :  { %v6971_v19 = vadd.f32 %v4620_v42, %v4574_v25  ;;  %v4623_v44 = vadd.f32 %v4622_v36, %v4621_v35  ;;  %5069 = vmatprep.subr.bf16.mxu0 %v5841_v15  ;;  %2762 = vmatmul.mubr.bf16.gmra.mrb[120].mxu0 %v6641_v34  ;;  %v5847_v15 = vld [vmem:[%s7521_s1 + $0x5d0] sm:$0xff]   ;;  %v5854_v25 = vld [vmem:[%s7521_s1 + $0x638] sm:$0xff]  }
 0x114   :  { %5271 = vmatmul.mubr.msk.bf16.gmra.mrb[120].mxu1 %vm629_vm1, %v6980_v48  ;;  %2769 = vmatprep.mubr.bf16.mxu0 %v6647_v23  ;;  %v5849_v42 = vld [vmem:[%s7521_s1 + $0x5d8] sm:$0xff]  }
 0x115   :  { %v6985_v53 = vadd.f32 %v4623_v44, %v4577_v20  ;;  %2825 = vmatprep.mubr.bf16.mxu1 %v6653_v24  ;;  %v5843_v24 = vld [vmem:[%s7521_s1 + $0x630] sm:$0xff]  }
 0x116   :  { %5070 = vmatpush3.bf16.msra.mxu0 %v5842_v43  ;;  %v4578_v56 = vpop.f32.mrb[16].mxu0 }
 0x117   :  { %v4624_v59 = vpop.f32.mrb[16].mxu1  ;;  %5071 = vmatprep.subr.bf16.mxu0 %v5844_v45  ;;  %v4579_v60 = vpop.f32.mrb[17].mxu0  ;;  %v5851_v45 = vld [vmem:[%s7521_s1 + $0x5e0] sm:$0xff]  }
 0x118   :  { %v4625_v34 = vpop.f32.mrb[17].mxu1  ;;  %v4580_v3 = vadd.f32 %v4579_v60, %v4578_v56  ;;  %v4581_v23 = vpop.f32.mrb[18].mxu0 }
 0x119   :  { %v4626_v14 = vadd.f32 %v4625_v34, %v4624_v59  ;;  %v4627_v32 = vpop.f32.mrb[18].mxu1  ;;  %v4582_v22 = vpop.f32.mrb[19].mxu0  ;;  %v5852_v59 = vld [vmem:[%s7521_s1 + $0x628] sm:$0xff]  }
 0x11a   :  { %v4628_v21 = vpop.f32.mrb[19].mxu1  ;;  %5072 = vmatpush3.bf16.msra.mxu0 %v5845_v2 }
 0x11b   :  { %v784_v40 = vadd.f32 %v4626_v14, %v4580_v3  ;;  %5073 = vmatprep.subr.bf16.mxu0 %v5846_v61  ;;  %2770 = vmatmul.mubr.bf16.gmra.mrb[124].mxu0 %v6674_v33  ;;  %v5850_v33 = vld [vmem:[%s7521_s1 + $0x620] sm:$0xff]  }
 0x11c   :  { %2826 = vmatmul.mubr.bf16.vlgmr.msra.gmra.mrb[124].mxu1 %v6680_v46  ;;  %2777 = vmatprep.mubr.bf16.mxu0 %v6689_v49 }
 0x11d   :  { %5275 = vmatpush3.bf16.msra.mxu1 %v5843_v24  ;;  %2833 = vmatprep.mubr.bf16.mxu1 %v6698_v54 }
 0x11e   :  { %5074 = vmatpush3.bf16.msra.mxu0 %v5847_v15  ;;  %v4646_v29 = vpop.f32.mrb[20].mxu0  ;;  %5276 = vmatprep.subr.bf16.mxu1 %v5888_v10 }
 0x11f   :  { %v4670_v35 = vpop.f32.mrb[20].mxu1  ;;  %5075 = vmatprep.subr.bf16.mxu0 %v5848_v17  ;;  %v4647_v46 = vpop.f32.mrb[21].mxu0 }
 0x120   :  { %v4671_v49 = vpop.f32.mrb[21].mxu1  ;;  %v4648_v30 = vadd.f32 %v4647_v46, %v4646_v29  ;;  %v4649_v43 = vpop.f32.mrb[22].mxu0 }
 0x121   :  { %v4672_v36 = vadd.f32 %v4671_v49, %v4670_v35  ;;  %v4673_v54 = vpop.f32.mrb[22].mxu1  ;;  %5277 = vmatpush3.bf16.msra.mxu1 %v5854_v25  ;;  %v4650_v20 = vpop.f32.mrb[23].mxu0 }
 0x122   :  { %v4674_v44 = vpop.f32.mrb[23].mxu1  ;;  %5076 = vmatpush3.bf16.msra.mxu0 %v5849_v42  ;;  %v4651_v2 = vadd.f32 %v4650_v20, %v4649_v43  ;;  %v824_v56 = vadd.f32 %v4648_v30, %v6864_v41  ;;  %v5853_v41 = vld [vmem:[%s7521_s1 + $0x5e8] sm:$0xff]  }
 0x123   :  { %5077 = vmatprep.subr.bf16.mxu0 %v5850_v33  ;;  %v7025_v61 = vadd.f32 %v4672_v36, %v784_v40  ;;  %2778 = vmatmul.mubr.bf16.gmra.mrb[128].mxu0 %v6717_v47 }
 0x124   :  { %2834 = vmatmul.mubr.bf16.gmra.mrb[128].mxu1 %v6723_v50  ;;  %v827_v60 = vadd.f32 %v4651_v2, %v6885_v28  ;;  %2785 = vmatprep.mubr.bf16.mxu0 %v6167_v63 }
 0x125   :  { %2841 = vmatprep.mubr.bf16.mxu1 %v6730_v55 }
 0x126   :  { %5078 = vmatpush3.bf16.msra.mxu0 %v5851_v45  ;;  %v4652_v34 = vpop.f32.mrb[24].mxu0 }
 0x127   :  { %v895_v3 = vpop.f32.mrb[24].mxu1  ;;  %5079 = vmatprep.subr.bf16.mxu0 %v5852_v59  ;;  %v4653_v32 = vpop.f32.mrb[25].mxu0 }
 0x128   :  { %v7035_v14 = vadd.f32 %v895_v3, %v824_v56  ;;  %v5208_v47 = vpop.f32.mrb[25].mxu1  ;;  %v4654_v23 = vadd.f32 %v4653_v32, %v4652_v34  ;;  %v4655_v50 = vpop.f32.mrb[26].mxu0 }
 0x129   :  { %v898_v24 = vpop.f32.mrb[26].mxu1  ;;  %v4656_v63 = vpop.f32.mrb[27].mxu0 }
 0x12a   :  { %v7037_v28 = vadd.f32 %v898_v24, %v827_v60  ;;  %v5209_v21 = vpop.f32.mrb[27].mxu1  ;;  %5080 = vmatpush3.bf16.msra.mxu0 %v5853_v41  ;;  %v4657_v55 = vadd.f32 %v4656_v63, %v4655_v50  ;;  %v832_v22 = vadd.f32 %v4654_v23, %v6905_v18 }
 0x12b   :  { %2786 = vmatmul.mubr.bf16.gmra.mrb[132].mxu0 %v6187_v5 }
 0x12c   :  { %2842 = vmatmul.mubr.bf16.gmra.mrb[132].mxu1 %v6743_v7  ;;  %v835_v15 = vadd.f32 %v4657_v55, %v6921_v27  ;;  %2897 = vmatprep.mubr.bf16.mxu0 %v6755_v16 }
 0x12d   :  { %2849 = vmatprep.mubr.bf16.mxu1 %v6749_v11 }
 0x12e   :  { %v4658_v40 = vpop.f32.mrb[28].mxu0 }
 0x12f   :  { %v903_v17 = vpop.f32.mrb[28].mxu1  ;;  %v4659_v42 = vpop.f32.mrb[29].mxu0 }
 0x130   :  { %v7045_v25 = vadd.f32 %v903_v17, %v832_v22  ;;  %v5212_v29 = vpop.f32.mrb[29].mxu1  ;;  %v4660_v35 = vadd.f32 %v4659_v42, %v4658_v40  ;;  %v4661_v33 = vpop.f32.mrb[30].mxu0 }
 0x131   :  { %v906_v46 = vpop.f32.mrb[30].mxu1  ;;  %v4662_v5 = vpop.f32.mrb[31].mxu0 }
 0x132   :  { %v7047_v18 = vadd.f32 %v906_v46, %v835_v15  ;;  %v5213_v49 = vpop.f32.mrb[31].mxu1  ;;  %v4663_v7 = vadd.f32 %v4662_v5, %v4661_v33  ;;  %v840_v27 = vadd.f32 %v4660_v35, %v6938_v37 }
 0x133   :  { %2898 = vmatmul.mubr.bf16.vlgmr.msra.gmra.mrb[136].mxu0 %v6773_v39 }
 0x134   :  { %2850 = vmatmul.mubr.bf16.gmra.mrb[136].mxu1 %v6767_v38  ;;  %v843_v11 = vadd.f32 %v4663_v7, %v6954_v13  ;;  %2905 = vmatprep.mubr.bf16.mxu0 %v6780_v31 }
 0x135   :  { %2857 = vmatprep.mubr.bf16.mxu1 %v6169_v0 }
 0x136   :  { %v4664_v16 = vpop.f32.mrb[32].mxu0 }
 0x137   :  { %v911_v30 = vpop.f32.mrb[32].mxu1  ;;  %v4665_v43 = vpop.f32.mrb[33].mxu0 }
 0x138   :  { %v7055_v36 = vadd.f32 %v911_v30, %v840_v27  ;;  %v5216_v54 = vpop.f32.mrb[33].mxu1  ;;  %v4666_v20 = vadd.f32 %v4665_v43, %v4664_v16  ;;  %v4667_v44 = vpop.f32.mrb[34].mxu0 }
 0x139   :  { %v914_v45 = vpop.f32.mrb[34].mxu1  ;;  %v4668_v38 = vpop.f32.mrb[35].mxu0 }
 0x13a   :  { %v7057_v37 = vadd.f32 %v914_v45, %v843_v11  ;;  %v5217_v2 = vpop.f32.mrb[35].mxu1  ;;  %v4669_v39 = vadd.f32 %v4668_v38, %v4667_v44  ;;  %v848_v13 = vadd.f32 %v4666_v20, %v6971_v19 }
 0x13b   :  { %2906 = vmatmul.mubr.bf16.gmra.mrb[140].mxu0 %v6799_v51 }
 0x13c   :  { %2858 = vmatmul.mubr.bf16.gmra.mrb[140].mxu1 %v6189_v6  ;;  %v851_v0 = vadd.f32 %v4669_v39, %v6985_v53  ;;  %2913 = vmatprep.mubr.bf16.mxu0 %v6805_v52 }
 0x13d   :  { %5278 = vmatprep.mubr.msk.bf16.mxu1 %vm5889_vm0, %v5888_v10 }
 0x13e   :  { %v4699_v56 = vpop.f32.mrb[36].mxu0 }
 0x13f   :  { %v919_v31 = vpop.f32.mrb[36].mxu1  ;;  %v4700_v41 = vpop.f32.mrb[37].mxu0 }
 0x140   :  { %v7066_v59 = vadd.f32 %v919_v31, %v848_v13  ;;  %v5220_v60 = vpop.f32.mrb[37].mxu1  ;;  %v4701_v3 = vadd.f32 %v4700_v41, %v4699_v56  ;;  %v4702_v19 = vpop.f32.mrb[38].mxu0 }
 0x141   :  { %v922_v34 = vpop.f32.mrb[38].mxu1  ;;  %v4703_v51 = vpop.f32.mrb[39].mxu0 }
 0x142   :  { %v7068_v32 = vadd.f32 %v922_v34, %v851_v0  ;;  %v5221_v6 = vpop.f32.mrb[39].mxu1  ;;  %v4704_v47 = vadd.f32 %v4703_v51, %v4702_v19 }
 0x143   :  { %2914 = vmatmul.mubr.bf16.gmra.mrb[144].mxu0 %v6828_v62 }
 0x144   :  { %5279 = vmatmul.mubr.msk.bf16.vlgmr.msra.gmra.mrb[144].mxu1 %vm629_vm1, %v6834_v1  ;;  %2921 = vmatprep.mubr.bf16.mxu0 %v6847_v4 }
 0x145   :  { %5282 = vmatprep.mubr.msk.bf16.mxu1 %vm5889_vm0, %v5888_v10 }
 0x146   :  { %v4705_v53 = vpop.f32.mrb[40].mxu0 }
 0x147   :  { %v927_v52 = vpop.f32.mrb[40].mxu1  ;;  %v4706_v24 = vpop.f32.mrb[41].mxu0 }
 0x148   :  { %v7077_v23 = vadd.f32 %v927_v52, %v7025_v61  ;;  %v5224_v50 = vpop.f32.mrb[41].mxu1  ;;  %v4707_v21 = vadd.f32 %v4706_v24, %v4705_v53  ;;  %v4708_v55 = vpop.f32.mrb[42].mxu0 }
 0x149   :  { %v930_v63 = vpop.f32.mrb[42].mxu1  ;;  %v4709_v62 = vpop.f32.mrb[43].mxu0 }
 0x14a   :  { %v5225_v22 = vpop.f32.mrb[43].mxu1  ;;  %v4710_v15 = vadd.f32 %v4709_v62, %v4708_v55 }
 0x14b   :  { %2922 = vmatmul.mubr.bf16.gmra.mrb[148].mxu0 %v6872_v57 }
 0x14c   :  { %5283 = vmatmul.mubr.msk.bf16.gmra.mrb[148].mxu1 %vm629_vm1, %v6878_v58  ;;  %2929 = vmatprep.mubr.bf16.mxu0 %v6196_v8 }
 0x14d   :  { %5286 = vmatprep.mubr.msk.bf16.mxu1 %vm5889_vm0, %v5888_v10 }
 0x14e   :  { %v4711_v4 = vpop.f32.mrb[44].mxu0 }
 0x14f   :  { %v4745_v1 = vpop.f32.mrb[44].mxu1  ;;  %v4712_v40 = vpop.f32.mrb[45].mxu0 }
 0x150   :  { %v4746_v61 = vpop.f32.mrb[45].mxu1  ;;  %v4713_v29 = vadd.f32 %v4712_v40, %v4711_v4  ;;  %v4714_v35 = vpop.f32.mrb[46].mxu0 }
 0x151   :  { %v4747_v17 = vadd.f32 %v4746_v61, %v4745_v1  ;;  %v4748_v42 = vpop.f32.mrb[46].mxu1  ;;  %v4715_v46 = vpop.f32.mrb[47].mxu0 }
 0x152   :  { %v4749_v33 = vpop.f32.mrb[47].mxu1  ;;  %v4716_v49 = vadd.f32 %v4715_v46, %v4714_v35 }
 0x153   :  { %v1441_v5 = vadd.f32 %v4747_v17, %v4701_v3  ;;  %v4750_v57 = vadd.f32 %v4749_v33, %v4748_v42  ;;  %2930 = vmatmul.mubr.bf16.gmra.mrb[152].mxu0 %v6211_v12 }
 0x154   :  { %5287 = vmatmul.mubr.msk.bf16.gmra.mrb[152].mxu1 %vm629_vm1, %v6917_v26  ;;  %5314 = vmatprep.mubr.msk.f32.mxu0 %vm5889_vm0, %v5888_v10 }
 0x155   :  { %v1444_v8 = vadd.f32 %v4750_v57, %v4704_v47  ;;  %5290 = vmatprep.mubr.msk.bf16.mxu1 %vm5889_vm0, %v5888_v10 }
 0x156   :  { %v4717_v7 = vpop.f32.mrb[48].mxu0 }
 0x157   :  { %v4751_v58 = vpop.f32.mrb[48].mxu1  ;;  %v4718_v11 = vpop.f32.mrb[49].mxu0 }
 0x158   :  { %v4752_v27 = vpop.f32.mrb[49].mxu1  ;;  %v4719_v43 = vadd.f32 %v4718_v11, %v4717_v7  ;;  %v4720_v54 = vpop.f32.mrb[50].mxu0 }
 0x159   :  { %v4753_v16 = vadd.f32 %v4752_v27, %v4751_v58  ;;  %v4754_v30 = vpop.f32.mrb[50].mxu1  ;;  %v4721_v12 = vpop.f32.mrb[51].mxu0 }
 0x15a   :  { %v4755_v20 = vpop.f32.mrb[51].mxu1  ;;  %v4722_v26 = vadd.f32 %v4721_v12, %v4720_v54 }
 0x15b   :  { %v1449_v44 = vadd.f32 %v4753_v16, %v4707_v21  ;;  %v4756_v45 = vadd.f32 %v4755_v20, %v4754_v30 }
 0x15c   :  { %5291 = vmatmul.mubr.msk.bf16.gmra.mrb[156].mxu1 %vm629_vm1, %v6949_v9 }
 0x15d   :  { %v1452_v38 = vadd.f32 %v4756_v45, %v4710_v15  ;;  %5294 = vmatprep.mubr.msk.bf16.mxu1 %vm5889_vm0, %v5888_v10 }
 0x15e   :  { %v4723_v39 = vpop.f32.mrb[52].mxu0 }
 0x15f   :  { %v4757_v2 = vpop.f32.mrb[52].mxu1  ;;  %v4724_v0 = vpop.f32.mrb[53].mxu0 }
 0x160   :  { %v4758_v13 = vpop.f32.mrb[53].mxu1  ;;  %v4725_v60 = vadd.f32 %v4724_v0, %v4723_v39  ;;  %v4726_v41 = vpop.f32.mrb[54].mxu0 }
 0x161   :  { %v4759_v31 = vadd.f32 %v4758_v13, %v4757_v2  ;;  %v4760_v56 = vpop.f32.mrb[54].mxu1  ;;  %v4727_v3 = vpop.f32.mrb[55].mxu0  ;;  %v4462_v41 = vld [vmem:[%s7523_s3 + $0x48] sm:$0xff] }
 0x162   :  { %v4761_v34 = vpop.f32.mrb[55].mxu1 }
 0x163   :  { %v1457_v19 = vadd.f32 %v4759_v31, %v4713_v29  ;;  %v4762_v6 = vadd.f32 %v4761_v34, %v4760_v56  ;;  %v5890_v56 = vmov 0.0|0.0  }
 0x164   :  { %5295 = vmatmul.mubr.msk.bf16.gmra.mrb[160].mxu1 %vm629_vm1, %v6980_v48  ;;  %5476 = vmatprep.subr.bf16.mxu0 %v5890_v56 }
 0x165   :  { %v1460_v9 = vadd.f32 %v4762_v6, %v4716_v49  ;;  %5333 = vmatprep.mubr.msk.f32.mxu1 %vm5889_vm0, %v5888_v10  ;;  %5488 = vmatprep.subr.bf16.mxu1 %v5890_v56 }
 0x166   :  { %v4791_v47 = vpop.f32.mrb[56].mxu0 }
 0x167   :  { %v4763_v51 = vpop.f32.mrb[56].mxu1  ;;  %v4792_v53 = vpop.f32.mrb[57].mxu0 }
 0x168   :  { %v4764_v52 = vpop.f32.mrb[57].mxu1  ;;  %v4793_v24 = vadd.f32 %v4792_v53, %v4791_v47  ;;  %v4794_v21 = vpop.f32.mrb[58].mxu0 }
 0x169   :  { %v4765_v50 = vadd.f32 %v4764_v52, %v4763_v51  ;;  %v4766_v63 = vpop.f32.mrb[58].mxu1  ;;  %v4795_v22 = vpop.f32.mrb[59].mxu0 }
 0x16a   :  { %v4767_v55 = vpop.f32.mrb[59].mxu1  ;;  %v4796_v1 = vadd.f32 %v4795_v22, %v4794_v21  ;;  %v1513_v4 = vadd.f32 %v4793_v24, %v1441_v5 }
 0x16b   :  { %v1465_v62 = vadd.f32 %v4765_v50, %v4719_v43  ;;  %v4768_v15 = vadd.f32 %v4767_v55, %v4766_v63 }
 0x16c   :  { %v1516_v48 = vadd.f32 %v4796_v1, %v1444_v8 }
 0x16d   :  { %v1468_v61 = vadd.f32 %v4768_v15, %v4722_v26 }
 0x16e   :  { %v4797_v17 = vpop.f32.mrb[60].mxu0 }
 0x16f   :  { %v4769_v40 = vpop.f32.mrb[60].mxu1  ;;  %v4798_v29 = vpop.f32.mrb[61].mxu0 }
 0x170   :  { %v4770_v42 = vpop.f32.mrb[61].mxu1  ;;  %v4799_v33 = vadd.f32 %v4798_v29, %v4797_v17  ;;  %v4800_v57 = vpop.f32.mrb[62].mxu0  ;;  %v4464_v17 = vld [vmem:[%s7523_s3 + $0x58] sm:$0xff] }
 0x171   :  { %v4771_v35 = vadd.f32 %v4770_v42, %v4769_v40  ;;  %v4772_v46 = vpop.f32.mrb[62].mxu1  ;;  %v4801_v58 = vpop.f32.mrb[63].mxu0  ;;  %v4463_v40 = vld [vmem:[%s7523_s3 + $0x50] sm:$0xff] }
 0x172   :  { %v4773_v49 = vpop.f32.mrb[63].mxu1  ;;  %v4802_v27 = vadd.f32 %v4801_v58, %v4800_v57  ;;  %v1521_v11 = vadd.f32 %v4799_v33, %v1449_v44  ;;  %v5480_v33 = vpack.c.bf16 %v4464_v17, %v4463_v40 }
 0x173   :  { %v1473_v7 = vadd.f32 %v4771_v35, %v4725_v60  ;;  %v4461_v60 = vld [vmem:[%s7523_s3 + $0x40] sm:$0xff] }
 0x174   :  { %v1524_v16 = vadd.f32 %v4802_v27, %v1452_v38 }
 0x176   :  { %v4803_v30 = vpop.f32.mrb[64].mxu0 }
 0x177   :  { %v1584_v43 = vpop.f32.mrb[64].mxu1  ;;  %v4804_v5 = vpop.f32.mrb[65].mxu0 }
 0x178   :  { %v7100_v54 = vadd.f32 %v1584_v43, %v1513_v4  ;;  %v5232_v8 = vpop.f32.mrb[65].mxu1  ;;  %v4805_v20 = vadd.f32 %v4804_v5, %v4803_v30  ;;  %v4806_v12 = vpop.f32.mrb[66].mxu0  ;;  %v3052_v30 = vld [vmem:[%s7523_s3] sm:$0xff]  ;;  %v3053_v43 = vld [vmem:[%s7523_s3 + $0x8] sm:$0xff] }
 0x179   :  { %v1587_v45 = vpop.f32.mrb[66].mxu1  ;;  %v4807_v39 = vpop.f32.mrb[67].mxu0  ;;  %v5489_v5 = vpack.c.bf16 %v3053_v43, %v3052_v30  ;;  %v4467_v30 = vld [vmem:[%s7523_s3 + $0x70] sm:$0xff]  ;;  %v4468_v43 = vld [vmem:[%s7523_s3 + $0x78] sm:$0xff] }
 0x17a   :  { %v1622_v26 = vmax.f32 %v7035_v14, %v7100_v54  ;;  %v7104_v2 = vadd.f32 %v1587_v45, %v1516_v48  ;;  %v5233_v13 = vpop.f32.mrb[67].mxu1  ;;  %v4808_v0 = vadd.f32 %v4807_v39, %v4806_v12  ;;  %v1529_v31 = vadd.f32 %v4805_v20, %v1457_v19  ;;  %v4471_v14 = vld [vmem:[%s7523_s3 + $0x80] sm:$0xff]  ;;  %v4472_v54 = vld [vmem:[%s7523_s3 + $0x88] sm:$0xff] }
 0x17b   :  { %v5477_v19 = vpack.c.bf16 %v4462_v41, %v4461_v60  ;;  %5490 = vmatpush3.bf16.msra.mxu1 %v5489_v5  ;;  %v5486_v5 = vpack.c.bf16 %v4468_v43, %v4467_v30 }
 0x17c   :  { %v1623_v44 = vmax.f32 %v7037_v28, %v7104_v2  ;;  %v1532_v38 = vadd.f32 %v4808_v0, %v1460_v9  ;;  %5491 = vmatprep.subr.bf16.mxu1 %v5890_v56  ;;  %v4482_v28 = vld [vmem:[%s7523_s3 + $0xd0] sm:$0xff]  ;;  %v4483_v2 = vld [vmem:[%s7523_s3 + $0xd8] sm:$0xff] }
 0x17d   :  { %5478 = vmatpush3.bf16.msra.mxu0 %v5477_v19  ;;  %v4466_v19 = vld [vmem:[%s7523_s3 + $0x68] sm:$0xff] }
 0x17e   :  { %v4809_v34 = vpop.f32.mrb[68].mxu0  ;;  %5479 = vmatprep.subr.bf16.mxu0 %v5890_v56 }
 0x17f   :  { %v1592_v3 = vpop.f32.mrb[68].mxu1  ;;  %v4810_v51 = vpop.f32.mrb[69].mxu0 }
 0x180   :  { %v7116_v6 = vadd.f32 %v1592_v3, %v1521_v11  ;;  %v5236_v9 = vpop.f32.mrb[69].mxu1  ;;  %v4811_v47 = vadd.f32 %v4810_v51, %v4809_v34  ;;  %v4812_v52 = vpop.f32.mrb[70].mxu0  ;;  %v4465_v3 = vld [vmem:[%s7523_s3 + $0x60] sm:$0xff]  ;;  %v3054_v51 = vld [vmem:[%s7523_s3 + $0x10] sm:$0xff] }
 0x181   :  { %v1595_v53 = vpop.f32.mrb[70].mxu1  ;;  %v4813_v63 = vpop.f32.mrb[71].mxu0  ;;  %5481 = vmatpush3.bf16.msra.mxu0 %v5480_v33 }
 0x182   :  { %v1624_v50 = vmax.f32 %v7045_v25, %v7116_v6  ;;  %v7120_v24 = vadd.f32 %v1595_v53, %v1524_v16  ;;  %v5237_v21 = vpop.f32.mrb[71].mxu1  ;;  %v4814_v55 = vadd.f32 %v4813_v63, %v4812_v52  ;;  %v1537_v22 = vadd.f32 %v4811_v47, %v1465_v62  ;;  %5482 = vmatprep.subr.bf16.mxu0 %v5890_v56  ;;  %v3055_v52 = vld [vmem:[%s7523_s3 + $0x18] sm:$0xff] }
 0x183   :  { %v5483_v47 = vpack.c.bf16 %v4466_v19, %v4465_v3  ;;  %v5492_v53 = vpack.c.bf16 %v3055_v52, %v3054_v51 }
 0x184   :  { %v1540_v1 = vadd.f32 %v4814_v55, %v1468_v61  ;;  %v3056_v55 = vld [vmem:[%s7523_s3 + $0x20] sm:$0xff]  ;;  %v7529_v25 = vmax.f32 %v7047_v18, %v7120_v24  ;;  %v4486_v18 = vld [vmem:[%s7523_s3 + $0xf0] sm:$0xff]  ;;  %v4487_v24 = vld [vmem:[%s7523_s3 + $0xf8] sm:$0xff] }
 0x185   :  { %5484 = vmatpush3.bf16.msra.mxu0 %v5483_v47  ;;  %5493 = vmatpush3.bf16.msra.mxu1 %v5492_v53 }
 0x186   :  { %v4815_v4 = vpop.f32.mrb[72].mxu0  ;;  %5485 = vmatprep.subr.bf16.mxu0 %v5890_v56  ;;  %5494 = vmatprep.subr.bf16.mxu1 %v5890_v56 }
 0x187   :  { %v1600_v48 = vpop.f32.mrb[72].mxu1  ;;  %v4816_v29 = vpop.f32.mrb[73].mxu0 }
 0x188   :  { %v7131_v42 = vadd.f32 %v1600_v48, %v1529_v31  ;;  %v5240_v35 = vpop.f32.mrb[73].mxu1  ;;  %v4817_v62 = vadd.f32 %v4816_v29, %v4815_v4  ;;  %v4818_v57 = vpop.f32.mrb[74].mxu0 }
 0x189   :  { %v1603_v46 = vpop.f32.mrb[74].mxu1  ;;  %v4819_v27 = vpop.f32.mrb[75].mxu0  ;;  %5487 = vmatpush3.bf16.msra.mxu0 %v5486_v5 }
 0x18a   :  { %v7135_v49 = vadd.f32 %v1603_v46, %v1532_v38  ;;  %v5241_v58 = vpop.f32.mrb[75].mxu1  ;;  %v1545_v11 = vadd.f32 %v4817_v62, %v1473_v7  ;;  %v3059_v27 = vld [vmem:[%s7523_s3 + $0x38] sm:$0xff]  ;;  %5500 = vmatprep.subr.bf16.mxu0 %v5890_v56 }
 0x18b   :  { %v3058_v58 = vld [vmem:[%s7523_s3 + $0x30] sm:$0xff] }
 0x18e   :  { %v4844_v20 = vpop.f32.mrb[76].mxu0 }
 0x18f   :  { %v1608_v8 = vpop.f32.mrb[76].mxu1  ;;  %v4845_v7 = vpop.f32.mrb[77].mxu0 }
 0x190   :  { %v7146_v12 = vadd.f32 %v1608_v8, %v1537_v22  ;;  %v5244_v45 = vpop.f32.mrb[77].mxu1  ;;  %v4846_v13 = vadd.f32 %v4845_v7, %v4844_v20  ;;  %v4847_v0 = vpop.f32.mrb[78].mxu0  ;;  %v3057_v22 = vld [vmem:[%s7523_s3 + $0x28] sm:$0xff] }
 0x191   :  { %v1611_v39 = vpop.f32.mrb[78].mxu1  ;;  %v4848_v41 = vpop.f32.mrb[79].mxu0  ;;  %v5495_v40 = vpack.c.bf16 %v3057_v22, %v3056_v55 }
 0x192   :  { %v7151_v38 = vadd.f32 %v1611_v39, %v1540_v1  ;;  %v5245_v60 = vpop.f32.mrb[79].mxu1  ;;  %v4849_v34 = vadd.f32 %v4848_v41, %v4847_v0 }
 0x193   :  { %5496 = vmatpush3.bf16.msra.mxu1 %v5495_v40 }
 0x194   :  { %5497 = vmatprep.subr.bf16.mxu1 %v5890_v56 }
 0x196   :  { %v4850_v21 = vpop.f32.mrb[80].mxu0 }
 0x197   :  { %v1616_v63 = vpop.f32.mrb[80].mxu1  ;;  %v4851_v48 = vpop.f32.mrb[81].mxu0 }
 0x198   :  { %v7174_v1 = vadd.f32 %v1616_v63, %v1545_v11  ;;  %v5248_v4 = vpop.f32.mrb[81].mxu1  ;;  %v4852_v29 = vadd.f32 %v4851_v48, %v4850_v21  ;;  %v4853_v35 = vpop.f32.mrb[82].mxu0  ;;  %v5498_v11 = vpack.c.bf16 %v3059_v27, %v3058_v58 }
 0x199   :  { %v1619_v17 = vpop.f32.mrb[82].mxu1  ;;  %v4854_v46 = vpop.f32.mrb[83].mxu0 }
 0x19a   :  { %v5249_v62 = vpop.f32.mrb[83].mxu1  ;;  %v4855_v57 = vadd.f32 %v4854_v46, %v4853_v35  ;;  %5499 = vmatpush3.bf16.msra.mxu1 %v5498_v11 }
 0x19b   :  { %5512 = vmatprep.subr.bf16.mxu1 %v5890_v56 }
 0x19e   :  { %v4856_v20 = vpop.f32.mrb[84].mxu0 }
 0x19f   :  { %v4890_v8 = vpop.f32.mrb[84].mxu1  ;;  %v4857_v7 = vpop.f32.mrb[85].mxu0 }
 0x1a0   :  { %v4891_v45 = vpop.f32.mrb[85].mxu1  ;;  %v4858_v60 = vadd.f32 %v4857_v7, %v4856_v20  ;;  %v4859_v41 = vpop.f32.mrb[86].mxu0 }
 0x1a1   :  { %v4892_v39 = vadd.f32 %v4891_v45, %v4890_v8  ;;  %v4893_v0 = vpop.f32.mrb[86].mxu1  ;;  %v4860_v19 = vpop.f32.mrb[87].mxu0 }
 0x1a2   :  { %v4894_v3 = vpop.f32.mrb[87].mxu1  ;;  %v4861_v52 = vadd.f32 %v4860_v19, %v4859_v41 }
 0x1a3   :  { %v2139_v51 = vadd.f32 %v4892_v39, %v4846_v13  ;;  %v4895_v47 = vadd.f32 %v4894_v3, %v4893_v0 }
 0x1a5   :  { %v2142_v53 = vadd.f32 %v4895_v47, %v4849_v34 }
 0x1a6   :  { %v4862_v21 = vpop.f32.mrb[88].mxu0 }
 0x1a7   :  { %v4896_v63 = vpop.f32.mrb[88].mxu1  ;;  %v4863_v22 = vpop.f32.mrb[89].mxu0 }
 0x1a8   :  { %v4897_v55 = vpop.f32.mrb[89].mxu1  ;;  %v4864_v40 = vadd.f32 %v4863_v22, %v4862_v21  ;;  %v4865_v17 = vpop.f32.mrb[90].mxu0 }
 0x1a9   :  { %v4898_v4 = vadd.f32 %v4897_v55, %v4896_v63  ;;  %v4899_v48 = vpop.f32.mrb[90].mxu1  ;;  %v4866_v62 = vpop.f32.mrb[91].mxu0 }
 0x1aa   :  { %v4900_v35 = vpop.f32.mrb[91].mxu1  ;;  %v4867_v27 = vadd.f32 %v4866_v62, %v4865_v17 }
 0x1ab   :  { %v2147_v46 = vadd.f32 %v4898_v4, %v4852_v29  ;;  %v4901_v58 = vadd.f32 %v4900_v35, %v4899_v48 }
 0x1ad   :  { %v2150_v11 = vadd.f32 %v4901_v58, %v4855_v57 }
 0x1ae   :  { %v4868_v43 = vpop.f32.mrb[92].mxu0 }
 0x1af   :  { %v4902_v30 = vpop.f32.mrb[92].mxu1  ;;  %v4869_v5 = vpop.f32.mrb[93].mxu0 }
 0x1b0   :  { %v4903_v13 = vpop.f32.mrb[93].mxu1  ;;  %v4870_v20 = vadd.f32 %v4869_v5, %v4868_v43  ;;  %v4871_v45 = vpop.f32.mrb[94].mxu0 }
 0x1b1   :  { %v4904_v8 = vadd.f32 %v4903_v13, %v4902_v30  ;;  %v4905_v34 = vpop.f32.mrb[94].mxu1  ;;  %v4872_v39 = vpop.f32.mrb[95].mxu0 }
 0x1b2   :  { %v4906_v7 = vpop.f32.mrb[95].mxu1 }
 0x1b3   :  { %v2155_v0 = vadd.f32 %v4904_v8, %v4858_v60  ;;  %v4907_v41 = vadd.f32 %v4906_v7, %v4905_v34 }
 0x1b5   :  { %v2158_v3 = vadd.f32 %v4907_v41, %v4861_v52 }
 0x1b6   :  { %v4936_v47 = vpop.f32.mrb[96].mxu0 }
 0x1b7   :  { %v4908_v19 = vpop.f32.mrb[96].mxu1  ;;  %v4937_v29 = vpop.f32.mrb[97].mxu0 }
 0x1b8   :  { %v4909_v63 = vpop.f32.mrb[97].mxu1  ;;  %v4938_v55 = vadd.f32 %v4937_v29, %v4936_v47  ;;  %v4939_v22 = vpop.f32.mrb[98].mxu0 }
 0x1b9   :  { %v4910_v21 = vadd.f32 %v4909_v63, %v4908_v19  ;;  %v4911_v57 = vpop.f32.mrb[98].mxu1  ;;  %v4940_v48 = vpop.f32.mrb[99].mxu0 }
 0x1ba   :  { %v4912_v4 = vpop.f32.mrb[99].mxu1  ;;  %v4941_v62 = vadd.f32 %v4940_v48, %v4939_v22  ;;  %v2211_v58 = vadd.f32 %v4938_v55, %v2139_v51 }
 0x1bb   :  { %v2163_v17 = vadd.f32 %v4910_v21, %v4864_v40  ;;  %v4913_v35 = vadd.f32 %v4912_v4, %v4911_v57 }
 0x1bc   :  { %v2214_v43 = vadd.f32 %v4941_v62, %v2142_v53 }
 0x1bd   :  { %v2166_v30 = vadd.f32 %v4913_v35, %v4867_v27 }
 0x1be   :  { %v4942_v60 = vpop.f32.mrb[100].mxu0 }
 0x1bf   :  { %v4914_v13 = vpop.f32.mrb[100].mxu1  ;;  %v4943_v52 = vpop.f32.mrb[101].mxu0 }
 0x1c0   :  { %v4915_v5 = vpop.f32.mrb[101].mxu1  ;;  %v4944_v34 = vadd.f32 %v4943_v52, %v4942_v60  ;;  %v4945_v7 = vpop.f32.mrb[102].mxu0 }
 0x1c1   :  { %v4916_v8 = vadd.f32 %v4915_v5, %v4914_v13  ;;  %v4917_v45 = vpop.f32.mrb[102].mxu1  ;;  %v4946_v41 = vpop.f32.mrb[103].mxu0 }
 0x1c2   :  { %v4918_v39 = vpop.f32.mrb[103].mxu1  ;;  %v4947_v47 = vadd.f32 %v4946_v41, %v4945_v7  ;;  %v2219_v63 = vadd.f32 %v4944_v34, %v2147_v46 }
 0x1c3   :  { %v2171_v19 = vadd.f32 %v4916_v8, %v4870_v20 }
 0x1c4   :  { %v2222_v29 = vadd.f32 %v4947_v47, %v2150_v11 }
 0x1c6   :  { %v4948_v40 = vpop.f32.mrb[104].mxu0 }
 0x1c7   :  { %v2282_v21 = vpop.f32.mrb[104].mxu1  ;;  %v4949_v51 = vpop.f32.mrb[105].mxu0 }
 0x1c8   :  { %v7194_v57 = vadd.f32 %v2282_v21, %v2211_v58  ;;  %v5256_v53 = vpop.f32.mrb[105].mxu1  ;;  %v4950_v27 = vadd.f32 %v4949_v51, %v4948_v40  ;;  %v4951_v55 = vpop.f32.mrb[106].mxu0 }
 0x1c9   :  { %v2285_v22 = vpop.f32.mrb[106].mxu1  ;;  %v4952_v48 = vpop.f32.mrb[107].mxu0 }
 0x1ca   :  { %v7196_v4 = vadd.f32 %v2285_v22, %v2214_v43  ;;  %v5257_v35 = vpop.f32.mrb[107].mxu1  ;;  %v4953_v62 = vadd.f32 %v4952_v48, %v4951_v55  ;;  %v2227_v13 = vadd.f32 %v4950_v27, %v2155_v0 }
 0x1cc   :  { %v2230_v60 = vadd.f32 %v4953_v62, %v2158_v3 }
 0x1ce   :  { %v4954_v20 = vpop.f32.mrb[108].mxu0 }
 0x1cf   :  { %v2290_v5 = vpop.f32.mrb[108].mxu1  ;;  %v4955_v11 = vpop.f32.mrb[109].mxu0 }
 0x1d0   :  { %v7198_v46 = vadd.f32 %v2290_v5, %v2219_v63  ;;  %v5260_v52 = vpop.f32.mrb[109].mxu1  ;;  %v4956_v58 = vadd.f32 %v4955_v11, %v4954_v20  ;;  %v4957_v8 = vpop.f32.mrb[110].mxu0 }
 0x1d1   :  { %v2293_v34 = vpop.f32.mrb[110].mxu1  ;;  %v4958_v7 = vpop.f32.mrb[111].mxu0 }
 0x1d2   :  { %v7200_v45 = vadd.f32 %v2293_v34, %v2222_v29  ;;  %v5261_v39 = vpop.f32.mrb[111].mxu1  ;;  %v4959_v43 = vadd.f32 %v4958_v7, %v4957_v8  ;;  %v2235_v41 = vadd.f32 %v4956_v58, %v2163_v17 }
 0x1d4   :  { %v2238_v47 = vadd.f32 %v4959_v43, %v2166_v30 }
 0x1d6   :  { %v4960_v40 = vpop.f32.mrb[112].mxu0 }
 0x1d7   :  { %v2298_v21 = vpop.f32.mrb[112].mxu1  ;;  %v4961_v3 = vpop.f32.mrb[113].mxu0 }
 0x1d8   :  { %v7202_v0 = vadd.f32 %v2298_v21, %v2227_v13  ;;  %v5264_v51 = vpop.f32.mrb[113].mxu1  ;;  %v4962_v63 = vadd.f32 %v4961_v3, %v4960_v40  ;;  %v4963_v27 = vpop.f32.mrb[114].mxu0 }
 0x1d9   :  { %v2301_v53 = vpop.f32.mrb[114].mxu1  ;;  %v4964_v48 = vpop.f32.mrb[115].mxu0 }
 0x1da   :  { %v7204_v55 = vadd.f32 %v2301_v53, %v2230_v60  ;;  %v5265_v22 = vpop.f32.mrb[115].mxu1  ;;  %v2243_v29 = vadd.f32 %v4962_v63, %v2171_v19 }
 0x1de   :  { %v4989_v62 = vpop.f32.mrb[116].mxu0 }
 0x1df   :  { %v2306_v35 = vpop.f32.mrb[116].mxu1  ;;  %v4990_v30 = vpop.f32.mrb[117].mxu0 }
 0x1e0   :  { %v7206_v20 = vadd.f32 %v2306_v35, %v2235_v41  ;;  %v5268_v17 = vpop.f32.mrb[117].mxu1  ;;  %v4991_v11 = vadd.f32 %v4990_v30, %v4989_v62  ;;  %v4992_v13 = vpop.f32.mrb[118].mxu0 }
 0x1e1   :  { %v2309_v5 = vpop.f32.mrb[118].mxu1  ;;  %v4993_v8 = vpop.f32.mrb[119].mxu0 }
 0x1e2   :  { %v7208_v52 = vadd.f32 %v2309_v5, %v2238_v47  ;;  %v5269_v58 = vpop.f32.mrb[119].mxu1  ;;  %v4994_v34 = vadd.f32 %v4993_v8, %v4992_v13 }
 0x1e6   :  { %v4995_v60 = vpop.f32.mrb[120].mxu0 }
 0x1e7   :  { %v2314_v7 = vpop.f32.mrb[120].mxu1  ;;  %v4996_v19 = vpop.f32.mrb[121].mxu0 }
 0x1e8   :  { %v7210_v39 = vadd.f32 %v2314_v7, %v2243_v29  ;;  %v5272_v43 = vpop.f32.mrb[121].mxu1  ;;  %v4997_v21 = vadd.f32 %v4996_v19, %v4995_v60  ;;  %v4998_v41 = vpop.f32.mrb[122].mxu0 }
 0x1e9   :  { %v2317_v40 = vpop.f32.mrb[122].mxu1  ;;  %v4999_v51 = vpop.f32.mrb[123].mxu0 }
 0x1ea   :  { %v5273_v3 = vpop.f32.mrb[123].mxu1  ;;  %v5000_v63 = vadd.f32 %v4999_v51, %v4998_v41 }
 0x1ee   :  { %v5001_v27 = vpop.f32.mrb[124].mxu0 }
 0x1ef   :  { %v5035_v53 = vpop.f32.mrb[124].mxu1  ;;  %v5002_v47 = vpop.f32.mrb[125].mxu0 }
 0x1f0   :  { %v5036_v22 = vpop.f32.mrb[125].mxu1  ;;  %v5003_v62 = vadd.f32 %v5002_v47, %v5001_v27  ;;  %v5004_v17 = vpop.f32.mrb[126].mxu0 }
 0x1f1   :  { %v5037_v48 = vadd.f32 %v5036_v22, %v5035_v53  ;;  %v5038_v35 = vpop.f32.mrb[126].mxu1  ;;  %v5005_v5 = vpop.f32.mrb[127].mxu0 }
 0x1f2   :  { %v5039_v30 = vpop.f32.mrb[127].mxu1  ;;  %v5006_v58 = vadd.f32 %v5005_v5, %v5004_v17 }
 0x1f3   :  { %v2828_v29 = vadd.f32 %v5037_v48, %v4991_v11  ;;  %v5040_v13 = vadd.f32 %v5039_v30, %v5038_v35 }
 0x1f5   :  { %v2831_v8 = vadd.f32 %v5040_v13, %v4994_v34 }
 0x1f6   :  { %v5007_v60 = vpop.f32.mrb[128].mxu0 }
 0x1f7   :  { %v5041_v7 = vpop.f32.mrb[128].mxu1  ;;  %v5008_v19 = vpop.f32.mrb[129].mxu0 }
 0x1f8   :  { %v5042_v43 = vpop.f32.mrb[129].mxu1  ;;  %v5009_v3 = vadd.f32 %v5008_v19, %v5007_v60  ;;  %v5010_v51 = vpop.f32.mrb[130].mxu0 }
 0x1f9   :  { %v5043_v40 = vadd.f32 %v5042_v43, %v5041_v7  ;;  %v5044_v41 = vpop.f32.mrb[130].mxu1  ;;  %v5011_v9 = vpop.f32.mrb[131].mxu0 }
 0x1fa   :  { %v5045_v33 = vpop.f32.mrb[131].mxu1  ;;  %v5012_v27 = vadd.f32 %v5011_v9, %v5010_v51 }
 0x1fb   :  { %v2836_v53 = vadd.f32 %v5043_v40, %v4997_v21  ;;  %v5046_v22 = vadd.f32 %v5045_v33, %v5044_v41 }
 0x1fd   :  { %v2839_v47 = vadd.f32 %v5046_v22, %v5000_v63 }
 0x1fe   :  { %v5013_v16 = vpop.f32.mrb[132].mxu0 }
 0x1ff   :  { %v5047_v31 = vpop.f32.mrb[132].mxu1  ;;  %v5014_v48 = vpop.f32.mrb[133].mxu0 }
 0x200   :  { %v5048_v11 = vpop.f32.mrb[133].mxu1  ;;  %v5015_v17 = vadd.f32 %v5014_v48, %v5013_v16  ;;  %v5016_v30 = vpop.f32.mrb[134].mxu0 }
 0x201   :  { %v5049_v35 = vadd.f32 %v5048_v11, %v5047_v31  ;;  %v5050_v34 = vpop.f32.mrb[134].mxu1  ;;  %v5017_v13 = vpop.f32.mrb[135].mxu0 }
 0x202   :  { %v5051_v5 = vpop.f32.mrb[135].mxu1 }
 0x203   :  { %v2844_v7 = vadd.f32 %v5049_v35, %v5003_v62  ;;  %v5052_v43 = vadd.f32 %v5051_v5, %v5050_v34 }
 0x205   :  { %v2847_v60 = vadd.f32 %v5052_v43, %v5006_v58 }
 0x206   :  { %v5081_v61 = vpop.f32.mrb[136].mxu0 }
 0x207   :  { %v5053_v19 = vpop.f32.mrb[136].mxu1  ;;  %v5082_v21 = vpop.f32.mrb[137].mxu0 }
 0x208   :  { %v5054_v15 = vpop.f32.mrb[137].mxu1  ;;  %v5083_v9 = vadd.f32 %v5082_v21, %v5081_v61  ;;  %v5084_v40 = vpop.f32.mrb[138].mxu0 }
 0x209   :  { %v5055_v33 = vadd.f32 %v5054_v15, %v5053_v19  ;;  %v5056_v63 = vpop.f32.mrb[138].mxu1  ;;  %v5085_v51 = vpop.f32.mrb[139].mxu0 }
 0x20a   :  { %v5057_v41 = vpop.f32.mrb[139].mxu1  ;;  %v5086_v16 = vadd.f32 %v5085_v51, %v5084_v40  ;;  %v2900_v11 = vadd.f32 %v5083_v9, %v2828_v29 }
 0x20b   :  { %v7212_v22 = vadd.f32 %v5055_v33, %v5009_v3  ;;  %v5058_v31 = vadd.f32 %v5057_v41, %v5056_v63 }
 0x20c   :  { %v2903_v62 = vadd.f32 %v5086_v16, %v2831_v8 }
 0x20d   :  { %v7214_v48 = vadd.f32 %v5058_v31, %v5012_v27 }
 0x20e   :  { %v5087_v58 = vpop.f32.mrb[140].mxu0 }
 0x20f   :  { %v5059_v35 = vpop.f32.mrb[140].mxu1  ;;  %v5088_v30 = vpop.f32.mrb[141].mxu0 }
 0x210   :  { %v5060_v34 = vpop.f32.mrb[141].mxu1  ;;  %v5089_v13 = vadd.f32 %v5088_v30, %v5087_v58  ;;  %v5090_v61 = vpop.f32.mrb[142].mxu0 }
 0x211   :  { %v5061_v5 = vadd.f32 %v5060_v34, %v5059_v35  ;;  %v5062_v15 = vpop.f32.mrb[142].mxu1  ;;  %v5091_v19 = vpop.f32.mrb[143].mxu0 }
 0x212   :  { %v5063_v43 = vpop.f32.mrb[143].mxu1  ;;  %v5092_v3 = vadd.f32 %v5091_v19, %v5090_v61  ;;  %v2908_v33 = vadd.f32 %v5089_v13, %v2836_v53 }
 0x213   :  { %v7216_v21 = vadd.f32 %v5061_v5, %v5015_v17  ;;  %v7222_v17 = vld [vmem:[%s7524_s2] ss:$0 sm:$0xff] }
 0x214   :  { %v2911_v63 = vadd.f32 %v5092_v3, %v2839_v47 }
 0x216   :  { %v5093_v40 = vpop.f32.mrb[144].mxu0 }
 0x217   :  { %v2971_v29 = vpop.f32.mrb[144].mxu1  ;;  %v5094_v9 = vpop.f32.mrb[145].mxu0 }
 0x218   :  { %v2972_v27 = vadd.f32 %v2971_v29, %v2900_v11  ;;  %v5280_v8 = vpop.f32.mrb[145].mxu1  ;;  %v5095_v41 = vadd.f32 %v5094_v9, %v5093_v40  ;;  %v5096_v51 = vpop.f32.mrb[146].mxu0 }
 0x219   :  { %v2974_v31 = vpop.f32.mrb[146].mxu1  ;;  %v5097_v58 = vpop.f32.mrb[147].mxu0 }
 0x21a   :  { %v3009_v16 = vmax.f32 %v7194_v57, %v2972_v27  ;;  %v2975_v35 = vadd.f32 %v2974_v31, %v2903_v62  ;;  %v5281_v34 = vpop.f32.mrb[147].mxu1  ;;  %v5098_v53 = vadd.f32 %v5097_v58, %v5096_v51  ;;  %v2916_v47 = vadd.f32 %v5095_v41, %v2844_v7  ;;  %v4480_v57 = vld [vmem:[%s7523_s3 + $0xc0] sm:$0xff]  ;;  %v4481_v62 = vld [vmem:[%s7523_s3 + $0xc8] sm:$0xff]  ;;  %v4473_v31 = vld [vmem:[%s7523_s3 + $0x90] sm:$0xff] }
 0x21b   :  { %v5513_v15 = vpack.c.bf16 %v4481_v62, %v4480_v57  ;;  %v5501_v27 = vpack.c.bf16 %v4472_v54, %v4471_v14  ;;  %v5516_v58 = vpack.c.bf16 %v4483_v2, %v4482_v28  ;;  %v5522_v28 = vpack.c.bf16 %v4487_v24, %v4486_v18 }
 0x21c   :  { %v3018_v11 = vmax.f32 %v1622_v26, %v3009_v16  ;;  %v3010_v30 = vmax.f32 %v7196_v4, %v2975_v35  ;;  %v7234_v5 = vadd.f32 %v5098_v53, %v2847_v60  ;;  %v4474_v16 = vld [vmem:[%s7523_s3 + $0x98] sm:$0xff]  ;;  %v4484_v53 = vld [vmem:[%s7523_s3 + $0xe0] sm:$0xff] }
 0x21e   :  { %v3034_v13 = vadd.f32 %v7222_v17, %v3018_v11  ;;  %v3019_v7 = vmax.f32 %v1623_v44, %v3010_v30  ;;  %v5099_v26 = vpop.f32.mrb[148].mxu0  ;;  %v5504_v11 = vpack.c.bf16 %v4474_v16, %v4473_v31 }
 0x21f   :  { %v2979_v4 = vpop.f32.mrb[148].mxu1  ;;  %v5100_v19 = vpop.f32.mrb[149].mxu0 }
 0x220   :  { %v3043_v60 = vmax.f32 %v3034_v13, 0.0  ;;  %v3035_v61 = vadd.f32 %v7222_v17, %v3019_v7  ;;  %v2980_v43 = vadd.f32 %v2979_v4, %v2908_v33  ;;  %v5284_v3 = vpop.f32.mrb[149].mxu1  ;;  %v5101_v44 = vadd.f32 %v5100_v19, %v5099_v26  ;;  %v5102_v40 = vpop.f32.mrb[150].mxu0  ;;  %v4478_v19 = vld [vmem:[%s7523_s3 + $0xb8] sm:$0xff] }
 0x221   :  { %v2982_v29 = vpop.f32.mrb[150].mxu1  ;;  %v5103_v51 = vpop.f32.mrb[151].mxu0 }
 0x222   :  { %v3044_v9 = vmax.f32 %v3035_v61, 0.0  ;;  %v3011_v8 = vmax.f32 %v7198_v46, %v2980_v43  ;;  %v2983_v41 = vadd.f32 %v2982_v29, %v2911_v63  ;;  %5334 = vmatmul.mubr.msk.f32.vlgmr.msra.gmra.mrb[164].mxu1 %vm3069_vm2, %v3043_v60  ;;  %v5285_v33 = vpop.f32.mrb[151].mxu1  ;;  %v5104_v35 = vadd.f32 %v5103_v51, %v5102_v40  ;;  %v4477_v43 = vld [vmem:[%s7523_s3 + $0xb0] sm:$0xff]  ;;  %v4498_v29 = vld [vmem:[%s7523_s3 + $0x140] sm:$0xff] }
 0x223   :  { %5514 = vmatpush3.bf16.msra.mxu1 %v5513_v15  ;;  %v2924_v34 = vadd.f32 %v5101_v44, %v7212_v22  ;;  %5371 = vmatprep.mubr.msk.f32.mxu1 %vm5889_vm0, %v5888_v10  ;;  %v4485_v22 = vld [vmem:[%s7523_s3 + $0xe8] sm:$0xff] }
 0x224   :  { %v3020_v46 = vmax.f32 %v1624_v50, %v3011_v8  ;;  %v3012_v63 = vmax.f32 %v7200_v45, %v2983_v41  ;;  %5315 = vmatmul.mubr.msk.f32.vlgmr.msra.gmra.mrb[156].mxu0 %vm3069_vm2, %v3044_v9  ;;  %5515 = vmatprep.subr.bf16.mxu1 %v5890_v56  ;;  %v2927_v30 = vadd.f32 %v5104_v35, %v7214_v48  ;;  %v4475_v50 = vld [vmem:[%s7523_s3 + $0xa0] sm:$0xff]  ;;  %v4476_v45 = vld [vmem:[%s7523_s3 + $0xa8] sm:$0xff] }
 0x225   :  { %5502 = vmatpush3.bf16.msra.mxu0 %v5501_v27  ;;  %5352 = vmatprep.mubr.msk.f32.mxu0 %vm5889_vm0, %v5888_v10  ;;  %v5519_v62 = vpack.c.bf16 %v4485_v22, %v4484_v53  ;;  %v5507_v4 = vpack.c.bf16 %v4476_v45, %v4475_v50  ;;  %v4499_v27 = vld [vmem:[%s7523_s3 + $0x148] sm:$0xff]  ;;  %v4491_v22 = vld [vmem:[%s7523_s3 + $0x110] sm:$0xff]  ;;  %v4502_v50 = vld [vmem:[%s7523_s3 + $0x160] sm:$0xff] }
 0x226   :  { %v3021_v6 = vmax.f32 %v7529_v25, %v3012_v63  ;;  %5503 = vmatprep.subr.bf16.mxu0 %v5890_v56  ;;  %v5105_v57 = vpop.f32.mrb[152].mxu0  ;;  %v3036_v9 = vadd.f32 %v7222_v17, %v3020_v46  ;;  %v4490_v8 = vld [vmem:[%s7523_s3 + $0x108] sm:$0xff]  ;;  %v5537_v51 = vpack.c.bf16 %v4499_v27, %v4498_v29 }
 0x227   :  { %5517 = vmatpush3.bf16.msra.mxu1 %v5516_v58  ;;  %v2987_v48 = vpop.f32.mrb[152].mxu1  ;;  %v5106_v7 = vpop.f32.mrb[153].mxu0  ;;  %v4503_v45 = vld [vmem:[%s7523_s3 + $0x168] sm:$0xff] }
 0x228   :  { %v2988_v13 = vadd.f32 %v2987_v48, %v2916_v47  ;;  %v5288_v14 = vpop.f32.mrb[153].mxu1  ;;  %5518 = vmatprep.subr.bf16.mxu1 %v5890_v56  ;;  %v5107_v54 = vadd.f32 %v5106_v7, %v5105_v57  ;;  %v5108_v15 = vpop.f32.mrb[154].mxu0  ;;  %v3045_v46 = vmax.f32 %v3036_v9, 0.0  ;;  %v4494_v48 = vld [vmem:[%s7523_s3 + $0x128] sm:$0xff]  ;;  %v4510_v9 = vld [vmem:[%s7523_s3 + $0x198] sm:$0xff] }
 0x229   :  { %5505 = vmatpush3.bf16.msra.mxu0 %v5504_v11  ;;  %v2990_v26 = vpop.f32.mrb[154].mxu1  ;;  %v5109_v3 = vpop.f32.mrb[155].mxu0  ;;  %v4492_v11 = vld [vmem:[%s7523_s3 + $0x118] sm:$0xff] }
 0x22a   :  { %v3013_v60 = vmax.f32 %v7202_v0, %v2988_v13  ;;  %v2991_v47 = vadd.f32 %v2990_v26, %v7234_v5  ;;  %5506 = vmatprep.subr.bf16.mxu0 %v5890_v56  ;;  %v5289_v61 = vpop.f32.mrb[155].mxu1  ;;  %v2932_v2 = vadd.f32 %v5107_v54, %v7216_v21  ;;  %v3037_v0 = vadd.f32 %v7222_v17, %v3021_v6  ;;  %v4495_v26 = vld [vmem:[%s7523_s3 + $0x130] sm:$0xff] }
 0x22b   :  { %5520 = vmatpush3.bf16.msra.mxu1 %v5519_v62  ;;  %v7530_v5 = vmax.f32 %v7055_v36, %v7131_v42  ;;  %v5510_v21 = vpack.c.bf16 %v4478_v19, %v4477_v43  ;;  %v7531_v36 = vmax.f32 %v7057_v37, %v7135_v49  ;;  %v4500_v37 = vld [vmem:[%s7523_s3 + $0x150] sm:$0xff]  ;;  %v4501_v49 = vld [vmem:[%s7523_s3 + $0x158] sm:$0xff]  ;;  %v5528_v57 = vpack.c.bf16 %v4492_v11, %v4491_v22  ;;  %v4517_v19 = vld [vmem:[%s7523_s3 + $0x1c8] sm:$0xff] }
 0x22c   :  { %v3014_v40 = vmax.f32 %v7204_v55, %v2991_v47  ;;  %5521 = vmatprep.subr.bf16.mxu1 %v5890_v56  ;;  %v4489_v55 = vld [vmem:[%s7523_s3 + $0x100] sm:$0xff]  ;;  %v3046_v33 = vmax.f32 %v3037_v0, 0.0  ;;  %v5540_v25 = vpack.c.bf16 %v4501_v49, %v4500_v37  ;;  %v5543_v13 = vpack.c.bf16 %v4503_v45, %v4502_v50  ;;  %v4513_v49 = vld [vmem:[%s7523_s3 + $0x1b0] sm:$0xff]  ;;  %v4526_v22 = vld [vmem:[%s7523_s3 + $0x208] sm:$0xff] }
 0x22d   :  { %v7310_v44 = vmax.f32 %v7530_v5, %v3013_v60  ;;  %5508 = vmatpush3.bf16.msra.mxu0 %v5507_v4  ;;  %v5525_v58 = vpack.c.bf16 %v4490_v8, %v4489_v55  ;;  %v4496_v4 = vld [vmem:[%s7523_s3 + $0x138] sm:$0xff]  ;;  %v7534_v61 = vmax.f32 %v7077_v23, %v7174_v1  ;;  %v4507_v23 = vld [vmem:[%s7523_s3 + $0x180] sm:$0xff]  ;;  %v4508_v1 = vld [vmem:[%s7523_s3 + $0x188] sm:$0xff] }
 0x22e   :  { %v3023_v42 = vmax.f32 %v7531_v36, %v3014_v40  ;;  %5509 = vmatprep.subr.bf16.mxu0 %v5890_v56  ;;  %v5534_v3 = vpack.c.bf16 %v4496_v4, %v4495_v26  ;;  %v4519_v40 = vld [vmem:[%s7523_s3 + $0x1d8] sm:$0xff]  ;;  %v5549_v29 = vpack.c.bf16 %v4508_v1, %v4507_v23  ;;  %v4521_v55 = vld [vmem:[%s7523_s3 + $0x1e8] sm:$0xff]  ;;  %v4529_v50 = vld [vmem:[%s7523_s3 + $0x220] sm:$0xff] }
 0x22f   :  { %5523 = vmatpush3.bf16.msra.mxu1 %v5522_v28  ;;  %v2995_v41 = vpop.f32.mrb[156].mxu1  ;;  %v3038_v28 = vadd.f32 %v7222_v17, %v7310_v44  ;;  %v4518_v44 = vld [vmem:[%s7523_s3 + $0x1d0] sm:$0xff]  ;;  %v4530_v45 = vld [vmem:[%s7523_s3 + $0x228] sm:$0xff] }
 0x230   :  { %v2996_v31 = vadd.f32 %v2995_v41, %v2924_v34  ;;  %v5292_v16 = vpop.f32.mrb[157].mxu1  ;;  %5536 = vmatprep.subr.bf16.mxu1 %v5890_v56  ;;  %v3039_v47 = vadd.f32 %v7222_v17, %v3023_v42  ;;  %v5564_v36 = vpack.c.bf16 %v4519_v40, %v4518_v44  ;;  %v4520_v42 = vld [vmem:[%s7523_s3 + $0x1e0] sm:$0xff] }
 0x231   :  { %5511 = vmatpush3.bf16.msra.mxu0 %v5510_v21  ;;  %v2998_v35 = vpop.f32.mrb[158].mxu1  ;;  %v3047_v27 = vmax.f32 %v3038_v28, 0.0  ;;  %v4509_v21 = vld [vmem:[%s7523_s3 + $0x190] sm:$0xff]  ;;  %v4511_v41 = vld [vmem:[%s7523_s3 + $0x1a0] sm:$0xff]  ;;  %v4523_v16 = vld [vmem:[%s7523_s3 + $0x1f8] sm:$0xff] }
 0x232   :  { %v3015_v63 = vmax.f32 %v7206_v20, %v2996_v31  ;;  %v2999_v53 = vadd.f32 %v2998_v35, %v2927_v30  ;;  %5372 = vmatmul.mubr.msk.f32.vlgmr.msra.gmra.mrb[166].mxu1 %vm3069_vm2, %v3046_v33  ;;  %5524 = vmatprep.subr.bf16.mxu0 %v5890_v56  ;;  %v5293_v34 = vpop.f32.mrb[159].mxu1  ;;  %v7532_v20 = vmax.f32 %v7066_v59, %v7146_v12  ;;  %v3048_v5 = vmax.f32 %v3039_v47, 0.0  ;;  %v4522_v31 = vld [vmem:[%s7523_s3 + $0x1f0] sm:$0xff]  ;;  %v4514_v35 = vld [vmem:[%s7523_s3 + $0x1b8] sm:$0xff]  ;;  %v4534_v40 = vld [vmem:[%s7527_s4] ss:$0 sm:$0xff] }
 0x233   :  { %5538 = vmatpush3.bf16.msra.mxu1 %v5537_v51  ;;  %5409 = vmatprep.mubr.msk.f32.mxu1 %vm5889_vm0, %v5888_v10  ;;  %v7533_v59 = vmax.f32 %v7068_v32, %v7151_v38  ;;  %v4504_v32 = vld [vmem:[%s7523_s3 + $0x170] sm:$0xff]  ;;  %v4505_v38 = vld [vmem:[%s7523_s3 + $0x178] sm:$0xff]  ;;  %v5552_v8 = vpack.c.bf16 %v4510_v9, %v4509_v21  ;;  %v4512_v51 = vld [vmem:[%s7523_s3 + $0x1a8] sm:$0xff]  ;;  %v5567_v33 = vpack.c.bf16 %v4521_v55, %v4520_v42 }
 0x234   :  { %v7352_v30 = vmax.f32 %v7532_v20, %v3015_v63  ;;  %v3016_v6 = vmax.f32 %v7208_v52, %v2999_v53  ;;  %5353 = vmatmul.mubr.msk.f32.vlgmr.msra.gmra.mrb[158].mxu0 %vm3069_vm2, %v3045_v46  ;;  %5539 = vmatprep.subr.bf16.mxu1 %v5890_v56  ;;  %v4493_v52 = vld [vmem:[%s7523_s3 + $0x120] sm:$0xff]  ;;  %v5546_v60 = vpack.c.bf16 %v4505_v38, %v4504_v32 }
 0x235   :  { %5526 = vmatpush3.bf16.msra.mxu0 %v5525_v58  ;;  %5390 = vmatprep.mubr.msk.f32.mxu0 %vm5889_vm0, %v5888_v10  ;;  %v5531_v18 = vpack.c.bf16 %v4494_v48, %v4493_v52  ;;  %v5555_v37 = vpack.c.bf16 %v4512_v51, %v4511_v41  ;;  %v5570_v58 = vpack.c.bf16 %v4523_v16, %v4522_v31  ;;  %v4525_v34 = vld [vmem:[%s7523_s3 + $0x200] sm:$0xff] }
 0x236   :  { %v7368_v12 = vmax.f32 %v7533_v59, %v3016_v6  ;;  %5527 = vmatprep.subr.bf16.mxu0 %v5890_v56  ;;  %v5558_v63 = vpack.c.bf16 %v4514_v35, %v4513_v49  ;;  %v3040_v53 = vadd.f32 %v7222_v17, %v7352_v30  ;;  %v4528_v30 = vld [vmem:[%s7523_s3 + $0x218] sm:$0xff]  ;;  %v4531_v59 = vld [vmem:[%s7523_s3 + $0x230] sm:$0xff]  ;;  %v3806_v48 = vld [vmem:[%s7525_s5] sm:$0xff] }
 0x237   :  { %5541 = vmatpush3.bf16.msra.mxu1 %v5540_v25  ;;  %v3003_v62 = vpop.f32.mrb[160].mxu1  ;;  %v5573_v25 = vpack.c.bf16 %v4526_v22, %v4525_v34 }
 0x238   :  { %v3004_v7 = vadd.f32 %v3003_v62, %v2932_v2  ;;  %5542 = vmatprep.subr.bf16.mxu1 %v5890_v56  ;;  %v5296_v14 = vpop.f32.mrb[161].mxu1  ;;  %v3041_v46 = vadd.f32 %v7222_v17, %v7368_v12  ;;  %v3049_v20 = vmax.f32 %v3040_v53, 0.0  ;;  %v3807_v62 = vld [vmem:[%s7525_s5 + $0x8] sm:$0x3] }
 0x239   :  { %5529 = vmatpush3.bf16.msra.mxu0 %v5528_v57  ;;  %v3006_v24 = vpop.f32.mrb[162].mxu1  ;;  %v5579_v57 = vpack.c.bf16 %v4530_v45, %v4529_v50 }
 0x23a   :  { %v3017_v54 = vmax.f32 %v7210_v39, %v3004_v7  ;;  %5530 = vmatprep.subr.bf16.mxu0 %v5890_v56  ;;  %v5297_v15 = vpop.f32.mrb[163].mxu1  ;;  %v4516_v39 = vld [vmem:[%s7523_s3 + $0x1c0] sm:$0xff]  ;;  %v3050_v11 = vmax.f32 %v3041_v46, 0.0 }
 0x23b   :  { %5544 = vmatpush3.bf16.msra.mxu1 %v5543_v13  ;;  %v5561_v0 = vpack.c.bf16 %v4517_v19, %v4516_v39  ;;  %v5585_v13 = vpack.c.bf16 %v3807_v62, %v3806_v48 }
 0x23c   :  { %v3026_v43 = vmax.f32 %v7534_v61, %v3017_v54  ;;  %5545 = vmatprep.subr.bf16.mxu1 %v5890_v56 }
 0x23d   :  { %5532 = vmatpush3.bf16.msra.mxu0 %v5531_v18 }
 0x23e   :  { %v7406_v2 = vadd.f32 %v7222_v17, %v3026_v43  ;;  %5533 = vmatprep.subr.bf16.mxu0 %v5890_v56  ;;  %v4527_v17 = vld [vmem:[%s7523_s3 + $0x210] sm:$0xff] }
 0x23f   :  { %5547 = vmatpush3.bf16.msra.mxu1 %v5546_v60  ;;  %v5576_v6 = vpack.c.bf16 %v4528_v30, %v4527_v17 }
 0x240   :  { %5560 = vmatprep.subr.bf16.mxu1 %v5890_v56  ;;  %v3051_v52 = vmax.f32 %v7406_v2, 0.0 }
 0x241   :  { %5535 = vmatpush3.bf16.msra.mxu0 %v5534_v3 }
 0x242   :  { %5410 = vmatmul.mubr.msk.f32.vlgmr.msra.gmra.mrb[168].mxu1 %vm3069_vm2, %v3048_v5  ;;  %5548 = vmatprep.subr.bf16.mxu0 %v5890_v56 }
 0x243   :  { %5562 = vmatpush3.bf16.msra.mxu1 %v5561_v0  ;;  %5447 = vmatprep.mubr.msk.f32.mxu1 %vm5889_vm0, %v5888_v10 }
 0x244   :  { %5391 = vmatmul.mubr.msk.f32.vlgmr.msra.gmra.mrb[160].mxu0 %vm3069_vm2, %v3047_v27  ;;  %5563 = vmatprep.subr.bf16.mxu1 %v5890_v56 }
 0x245   :  { %5550 = vmatpush3.bf16.msra.mxu0 %v5549_v29  ;;  %5428 = vmatprep.mubr.msk.f32.mxu0 %vm5889_vm0, %v5888_v10 }
 0x246   :  { %5551 = vmatprep.subr.bf16.mxu0 %v5890_v56 }
 0x247   :  { %5565 = vmatpush3.bf16.msra.mxu1 %v5564_v36 }
 0x248   :  { %5566 = vmatprep.subr.bf16.mxu1 %v5890_v56 }
 0x249   :  { %5553 = vmatpush3.bf16.msra.mxu0 %v5552_v8 }
 0x24a   :  { %5554 = vmatprep.subr.bf16.mxu0 %v5890_v56 }
 0x24b   :  { %5568 = vmatpush3.bf16.msra.mxu1 %v5567_v33 }
 0x24c   :  { %5569 = vmatprep.subr.bf16.mxu1 %v5890_v56 }
 0x24d   :  { %5556 = vmatpush3.bf16.msra.mxu0 %v5555_v37 }
 0x24e   :  { %5557 = vmatprep.subr.bf16.mxu0 %v5890_v56 }
 0x24f   :  { %5571 = vmatpush3.bf16.msra.mxu1 %v5570_v58 }
 0x250   :  { %5584 = vmatprep.subr.bf16.mxu1 %v5890_v56 }
 0x251   :  { %5559 = vmatpush3.bf16.msra.mxu0 %v5558_v63 }
 0x252   :  { %5448 = vmatmul.mubr.msk.f32.vlgmr.msra.gmra.mrb[170].mxu1 %vm3069_vm2, %v3050_v11  ;;  %5572 = vmatprep.subr.bf16.mxu0 %v5890_v56 }
 0x253   :  { %5473 = vmatprep.mubr.msk.f32.mxu1 %vm5889_vm0, %v5888_v10  ;;  %5587 = vmatpush3.bf16.msk.msra.mxu1 %vm5586_vm5, %v5585_v13 }
 0x254   :  { %5429 = vmatmul.mubr.msk.f32.vlgmr.msra.gmra.mrb[162].mxu0 %vm3069_vm2, %v3049_v20 }
 0x255   :  { %5574 = vmatpush3.bf16.msra.mxu0 %v5573_v25  ;;  %5466 = vmatprep.mubr.msk.f32.mxu0 %vm5889_vm0, %v5888_v10  ;;  %v4532_v10 = vld [vmem:[%s7523_s3 + $0x238] sm:$0xff] }
 0x256   :  { %5575 = vmatprep.subr.bf16.mxu0 %v5890_v56  ;;  %v5582_v12 = vpack.c.bf16 %v4532_v10, %v4531_v59 }
 0x259   :  { %5577 = vmatpush3.bf16.msra.mxu0 %v5576_v6 }
 0x25a   :  { %5578 = vmatprep.subr.bf16.mxu0 %v5890_v56 }
 0x25d   :  { %5580 = vmatpush3.bf16.msra.mxu0 %v5579_v57 }
 0x25e   :  { %5581 = vmatprep.subr.bf16.mxu0 %v5890_v56  ;;  %v12_v56 = vstv %s7526_s6 }
 0x25f   :  { %13 = vst [vmem:[#allocation2] sm:$0x1] %v12_v56 }
 0x261   :  { %5583 = vmatpush3.bf16.msra.mxu0 %v5582_v12 }
 0x264   :  { %5467 = vmatmul.mubr.msk.f32.vlgmr.msra.gmra.mrb[164].mxu0 %vm3069_vm2, %v3051_v52 }
 0x266   :  { %v4535_v36 = vld [vmem:[#allocation2] ss:$0 sm:$0xff] }
 0x2f5   :  { %v3212_v7 = vpop.f32.mrb[164].mxu1 }
 0x2f6   :  { %v5335_v32 = vpop.f32.mrb[165].mxu1 }
 0x2f7   :  { %v3139_v38 = vpop.f32.mrb[156].mxu0 }
 0x2f8   :  { %v3213_v14 = vadd.f32 %v3212_v7, %v3139_v38  ;;  %v5316_v18 = vpop.f32.mrb[157].mxu0 }
 0x305   :  { %v3377_v24 = vpop.f32.mrb[166].mxu1 }
 0x306   :  { %v5373_v54 = vpop.f32.mrb[167].mxu1 }
 0x307   :  { %v3294_v26 = vpop.f32.mrb[158].mxu0 }
 0x308   :  { %v3298_v4 = vadd.f32 %v3294_v26, %v3213_v14  ;;  %v5354_v15 = vpop.f32.mrb[159].mxu0 }
 0x30a   :  { %v3381_v60 = vadd.f32 %v3377_v24, %v3298_v4 }
 0x315   :  { %v3543_v47 = vpop.f32.mrb[168].mxu1 }
 0x316   :  { %v5411_v61 = vpop.f32.mrb[169].mxu1 }
 0x317   :  { %v3460_v43 = vpop.f32.mrb[160].mxu0 }
 0x318   :  { %v3464_v39 = vadd.f32 %v3460_v43, %v3381_v60  ;;  %v5392_v19 = vpop.f32.mrb[161].mxu0 }
 0x31a   :  { %v3547_v3 = vadd.f32 %v3543_v47, %v3464_v39 }
 0x325   :  { %v3709_v28 = vpop.f32.mrb[170].mxu1 }
 0x326   :  { %v5449_v2 = vpop.f32.mrb[171].mxu1 }
 0x327   :  { %v3626_v23 = vpop.f32.mrb[162].mxu0 }
 0x328   :  { %v3630_v1 = vadd.f32 %v3626_v23, %v3547_v3  ;;  %v5430_v0 = vpop.f32.mrb[163].mxu0 }
 0x32a   :  { %v3713_v5 = vadd.f32 %v3709_v28, %v3630_v1 }
 0x337   :  { %v3792_v44 = vpop.f32.mrb[164].mxu0 }
 0x338   :  { %v3796_v29 = vadd.f32 %v3792_v44, %v3713_v5  ;;  %v5468_v27 = vpop.f32.mrb[165].mxu0 }
 0x33a   :  { %v3804_v21 = vadd.f32 %v4534_v40, %v3796_v29 }
 0x33c   :  { %v3805_v9 = vmax.f32 %v3804_v21, 0.0 }
 0x33e   :  { %5474 = vmatmul.mubr.msk.f32.vlgmr.msra.gmra.mrb[172].mxu1 %vm3815_vm6, %v3805_v9 }
 0x411   :  { %v3889_v42 = vpop.f32.mrb[172].mxu1 }
 0x412   :  { %v3890_v55 = vadd.f32 %v4535_v36, %v3889_v42  ;;  %v5475_v8 = vpop.f32.mrb[173].mxu1 }
 0x414   :  { %v3893_v41 = vsub.f32 0.0, %v3890_v55 }
 0x416   :  { %v3894_v51 = vmul.f32 1.442695, %v3893_v41 }
 0x418   :  { %5855 = vpow2.f32 %v3894_v51 }
 0x422   :  { %v5856_v33 = vpop.eup %5855 }
 0x423   :  { %v3896_v31 = vadd.f32 1.0, %v5856_v33 }
 0x425   :  { %5857 = vrcp.f32 %v3896_v31 }
 0x42f   :  { %v5858_v16 = vpop.eup %5857 }
 0x430   :  { %3900 = vst.msk [vmem:[%s7528_s7] sm:$0xff] %vm3899_vm7, %v5858_v16 }

</bundles_post_ra>
